<compile_context>
chip_gen: v6e
topology: v6e:2x2x1
jax: 0.10.0
libtpu: 0.0.40
codegen_flags: <defaults>
</compile_context>

<pallas_src>
from functools import partial

import numpy as np
import jax
import jax.numpy as jnp
from jax.experimental import pallas as pl
from jax.experimental.pallas import tpu as pltpu

_EPS = 1e-5


# ---------------------------------------------------------------------------
# Wavelet filters (db1 / Haar), mirroring create_wavelet_filter().
# TODO(synk): coefficients hardcoded for the default wave='db1' (no pywt here).
# ---------------------------------------------------------------------------
def _db1_filters():
    c = 1.0 / np.sqrt(2.0)
    dec_lo = np.array([c, c], np.float32)[::-1]
    dec_hi = np.array([-c, c], np.float32)[::-1]
    rec_lo = np.array([c, c], np.float32)      # double [::-1] in the torch code is a no-op
    rec_hi = np.array([c, -c], np.float32)
    dec = np.stack([dec_lo[None, :] * dec_lo[:, None],
                    dec_lo[None, :] * dec_hi[:, None],
                    dec_hi[None, :] * dec_lo[:, None],
                    dec_hi[None, :] * dec_hi[:, None]], axis=0)  # (4, di, dj)
    rec = np.stack([rec_lo[None, :] * rec_lo[:, None],
                    rec_lo[None, :] * rec_hi[:, None],
                    rec_hi[None, :] * rec_lo[:, None],
                    rec_hi[None, :] * rec_hi[:, None]], axis=0)
    dec_mat = dec.reshape(4, 4)        # [subband f, slab p = 2*di + dj]
    rec_mat = rec.reshape(4, 4).T      # [slab p, subband f]
    return dec_mat, rec_mat


DEC_MAT, REC_MAT = _db1_filters()


def _pool_mats(Hh, Wh, ws):
    """Small constant matrices: directional means / gate broadcast + per-row-block pool."""
    L = Hh * Wh
    Wp = Wh // ws
    pW = np.zeros((L, Hh), np.float32)        # mean over W  (and its T broadcasts over W)
    pH = np.zeros((L, Wh), np.float32)        # mean over H  (and its T broadcasts over H)
    for h in range(Hh):
        for w in range(Wh):
            l = h * Wh + w
            pW[l, h] = 1.0 / Wh
            pH[l, w] = 1.0 / Hh
    # ws x ws avg-pool of ONE row-block of ws rows: lanes (i*Wh + w) -> Wp outputs
    pblk = np.zeros((ws * Wh, Wp), np.float32)
    for i in range(ws):
        for w in range(Wh):
            pblk[i * Wh + w, w // ws] = 1.0 / (ws * ws)
    return pW, pH, pblk


def _pick_tb(B, L):
    """Samples per grid block so that the block lane width TB*L is a multiple of 128."""
    for tb in range(1, B + 1):
        if B % tb == 0 and (tb * L) % 128 == 0 and tb <= 8:
            return tb
    return B  # fall back: whole batch in one block (block == full array dim)


# ---------------------------------------------------------------------------
# The single fused kernel (one grid step per TB-sample lane tile)
# ---------------------------------------------------------------------------
def make_fga_kernel(C, G, TB, head_num, head_dim, scaler, Hh, Wh, ws, eps=_EPS):
    L = Hh * Wh
    Hp, Wp = Hh // ws, Wh // ws
    Lp = Hp * Wp
    f32 = jnp.float32
    bf16 = jnp.bfloat16
    cg = C // G

    def gn_sigmoid(z, gamma, beta):
        # GroupNorm(G) over each (C/G, n) group, then sigmoid (all f32, no reshape).
        parts = []
        for g in range(G):
            zg = z[g * cg:(g + 1) * cg, :]
            mu = jnp.mean(zg)
            var = jnp.mean((zg - mu) ** 2)
            parts.append((zg - mu) * jax.lax.rsqrt(var + eps))
        zn = jnp.concatenate(parts, axis=0)
        return jax.nn.sigmoid(zn * gamma + beta)

    def kernel(slab_ref, wdir_ref, wcx_ref, wcx1_ref,
               pW_ref, pH_ref, pblk_ref, cp_ref, out_ref):
        s = slab_ref[...]                    # (4C, TB*L) bf16, stride-2 slabs, slab-major
        wdir = wdir_ref[...]                 # (C, 4C)  bf16  DEC-folded directional proj
        wcx = wcx_ref[...]                   # (C, 4C)  bf16  DEC-folded convx
        wcx1 = wcx1_ref[...]                 # (4C, C)  bf16  REC-folded convx1
        pW = pW_ref[...]                     # (L, Hh)  bf16
        pH = pH_ref[...]                     # (L, Wh)  bf16
        pblk = pblk_ref[...]                 # (ws*Wh, Wp) bf16
        cp = cp_ref[...]                     # (C, 9)   f32 packed per-channel params

        gn_h_g, gn_h_b = cp[:, 0:1], cp[:, 1:2]
        gn_w_g, gn_w_b = cp[:, 2:3], cp[:, 3:4]
        gn1_g, gn1_b = cp[:, 4:5], cp[:, 5:6]
        qw, kw, vw = cp[:, 6:7], cp[:, 7:8], cp[:, 8:9]

        # --- folded DWT + convx for ALL TB samples at once (lane-dense MXU) ---
        xc_all = jnp.dot(wcx, s, preferred_element_type=f32)     # (C, TB*L) f32

        gated_parts = []
        for t in range(TB):                                      # static, TB is small
            st = s[:, t * L:(t + 1) * L]                         # (4C, L) bf16

            # directional means (small matmuls) + folded 1x1 projections
            m_h = jnp.dot(st, pW, preferred_element_type=f32)    # (4C, Hh)
            m_w = jnp.dot(st, pH, preferred_element_type=f32)    # (4C, Wh)
            x_h = jnp.dot(wdir, m_h.astype(bf16), preferred_element_type=f32)  # (C, Hh)
            x_w = jnp.dot(wdir, m_w.astype(bf16), preferred_element_type=f32)  # (C, Wh)

            gate_h = gn_sigmoid(x_h, gn_h_g, gn_h_b)             # (C, Hh)
            gate_w = gn_sigmoid(x_w, gn_w_g, gn_w_b)             # (C, Wh)

            # broadcast gates back onto the flattened spatial lane axis (NT matmuls)
            gh_full = jax.lax.dot_general(
                gate_h.astype(bf16), pW, (((1,), (1,)), ((), ())),
                preferred_element_type=f32) * float(Wh)          # (C, L)
            gw_full = jax.lax.dot_general(
                gate_w.astype(bf16), pH, (((1,), (1,)), ((), ())),
                preferred_element_type=f32) * float(Hh)          # (C, L)

            x_mod = xc_all[:, t * L:(t + 1) * L] * gh_full * gw_full   # (C, L) f32

            # --- ws x ws avg pool, one row-block at a time (tiny matmul each) ---
            ypieces = []
            for hp in range(Hp):
                chunk = x_mod[:, hp * ws * Wh:(hp + 1) * ws * Wh]       # (C, ws*Wh)
                ypieces.append(jnp.dot(chunk.astype(bf16), pblk,
                                       preferred_element_type=f32))    # (C, Wp)
            y = ypieces[0] if Hp == 1 else jnp.concatenate(ypieces, axis=1)  # (C, Lp)

            # --- GroupNorm(1, C) ---
            mu = jnp.mean(y)
            var = jnp.mean((y - mu) ** 2)
            yn = (y - mu) * jax.lax.rsqrt(var + eps) * gn1_g + gn1_b

            # --- depthwise qkv + per-head channel attention -> channel gate ---
            q_full = yn * qw
            k_full = yn * kw
            v_full = yn * vw
            gparts = []
            for hh in range(head_num):                            # static, small
                lo, hi = hh * head_dim, (hh + 1) * head_dim
                qh = q_full[lo:hi, :].astype(bf16)
                kh = k_full[lo:hi, :].astype(bf16)
                vh = v_full[lo:hi, :].astype(bf16)
                att = jax.lax.dot_general(
                    qh, kh, (((1,), (1,)), ((), ())),
                    preferred_element_type=f32) * scaler          # (hd, hd)
                att = jax.nn.softmax(att, axis=-1)
                oh = jax.lax.dot_general(
                    att.astype(bf16), vh, (((1,), (0,)), ((), ())),
                    preferred_element_type=f32)                   # (hd, Lp)
                gparts.append(jnp.mean(oh, axis=-1, keepdims=True))
            gate_c = jax.nn.sigmoid(jnp.concatenate(gparts, axis=0))   # (C, 1)

            gated_parts.append(x_mod * gate_c)                    # (C, L)

        gated = gated_parts[0] if TB == 1 else jnp.concatenate(gated_parts, axis=1)

        # --- folded convx1 + inverse Haar mix -> slab-major, lane-dense store ---
        out_ref[...] = jnp.dot(wcx1, gated.astype(bf16),
                               preferred_element_type=f32).astype(out_ref.dtype)

    return kernel


# ---------------------------------------------------------------------------
# FGA forward (Pallas) and pure-jnp reference
# ---------------------------------------------------------------------------
def fga_forward(x, p, head_num, window_size):
    B, C, H, W = x.shape
    assert H % 2 == 0 and W % 2 == 0, "H, W must be even (no padding branch implemented)"
    Hh, Wh = H // 2, W // 2
    ws = window_size
    assert Hh % ws == 0 and Wh % ws == 0, "half-res spatial must divide window_size"
    assert C % 4 == 0 and C % head_num == 0
    L = Hh * Wh
    Hp, Wp = Hh // ws, Wh // ws
    G = 4
    head_dim = C // head_num
    scaler = head_dim ** -0.5
    bf16 = jnp.bfloat16

    dec = jnp.asarray(DEC_MAT)
    rec = jnp.asarray(REC_MAT)

    # ---- fold the Haar mixing matrices into the 1x1-conv weights (wrapper) ----
    # directional projection: concat order (ll,lh,hl,hh) -> subbands f = (0,2,1,3)
    w_stack = jnp.stack([p['w_ll'], p['w_lh'], p['w_hl'], p['w_hh']], axis=0)   # (4,gc,C)
    dec_rows = jnp.asarray(DEC_MAT[[0, 2, 1, 3]])                               # (4, 4)
    wdir = jnp.einsum('rp,rgc->rgpc', dec_rows, w_stack).reshape(C, 4 * C)

    # convx folded with the DWT mix (concat(LL,HL,LH,HH) == kron(DEC, I) @ slabs)
    wcx = jnp.einsum('kfc,fp->kpc',
                     p['w_convx'].reshape(C, 4, C), dec).reshape(C, 4 * C)

    # convx1 folded with the inverse-DWT mix; output rows are slab-major (p*C + c)
    wcx1 = jnp.einsum('pf,cfk->pck',
                      rec, p['w_convx1'].reshape(C, 4, C)).reshape(4 * C, C)

    # packed per-channel parameters (C, 9), kept f32
    cp = jnp.stack([p['gn_h_g'], p['gn_h_b'], p['gn_w_g'], p['gn_w_b'],
                    p['gn1_g'], p['gn1_b'], p['qw'], p['kw'], p['vw']],
                   axis=1).astype(jnp.float32)

    pW_np, pH_np, pblk_np = _pool_mats(Hh, Wh, ws)

    TB = _pick_tb(B, L)
    n_blocks = B // TB

    # stride-2 slab extraction: rows = p*C + c (p = 2*di + dj), cols = b*L + h*Wh + w
    # TODO(synk): the (de)interleave stays in the XLA wrapper; an in-kernel strided-DMA
    # version would remove one extra HBM round trip at large H, W.
    slab = (x.reshape(B, C, Hh, 2, Wh, 2)
             .transpose(3, 5, 1, 0, 2, 4)
             .reshape(4 * C, B * L)).astype(bf16)

    # explicit, audited VMEM budget (generous margin; clamped for v7x's 64 MiB)
    blk = 4 * C * TB * L
    est = (2 * blk * 2 + 2 * blk * 4                     # slab in (bf16) + out (f32), x2 buffers
           + (2 * C * 4 * C + 4 * C * C) * 2             # folded weights (bf16)
           + (L * (Hh + Wh) + ws * Wh * Wp) * 2          # small pooling matrices (bf16)
           + C * 9 * 4
           + 12 * C * TB * L * 4)                        # f32 temporaries headroom
    vmem_limit = int(min(64 * 2 ** 20, max(32 * 2 ** 20, 4 * est)))

    out_slab = pl.pallas_call(
        make_fga_kernel(C, G, TB, head_num, head_dim, scaler, Hh, Wh, ws),
        grid=(n_blocks,),
        in_specs=[
            pl.BlockSpec((4 * C, TB * L), lambda i: (0, i)),
            pl.BlockSpec((C, 4 * C), lambda i: (0, 0)),
            pl.BlockSpec((C, 4 * C), lambda i: (0, 0)),
            pl.BlockSpec((4 * C, C), lambda i: (0, 0)),
            pl.BlockSpec((L, Hh), lambda i: (0, 0)),
            pl.BlockSpec((L, Wh), lambda i: (0, 0)),
            pl.BlockSpec((ws * Wh, Wp), lambda i: (0, 0)),
            pl.BlockSpec((C, 9), lambda i: (0, 0)),
        ],
        out_specs=pl.BlockSpec((4 * C, TB * L), lambda i: (0, i)),
        out_shape=jax.ShapeDtypeStruct((4 * C, B * L), jnp.float32),
        compiler_params=pltpu.CompilerParams(
            dimension_semantics=("parallel",),
            vmem_limit_bytes=vmem_limit),
    )(slab, wdir.astype(bf16), wcx.astype(bf16), wcx1.astype(bf16),
      jnp.asarray(pW_np, bf16), jnp.asarray(pH_np, bf16),
      jnp.asarray(pblk_np, bf16), cp)

    # inverse-DWT re-interleave back to (B, C, H, W)
    out = (out_slab.reshape(2, 2, C, B, Hh, Wh)
                   .transpose(3, 2, 4, 0, 5, 1)
                   .reshape(B, C, H, W))
    return out


def fga_reference(x, p, head_num, window_size):
    """Pure-jnp f32 reference with identical semantics (for correctness check)."""
    B, C, H, W = x.shape
    Hh, Wh = H // 2, W // 2
    slabs = jnp.stack([x[:, :, di::2, dj::2] for di in (0, 1) for dj in (0, 1)], axis=2)
    subs = jnp.einsum('fp,bcpij->bcfij', jnp.asarray(DEC_MAT), slabs)
    LL, HL, LH, HH = subs[:, :, 0], subs[:, :, 1], subs[:, :, 2], subs[:, :, 3]

    def proj(s, w):
        return (jnp.einsum('oc,bcl->bol', w, s.mean(axis=3)),
                jnp.einsum('oc,bcl->bol', w, s.mean(axis=2)))

    ll_h, ll_w = proj(LL, p['w_ll']); lh_h, lh_w = proj(LH, p['w_lh'])
    hl_h, hl_w = proj(HL, p['w_hl']); hh_h, hh_w = proj(HH, p['w_hh'])
    x_h = jnp.concatenate([ll_h, lh_h, hl_h, hh_h], axis=1)
    x_w = jnp.concatenate([ll_w, lh_w, hl_w, hh_w], axis=1)

    def gn(z, g, b, G):
        Bc, Cc, L = z.shape
        zg = z.reshape(Bc, G, Cc // G, L)
        mu = zg.mean(axis=(2, 3), keepdims=True)
        var = ((zg - mu) ** 2).mean(axis=(2, 3), keepdims=True)
        zn = ((zg - mu) / jnp.sqrt(var + _EPS)).reshape(Bc, Cc, L)
        return zn * g[None, :, None] + b[None, :, None]

    x_h_attn = jax.nn.sigmoid(gn(x_h, p['gn_h_g'], p['gn_h_b'], 4))
    x_w_attn = jax.nn.sigmoid(gn(x_w, p['gn_w_g'], p['gn_w_b'], 4))
    xcat = jnp.concatenate([LL, HL, LH, HH], axis=1)
    xc = jnp.einsum('oc,bchw->bohw', p['w_convx'], xcat)
    x_mod = xc * x_h_attn[:, :, :, None] * x_w_attn[:, :, None, :]
    ws = window_size
    Hp, Wp = Hh // ws, Wh // ws
    y = x_mod.reshape(B, C, Hp, ws, Wp, ws).mean(axis=(3, 5)).reshape(B, C, Hp * Wp)
    yn = gn(y, p['gn1_g'], p['gn1_b'], 1)
    head_dim = C // head_num
    scaler = head_dim ** -0.5
    q = (yn * p['qw'][None, :, None]).reshape(B, head_num, head_dim, -1)
    k = (yn * p['kw'][None, :, None]).reshape(B, head_num, head_dim, -1)
    v = (yn * p['vw'][None, :, None]).reshape(B, head_num, head_dim, -1)
    attn = jax.nn.softmax(jnp.einsum('bhdl,bhel->bhde', q, k) * scaler, axis=-1)
    ao = jnp.einsum('bhde,bhel->bhdl', attn, v).reshape(B, C, -1)
    gate = jax.nn.sigmoid(ao.mean(axis=-1))[:, :, None, None]
    gated = gate * x_mod
    out4 = jnp.einsum('oc,bchw->bohw', p['w_convx1'], gated)
    rw = out4.reshape(B, C, 4, Hh, Wh)
    slabs_out = jnp.einsum('pf,bcfij->bcpij', jnp.asarray(REC_MAT), rw)
    y00, y01, y10, y11 = (slabs_out[:, :, 0], slabs_out[:, :, 1],
                          slabs_out[:, :, 2], slabs_out[:, :, 3])
    row0 = jnp.stack([y00, y01], axis=-1)
    row1 = jnp.stack([y10, y11], axis=-1)
    return jnp.stack([row0, row1], axis=3).reshape(B, C, H, W)


# ---------------------------------------------------------------------------
if __name__ == "__main__":
    B, dim, H, W = 2, 8, 16, 16
    head_num = 2
    window_size = 2          # (module default 7; chosen so the pooled size divides)
    gc = dim // 4

    keys = jax.random.split(jax.random.PRNGKey(0), 16)

    def rnd(k, shape, scale=0.2):
        return scale * jax.random.normal(k, shape, jnp.float32)

    x = jax.random.normal(keys[0], (B, dim, H, W), jnp.float32)
    params = {
        'w_ll': rnd(keys[1], (gc, dim)),
        'w_lh': rnd(keys[2], (gc, dim)),
        'w_hl': rnd(keys[3], (gc, dim)),
        'w_hh': rnd(keys[4], (gc, dim)),
        'w_convx': rnd(keys[5], (dim, 4 * dim)),
        'w_convx1': rnd(keys[6], (4 * dim, dim)),
        'gn_h_g': 1.0 + rnd(keys[7], (dim,), 0.1),
        'gn_h_b': rnd(keys[8], (dim,), 0.1),
        'gn_w_g': 1.0 + rnd(keys[9], (dim,), 0.1),
        'gn_w_b': rnd(keys[10], (dim,), 0.1),
        'gn1_g': 1.0 + rnd(keys[11], (dim,), 0.1),
        'gn1_b': rnd(keys[12], (dim,), 0.1),
        'qw': rnd(keys[13], (dim,), 0.5),
        'kw': rnd(keys[14], (dim,), 0.5),
        'vw': rnd(keys[15], (dim,), 0.5),
    }

    fga_fn = jax.jit(partial(fga_forward, head_num=head_num, window_size=window_size))
    out = jax.block_until_ready(fga_fn(x, params))

    ref = fga_reference(x, params, head_num, window_size)
    assert out.shape == (B, dim, H, W)
    max_err = float(jnp.max(jnp.abs(out - ref)))
    # bf16 MXU operands with f32 accumulation -> slightly relaxed tolerance
    assert jnp.allclose(out, ref, rtol=3e-2, atol=3e-2), f"mismatch (max abs err {max_err})"

    print("KERNEL_OK")
</pallas_src>

<mosaic_0001>
module attributes {stable_mosaic.version = 11 : i64} {
  func.func @kernel(%arg0: i32, %arg1: memref<32x128xbf16, #tpu.memory_space<vmem>>, %arg2: memref<8x32xbf16, #tpu.memory_space<vmem>>, %arg3: memref<8x32xbf16, #tpu.memory_space<vmem>>, %arg4: memref<32x8xbf16, #tpu.memory_space<vmem>>, %arg5: memref<64x8xbf16, #tpu.memory_space<vmem>>, %arg6: memref<64x8xbf16, #tpu.memory_space<vmem>>, %arg7: memref<16x4xbf16, #tpu.memory_space<vmem>>, %arg8: memref<8x9xf32, #tpu.memory_space<vmem>>, %arg9: memref<32x128xf32, #tpu.memory_space<vmem>>) attributes {dimension_semantics = [#tpu.dimension_semantics<parallel>], iteration_bounds = array<i64: 1>, scalar_prefetch = 0 : i64, scratch_operands = 0 : i64, tpu.core_type = #tpu.core_type<tc>, window_params = [{transform_indices = @transform_0, window_bounds = array<i64: 32, 128>}, {pipeline_mode = #tpu.pipeline_mode<synchronous>, transform_indices = @transform_1, window_bounds = array<i64: 8, 32>}, {pipeline_mode = #tpu.pipeline_mode<synchronous>, transform_indices = @transform_2, window_bounds = array<i64: 8, 32>}, {pipeline_mode = #tpu.pipeline_mode<synchronous>, transform_indices = @transform_3, window_bounds = array<i64: 32, 8>}, {pipeline_mode = #tpu.pipeline_mode<synchronous>, transform_indices = @transform_4, window_bounds = array<i64: 64, 8>}, {pipeline_mode = #tpu.pipeline_mode<synchronous>, transform_indices = @transform_5, window_bounds = array<i64: 64, 8>}, {pipeline_mode = #tpu.pipeline_mode<synchronous>, transform_indices = @transform_6, window_bounds = array<i64: 16, 4>}, {pipeline_mode = #tpu.pipeline_mode<synchronous>, transform_indices = @transform_7, window_bounds = array<i64: 8, 9>}, {transform_indices = @transform_8, window_bounds = array<i64: 32, 128>}]} {
    %c0 = arith.constant 0 : index
    %c0_0 = arith.constant 0 : index
    %0 = vector.load %arg1[%c0, %c0_0] : memref<32x128xbf16, #tpu.memory_space<vmem>>, vector<32x128xbf16>
    %c0_1 = arith.constant 0 : index
    %c0_2 = arith.constant 0 : index
    %1 = vector.load %arg2[%c0_1, %c0_2] : memref<8x32xbf16, #tpu.memory_space<vmem>>, vector<8x32xbf16>
    %c0_3 = arith.constant 0 : index
    %c0_4 = arith.constant 0 : index
    %2 = vector.load %arg3[%c0_3, %c0_4] : memref<8x32xbf16, #tpu.memory_space<vmem>>, vector<8x32xbf16>
    %c0_5 = arith.constant 0 : index
    %c0_6 = arith.constant 0 : index
    %3 = vector.load %arg4[%c0_5, %c0_6] : memref<32x8xbf16, #tpu.memory_space<vmem>>, vector<32x8xbf16>
    %c0_7 = arith.constant 0 : index
    %c0_8 = arith.constant 0 : index
    %4 = vector.load %arg5[%c0_7, %c0_8] : memref<64x8xbf16, #tpu.memory_space<vmem>>, vector<64x8xbf16>
    %c0_9 = arith.constant 0 : index
    %c0_10 = arith.constant 0 : index
    %5 = vector.load %arg6[%c0_9, %c0_10] : memref<64x8xbf16, #tpu.memory_space<vmem>>, vector<64x8xbf16>
    %c0_11 = arith.constant 0 : index
    %c0_12 = arith.constant 0 : index
    %6 = vector.load %arg7[%c0_11, %c0_12] : memref<16x4xbf16, #tpu.memory_space<vmem>>, vector<16x4xbf16>
    %c0_13 = arith.constant 0 : index
    %c0_14 = arith.constant 0 : index
    %7 = vector.load %arg8[%c0_13, %c0_14] : memref<8x9xf32, #tpu.memory_space<vmem>>, vector<8x9xf32>
    %8 = vector.extract_strided_slice %7 {offsets = [0, 0], sizes = [8, 1], strides = [1, 1]} : vector<8x9xf32> to vector<8x1xf32>
    %9 = vector.extract_strided_slice %7 {offsets = [0, 1], sizes = [8, 1], strides = [1, 1]} : vector<8x9xf32> to vector<8x1xf32>
    %10 = vector.extract_strided_slice %7 {offsets = [0, 2], sizes = [8, 1], strides = [1, 1]} : vector<8x9xf32> to vector<8x1xf32>
    %11 = vector.extract_strided_slice %7 {offsets = [0, 3], sizes = [8, 1], strides = [1, 1]} : vector<8x9xf32> to vector<8x1xf32>
    %12 = vector.extract_strided_slice %7 {offsets = [0, 4], sizes = [8, 1], strides = [1, 1]} : vector<8x9xf32> to vector<8x1xf32>
    %13 = vector.extract_strided_slice %7 {offsets = [0, 5], sizes = [8, 1], strides = [1, 1]} : vector<8x9xf32> to vector<8x1xf32>
    %14 = vector.extract_strided_slice %7 {offsets = [0, 6], sizes = [8, 1], strides = [1, 1]} : vector<8x9xf32> to vector<8x1xf32>
    %15 = vector.extract_strided_slice %7 {offsets = [0, 7], sizes = [8, 1], strides = [1, 1]} : vector<8x9xf32> to vector<8x1xf32>
    %16 = vector.extract_strided_slice %7 {offsets = [0, 8], sizes = [8, 1], strides = [1, 1]} : vector<8x9xf32> to vector<8x1xf32>
    %cst = arith.constant dense<0.000000e+00> : vector<8x128xf32>
    %17 = tpu.matmul %2, %0, %cst {dimension_numbers = #tpu.dot_dimension_numbers<[1], [0], [0], [1], [0, 0, 1, 1], [], []>} : vector<8x32xbf16>, vector<32x128xbf16>, vector<8x128xf32> -> vector<8x128xf32>
    %18 = vector.extract_strided_slice %0 {offsets = [0, 0], sizes = [32, 64], strides = [1, 1]} : vector<32x128xbf16> to vector<32x64xbf16>
    %cst_15 = arith.constant dense<0.000000e+00> : vector<32x8xf32>
    %19 = tpu.matmul %18, %4, %cst_15 {dimension_numbers = #tpu.dot_dimension_numbers<[1], [0], [0], [1], [0, 0, 1, 1], [], []>} : vector<32x64xbf16>, vector<64x8xbf16>, vector<32x8xf32> -> vector<32x8xf32>
    %cst_16 = arith.constant dense<0.000000e+00> : vector<32x8xf32>
    %20 = tpu.matmul %18, %5, %cst_16 {dimension_numbers = #tpu.dot_dimension_numbers<[1], [0], [0], [1], [0, 0, 1, 1], [], []>} : vector<32x64xbf16>, vector<64x8xbf16>, vector<32x8xf32> -> vector<32x8xf32>
    %21 = arith.truncf %19 : vector<32x8xf32> to vector<32x8xbf16>
    %cst_17 = arith.constant dense<0.000000e+00> : vector<8x8xf32>
    %22 = tpu.matmul %1, %21, %cst_17 {dimension_numbers = #tpu.dot_dimension_numbers<[1], [0], [0], [1], [0, 0, 1, 1], [], []>} : vector<8x32xbf16>, vector<32x8xbf16>, vector<8x8xf32> -> vector<8x8xf32>
    %23 = arith.truncf %20 : vector<32x8xf32> to vector<32x8xbf16>
    %cst_18 = arith.constant dense<0.000000e+00> : vector<8x8xf32>
    %24 = tpu.matmul %1, %23, %cst_18 {dimension_numbers = #tpu.dot_dimension_numbers<[1], [0], [0], [1], [0, 0, 1, 1], [], []>} : vector<8x32xbf16>, vector<32x8xbf16>, vector<8x8xf32> -> vector<8x8xf32>
    %25 = vector.extract_strided_slice %22 {offsets = [0, 0], sizes = [2, 8], strides = [1, 1]} : vector<8x8xf32> to vector<2x8xf32>
    %26 = vector.shape_cast %25 : vector<2x8xf32> to vector<1x2x8xf32>
    %cst_19 = arith.constant dense<0.000000e+00> : vector<1xf32>
    %27 = vector.multi_reduction <add>, %26, %cst_19 [1, 2] : vector<1x2x8xf32> to vector<1xf32>
    %28 = vector.shape_cast %27 : vector<1xf32> to vector<1x1x1xf32>
    %29 = vector.extract %28[0, 0, 0] : f32 from vector<1x1x1xf32>
    %cst_20 = arith.constant 1.600000e+01 : f32
    %30 = arith.divf %29, %cst_20 : f32
    %31 = vector.broadcast %30 : f32 to vector<2x8xf32>
    %32 = arith.subf %25, %31 : vector<2x8xf32>
    %33 = arith.mulf %32, %32 : vector<2x8xf32>
    %34 = vector.shape_cast %33 : vector<2x8xf32> to vector<1x2x8xf32>
    %cst_21 = arith.constant dense<0.000000e+00> : vector<1xf32>
    %35 = vector.multi_reduction <add>, %34, %cst_21 [1, 2] : vector<1x2x8xf32> to vector<1xf32>
    %36 = vector.shape_cast %35 : vector<1xf32> to vector<1x1x1xf32>
    %37 = vector.extract %36[0, 0, 0] : f32 from vector<1x1x1xf32>
    %cst_22 = arith.constant 1.600000e+01 : f32
    %38 = arith.divf %37, %cst_22 : f32
    %39 = vector.broadcast %30 : f32 to vector<2x8xf32>
    %40 = arith.subf %25, %39 : vector<2x8xf32>
    %cst_23 = arith.constant 9.99999974E-6 : f32
    %41 = arith.addf %38, %cst_23 : f32
    %42 = math.rsqrt %41 : f32
    %43 = vector.broadcast %42 : f32 to vector<2x8xf32>
    %44 = arith.mulf %40, %43 : vector<2x8xf32>
    %45 = vector.extract_strided_slice %22 {offsets = [2, 0], sizes = [2, 8], strides = [1, 1]} : vector<8x8xf32> to vector<2x8xf32>
    %46 = vector.shape_cast %45 : vector<2x8xf32> to vector<1x2x8xf32>
    %cst_24 = arith.constant dense<0.000000e+00> : vector<1xf32>
    %47 = vector.multi_reduction <add>, %46, %cst_24 [1, 2] : vector<1x2x8xf32> to vector<1xf32>
    %48 = vector.shape_cast %47 : vector<1xf32> to vector<1x1x1xf32>
    %49 = vector.extract %48[0, 0, 0] : f32 from vector<1x1x1xf32>
    %cst_25 = arith.constant 1.600000e+01 : f32
    %50 = arith.divf %49, %cst_25 : f32
    %51 = vector.broadcast %50 : f32 to vector<2x8xf32>
    %52 = arith.subf %45, %51 : vector<2x8xf32>
    %53 = arith.mulf %52, %52 : vector<2x8xf32>
    %54 = vector.shape_cast %53 : vector<2x8xf32> to vector<1x2x8xf32>
    %cst_26 = arith.constant dense<0.000000e+00> : vector<1xf32>
    %55 = vector.multi_reduction <add>, %54, %cst_26 [1, 2] : vector<1x2x8xf32> to vector<1xf32>
    %56 = vector.shape_cast %55 : vector<1xf32> to vector<1x1x1xf32>
    %57 = vector.extract %56[0, 0, 0] : f32 from vector<1x1x1xf32>
    %cst_27 = arith.constant 1.600000e+01 : f32
    %58 = arith.divf %57, %cst_27 : f32
    %59 = vector.broadcast %50 : f32 to vector<2x8xf32>
    %60 = arith.subf %45, %59 : vector<2x8xf32>
    %cst_28 = arith.constant 9.99999974E-6 : f32
    %61 = arith.addf %58, %cst_28 : f32
    %62 = math.rsqrt %61 : f32
    %63 = vector.broadcast %62 : f32 to vector<2x8xf32>
    %64 = arith.mulf %60, %63 : vector<2x8xf32>
    %65 = vector.extract_strided_slice %22 {offsets = [4, 0], sizes = [2, 8], strides = [1, 1]} : vector<8x8xf32> to vector<2x8xf32>
    %66 = vector.shape_cast %65 : vector<2x8xf32> to vector<1x2x8xf32>
    %cst_29 = arith.constant dense<0.000000e+00> : vector<1xf32>
    %67 = vector.multi_reduction <add>, %66, %cst_29 [1, 2] : vector<1x2x8xf32> to vector<1xf32>
    %68 = vector.shape_cast %67 : vector<1xf32> to vector<1x1x1xf32>
    %69 = vector.extract %68[0, 0, 0] : f32 from vector<1x1x1xf32>
    %cst_30 = arith.constant 1.600000e+01 : f32
    %70 = arith.divf %69, %cst_30 : f32
    %71 = vector.broadcast %70 : f32 to vector<2x8xf32>
    %72 = arith.subf %65, %71 : vector<2x8xf32>
    %73 = arith.mulf %72, %72 : vector<2x8xf32>
    %74 = vector.shape_cast %73 : vector<2x8xf32> to vector<1x2x8xf32>
    %cst_31 = arith.constant dense<0.000000e+00> : vector<1xf32>
    %75 = vector.multi_reduction <add>, %74, %cst_31 [1, 2] : vector<1x2x8xf32> to vector<1xf32>
    %76 = vector.shape_cast %75 : vector<1xf32> to vector<1x1x1xf32>
    %77 = vector.extract %76[0, 0, 0] : f32 from vector<1x1x1xf32>
    %cst_32 = arith.constant 1.600000e+01 : f32
    %78 = arith.divf %77, %cst_32 : f32
    %79 = vector.broadcast %70 : f32 to vector<2x8xf32>
    %80 = arith.subf %65, %79 : vector<2x8xf32>
    %cst_33 = arith.constant 9.99999974E-6 : f32
    %81 = arith.addf %78, %cst_33 : f32
    %82 = math.rsqrt %81 : f32
    %83 = vector.broadcast %82 : f32 to vector<2x8xf32>
    %84 = arith.mulf %80, %83 : vector<2x8xf32>
    %85 = vector.extract_strided_slice %22 {offsets = [6, 0], sizes = [2, 8], strides = [1, 1]} : vector<8x8xf32> to vector<2x8xf32>
    %86 = vector.shape_cast %85 : vector<2x8xf32> to vector<1x2x8xf32>
    %cst_34 = arith.constant dense<0.000000e+00> : vector<1xf32>
    %87 = vector.multi_reduction <add>, %86, %cst_34 [1, 2] : vector<1x2x8xf32> to vector<1xf32>
    %88 = vector.shape_cast %87 : vector<1xf32> to vector<1x1x1xf32>
    %89 = vector.extract %88[0, 0, 0] : f32 from vector<1x1x1xf32>
    %cst_35 = arith.constant 1.600000e+01 : f32
    %90 = arith.divf %89, %cst_35 : f32
    %91 = vector.broadcast %90 : f32 to vector<2x8xf32>
    %92 = arith.subf %85, %91 : vector<2x8xf32>
    %93 = arith.mulf %92, %92 : vector<2x8xf32>
    %94 = vector.shape_cast %93 : vector<2x8xf32> to vector<1x2x8xf32>
    %cst_36 = arith.constant dense<0.000000e+00> : vector<1xf32>
    %95 = vector.multi_reduction <add>, %94, %cst_36 [1, 2] : vector<1x2x8xf32> to vector<1xf32>
    %96 = vector.shape_cast %95 : vector<1xf32> to vector<1x1x1xf32>
    %97 = vector.extract %96[0, 0, 0] : f32 from vector<1x1x1xf32>
    %cst_37 = arith.constant 1.600000e+01 : f32
    %98 = arith.divf %97, %cst_37 : f32
    %99 = vector.broadcast %90 : f32 to vector<2x8xf32>
    %100 = arith.subf %85, %99 : vector<2x8xf32>
    %cst_38 = arith.constant 9.99999974E-6 : f32
    %101 = arith.addf %98, %cst_38 : f32
    %102 = math.rsqrt %101 : f32
    %103 = vector.broadcast %102 : f32 to vector<2x8xf32>
    %104 = arith.mulf %100, %103 : vector<2x8xf32>
    %105 = tpu.concatenate %44, %64, %84, %104 in 0 : vector<2x8xf32>, vector<2x8xf32>, vector<2x8xf32>, vector<2x8xf32> -> vector<8x8xf32>
    %106 = vector.broadcast %8 : vector<8x1xf32> to vector<8x8xf32>
    %107 = arith.mulf %105, %106 : vector<8x8xf32>
    %108 = vector.broadcast %9 : vector<8x1xf32> to vector<8x8xf32>
    %109 = arith.addf %107, %108 : vector<8x8xf32>
    %110 = arith.negf %109 : vector<8x8xf32>
    %111 = math.exp %110 : vector<8x8xf32>
    %cst_39 = arith.constant 1.000000e+00 : f32
    %112 = vector.broadcast %cst_39 : f32 to vector<8x8xf32>
    %113 = arith.addf %112, %111 : vector<8x8xf32>
    %114 = arith.divf %112, %113 : vector<8x8xf32>
    %115 = vector.extract_strided_slice %24 {offsets = [0, 0], sizes = [2, 8], strides = [1, 1]} : vector<8x8xf32> to vector<2x8xf32>
    %116 = vector.shape_cast %115 : vector<2x8xf32> to vector<1x2x8xf32>
    %cst_40 = arith.constant dense<0.000000e+00> : vector<1xf32>
    %117 = vector.multi_reduction <add>, %116, %cst_40 [1, 2] : vector<1x2x8xf32> to vector<1xf32>
    %118 = vector.shape_cast %117 : vector<1xf32> to vector<1x1x1xf32>
    %119 = vector.extract %118[0, 0, 0] : f32 from vector<1x1x1xf32>
    %cst_41 = arith.constant 1.600000e+01 : f32
    %120 = arith.divf %119, %cst_41 : f32
    %121 = vector.broadcast %120 : f32 to vector<2x8xf32>
    %122 = arith.subf %115, %121 : vector<2x8xf32>
    %123 = arith.mulf %122, %122 : vector<2x8xf32>
    %124 = vector.shape_cast %123 : vector<2x8xf32> to vector<1x2x8xf32>
    %cst_42 = arith.constant dense<0.000000e+00> : vector<1xf32>
    %125 = vector.multi_reduction <add>, %124, %cst_42 [1, 2] : vector<1x2x8xf32> to vector<1xf32>
    %126 = vector.shape_cast %125 : vector<1xf32> to vector<1x1x1xf32>
    %127 = vector.extract %126[0, 0, 0] : f32 from vector<1x1x1xf32>
    %cst_43 = arith.constant 1.600000e+01 : f32
    %128 = arith.divf %127, %cst_43 : f32
    %129 = vector.broadcast %120 : f32 to vector<2x8xf32>
    %130 = arith.subf %115, %129 : vector<2x8xf32>
    %cst_44 = arith.constant 9.99999974E-6 : f32
    %131 = arith.addf %128, %cst_44 : f32
    %132 = math.rsqrt %131 : f32
    %133 = vector.broadcast %132 : f32 to vector<2x8xf32>
    %134 = arith.mulf %130, %133 : vector<2x8xf32>
    %135 = vector.extract_strided_slice %24 {offsets = [2, 0], sizes = [2, 8], strides = [1, 1]} : vector<8x8xf32> to vector<2x8xf32>
    %136 = vector.shape_cast %135 : vector<2x8xf32> to vector<1x2x8xf32>
    %cst_45 = arith.constant dense<0.000000e+00> : vector<1xf32>
    %137 = vector.multi_reduction <add>, %136, %cst_45 [1, 2] : vector<1x2x8xf32> to vector<1xf32>
    %138 = vector.shape_cast %137 : vector<1xf32> to vector<1x1x1xf32>
    %139 = vector.extract %138[0, 0, 0] : f32 from vector<1x1x1xf32>
    %cst_46 = arith.constant 1.600000e+01 : f32
    %140 = arith.divf %139, %cst_46 : f32
    %141 = vector.broadcast %140 : f32 to vector<2x8xf32>
    %142 = arith.subf %135, %141 : vector<2x8xf32>
    %143 = arith.mulf %142, %142 : vector<2x8xf32>
    %144 = vector.shape_cast %143 : vector<2x8xf32> to vector<1x2x8xf32>
    %cst_47 = arith.constant dense<0.000000e+00> : vector<1xf32>
    %145 = vector.multi_reduction <add>, %144, %cst_47 [1, 2] : vector<1x2x8xf32> to vector<1xf32>
    %146 = vector.shape_cast %145 : vector<1xf32> to vector<1x1x1xf32>
    %147 = vector.extract %146[0, 0, 0] : f32 from vector<1x1x1xf32>
    %cst_48 = arith.constant 1.600000e+01 : f32
    %148 = arith.divf %147, %cst_48 : f32
    %149 = vector.broadcast %140 : f32 to vector<2x8xf32>
    %150 = arith.subf %135, %149 : vector<2x8xf32>
    %cst_49 = arith.constant 9.99999974E-6 : f32
    %151 = arith.addf %148, %cst_49 : f32
    %152 = math.rsqrt %151 : f32
    %153 = vector.broadcast %152 : f32 to vector<2x8xf32>
    %154 = arith.mulf %150, %153 : vector<2x8xf32>
    %155 = vector.extract_strided_slice %24 {offsets = [4, 0], sizes = [2, 8], strides = [1, 1]} : vector<8x8xf32> to vector<2x8xf32>
    %156 = vector.shape_cast %155 : vector<2x8xf32> to vector<1x2x8xf32>
    %cst_50 = arith.constant dense<0.000000e+00> : vector<1xf32>
    %157 = vector.multi_reduction <add>, %156, %cst_50 [1, 2] : vector<1x2x8xf32> to vector<1xf32>
    %158 = vector.shape_cast %157 : vector<1xf32> to vector<1x1x1xf32>
    %159 = vector.extract %158[0, 0, 0] : f32 from vector<1x1x1xf32>
    %cst_51 = arith.constant 1.600000e+01 : f32
    %160 = arith.divf %159, %cst_51 : f32
    %161 = vector.broadcast %160 : f32 to vector<2x8xf32>
    %162 = arith.subf %155, %161 : vector<2x8xf32>
    %163 = arith.mulf %162, %162 : vector<2x8xf32>
    %164 = vector.shape_cast %163 : vector<2x8xf32> to vector<1x2x8xf32>
    %cst_52 = arith.constant dense<0.000000e+00> : vector<1xf32>
    %165 = vector.multi_reduction <add>, %164, %cst_52 [1, 2] : vector<1x2x8xf32> to vector<1xf32>
    %166 = vector.shape_cast %165 : vector<1xf32> to vector<1x1x1xf32>
    %167 = vector.extract %166[0, 0, 0] : f32 from vector<1x1x1xf32>
    %cst_53 = arith.constant 1.600000e+01 : f32
    %168 = arith.divf %167, %cst_53 : f32
    %169 = vector.broadcast %160 : f32 to vector<2x8xf32>
    %170 = arith.subf %155, %169 : vector<2x8xf32>
    %cst_54 = arith.constant 9.99999974E-6 : f32
    %171 = arith.addf %168, %cst_54 : f32
    %172 = math.rsqrt %171 : f32
    %173 = vector.broadcast %172 : f32 to vector<2x8xf32>
    %174 = arith.mulf %170, %173 : vector<2x8xf32>
    %175 = vector.extract_strided_slice %24 {offsets = [6, 0], sizes = [2, 8], strides = [1, 1]} : vector<8x8xf32> to vector<2x8xf32>
    %176 = vector.shape_cast %175 : vector<2x8xf32> to vector<1x2x8xf32>
    %cst_55 = arith.constant dense<0.000000e+00> : vector<1xf32>
    %177 = vector.multi_reduction <add>, %176, %cst_55 [1, 2] : vector<1x2x8xf32> to vector<1xf32>
    %178 = vector.shape_cast %177 : vector<1xf32> to vector<1x1x1xf32>
    %179 = vector.extract %178[0, 0, 0] : f32 from vector<1x1x1xf32>
    %cst_56 = arith.constant 1.600000e+01 : f32
    %180 = arith.divf %179, %cst_56 : f32
    %181 = vector.broadcast %180 : f32 to vector<2x8xf32>
    %182 = arith.subf %175, %181 : vector<2x8xf32>
    %183 = arith.mulf %182, %182 : vector<2x8xf32>
    %184 = vector.shape_cast %183 : vector<2x8xf32> to vector<1x2x8xf32>
    %cst_57 = arith.constant dense<0.000000e+00> : vector<1xf32>
    %185 = vector.multi_reduction <add>, %184, %cst_57 [1, 2] : vector<1x2x8xf32> to vector<1xf32>
    %186 = vector.shape_cast %185 : vector<1xf32> to vector<1x1x1xf32>
    %187 = vector.extract %186[0, 0, 0] : f32 from vector<1x1x1xf32>
    %cst_58 = arith.constant 1.600000e+01 : f32
    %188 = arith.divf %187, %cst_58 : f32
    %189 = vector.broadcast %180 : f32 to vector<2x8xf32>
    %190 = arith.subf %175, %189 : vector<2x8xf32>
    %cst_59 = arith.constant 9.99999974E-6 : f32
    %191 = arith.addf %188, %cst_59 : f32
    %192 = math.rsqrt %191 : f32
    %193 = vector.broadcast %192 : f32 to vector<2x8xf32>
    %194 = arith.mulf %190, %193 : vector<2x8xf32>
    %195 = tpu.concatenate %134, %154, %174, %194 in 0 : vector<2x8xf32>, vector<2x8xf32>, vector<2x8xf32>, vector<2x8xf32> -> vector<8x8xf32>
    %196 = vector.broadcast %10 : vector<8x1xf32> to vector<8x8xf32>
    %197 = arith.mulf %195, %196 : vector<8x8xf32>
    %198 = vector.broadcast %11 : vector<8x1xf32> to vector<8x8xf32>
    %199 = arith.addf %197, %198 : vector<8x8xf32>
    %200 = arith.negf %199 : vector<8x8xf32>
    %201 = math.exp %200 : vector<8x8xf32>
    %cst_60 = arith.constant 1.000000e+00 : f32
    %202 = vector.broadcast %cst_60 : f32 to vector<8x8xf32>
    %203 = arith.addf %202, %201 : vector<8x8xf32>
    %204 = arith.divf %202, %203 : vector<8x8xf32>
    %205 = arith.truncf %114 : vector<8x8xf32> to vector<8x8xbf16>
    %cst_61 = arith.constant dense<0.000000e+00> : vector<8x64xf32>
    %206 = tpu.matmul %205, %4, %cst_61 {dimension_numbers = #tpu.dot_dimension_numbers<[1], [1], [0], [0], [0, 0, 1, 0], [], []>} : vector<8x8xbf16>, vector<64x8xbf16>, vector<8x64xf32> -> vector<8x64xf32>
    %cst_62 = arith.constant 8.000000e+00 : f32
    %207 = vector.broadcast %cst_62 : f32 to vector<8x64xf32>
    %208 = arith.mulf %206, %207 : vector<8x64xf32>
    %209 = arith.truncf %204 : vector<8x8xf32> to vector<8x8xbf16>
    %cst_63 = arith.constant dense<0.000000e+00> : vector<8x64xf32>
    %210 = tpu.matmul %209, %5, %cst_63 {dimension_numbers = #tpu.dot_dimension_numbers<[1], [1], [0], [0], [0, 0, 1, 0], [], []>} : vector<8x8xbf16>, vector<64x8xbf16>, vector<8x64xf32> -> vector<8x64xf32>
    %cst_64 = arith.constant 8.000000e+00 : f32
    %211 = vector.broadcast %cst_64 : f32 to vector<8x64xf32>
    %212 = arith.mulf %210, %211 : vector<8x64xf32>
    %213 = vector.extract_strided_slice %17 {offsets = [0, 0], sizes = [8, 64], strides = [1, 1]} : vector<8x128xf32> to vector<8x64xf32>
    %214 = arith.mulf %213, %208 : vector<8x64xf32>
    %215 = arith.mulf %214, %212 : vector<8x64xf32>
    %216 = vector.extract_strided_slice %215 {offsets = [0, 0], sizes = [8, 16], strides = [1, 1]} : vector<8x64xf32> to vector<8x16xf32>
    %217 = arith.truncf %216 : vector<8x16xf32> to vector<8x16xbf16>
    %cst_65 = arith.constant dense<0.000000e+00> : vector<8x4xf32>
    %218 = tpu.matmul %217, %6, %cst_65 {dimension_numbers = #tpu.dot_dimension_numbers<[1], [0], [0], [1], [0, 0, 1, 1], [], []>} : vector<8x16xbf16>, vector<16x4xbf16>, vector<8x4xf32> -> vector<8x4xf32>
    %219 = vector.extract_strided_slice %215 {offsets = [0, 16], sizes = [8, 16], strides = [1, 1]} : vector<8x64xf32> to vector<8x16xf32>
    %220 = arith.truncf %219 : vector<8x16xf32> to vector<8x16xbf16>
    %cst_66 = arith.constant dense<0.000000e+00> : vector<8x4xf32>
    %221 = tpu.matmul %220, %6, %cst_66 {dimension_numbers = #tpu.dot_dimension_numbers<[1], [0], [0], [1], [0, 0, 1, 1], [], []>} : vector<8x16xbf16>, vector<16x4xbf16>, vector<8x4xf32> -> vector<8x4xf32>
    %222 = vector.extract_strided_slice %215 {offsets = [0, 32], sizes = [8, 16], strides = [1, 1]} : vector<8x64xf32> to vector<8x16xf32>
    %223 = arith.truncf %222 : vector<8x16xf32> to vector<8x16xbf16>
    %cst_67 = arith.constant dense<0.000000e+00> : vector<8x4xf32>
    %224 = tpu.matmul %223, %6, %cst_67 {dimension_numbers = #tpu.dot_dimension_numbers<[1], [0], [0], [1], [0, 0, 1, 1], [], []>} : vector<8x16xbf16>, vector<16x4xbf16>, vector<8x4xf32> -> vector<8x4xf32>
    %225 = vector.extract_strided_slice %215 {offsets = [0, 48], sizes = [8, 16], strides = [1, 1]} : vector<8x64xf32> to vector<8x16xf32>
    %226 = arith.truncf %225 : vector<8x16xf32> to vector<8x16xbf16>
    %cst_68 = arith.constant dense<0.000000e+00> : vector<8x4xf32>
    %227 = tpu.matmul %226, %6, %cst_68 {dimension_numbers = #tpu.dot_dimension_numbers<[1], [0], [0], [1], [0, 0, 1, 1], [], []>} : vector<8x16xbf16>, vector<16x4xbf16>, vector<8x4xf32> -> vector<8x4xf32>
    %228 = tpu.concatenate %218, %221, %224, %227 in 1 : vector<8x4xf32>, vector<8x4xf32>, vector<8x4xf32>, vector<8x4xf32> -> vector<8x16xf32>
    %229 = vector.shape_cast %228 : vector<8x16xf32> to vector<1x8x16xf32>
    %cst_69 = arith.constant dense<0.000000e+00> : vector<1xf32>
    %230 = vector.multi_reduction <add>, %229, %cst_69 [1, 2] : vector<1x8x16xf32> to vector<1xf32>
    %231 = vector.shape_cast %230 : vector<1xf32> to vector<1x1x1xf32>
    %232 = vector.extract %231[0, 0, 0] : f32 from vector<1x1x1xf32>
    %cst_70 = arith.constant 1.280000e+02 : f32
    %233 = arith.divf %232, %cst_70 : f32
    %234 = vector.broadcast %233 : f32 to vector<8x16xf32>
    %235 = arith.subf %228, %234 : vector<8x16xf32>
    %236 = arith.mulf %235, %235 : vector<8x16xf32>
    %237 = vector.shape_cast %236 : vector<8x16xf32> to vector<1x8x16xf32>
    %cst_71 = arith.constant dense<0.000000e+00> : vector<1xf32>
    %238 = vector.multi_reduction <add>, %237, %cst_71 [1, 2] : vector<1x8x16xf32> to vector<1xf32>
    %239 = vector.shape_cast %238 : vector<1xf32> to vector<1x1x1xf32>
    %240 = vector.extract %239[0, 0, 0] : f32 from vector<1x1x1xf32>
    %cst_72 = arith.constant 1.280000e+02 : f32
    %241 = arith.divf %240, %cst_72 : f32
    %242 = vector.broadcast %233 : f32 to vector<8x16xf32>
    %243 = arith.subf %228, %242 : vector<8x16xf32>
    %cst_73 = arith.constant 9.99999974E-6 : f32
    %244 = arith.addf %241, %cst_73 : f32
    %245 = math.rsqrt %244 : f32
    %246 = vector.broadcast %245 : f32 to vector<8x16xf32>
    %247 = arith.mulf %243, %246 : vector<8x16xf32>
    %248 = vector.broadcast %12 : vector<8x1xf32> to vector<8x16xf32>
    %249 = arith.mulf %247, %248 : vector<8x16xf32>
    %250 = vector.broadcast %13 : vector<8x1xf32> to vector<8x16xf32>
    %251 = arith.addf %249, %250 : vector<8x16xf32>
    %252 = vector.broadcast %14 : vector<8x1xf32> to vector<8x16xf32>
    %253 = arith.mulf %251, %252 : vector<8x16xf32>
    %254 = vector.broadcast %15 : vector<8x1xf32> to vector<8x16xf32>
    %255 = arith.mulf %251, %254 : vector<8x16xf32>
    %256 = vector.broadcast %16 : vector<8x1xf32> to vector<8x16xf32>
    %257 = arith.mulf %251, %256 : vector<8x16xf32>
    %258 = vector.extract_strided_slice %253 {offsets = [0, 0], sizes = [4, 16], strides = [1, 1]} : vector<8x16xf32> to vector<4x16xf32>
    %259 = arith.truncf %258 : vector<4x16xf32> to vector<4x16xbf16>
    %260 = vector.extract_strided_slice %255 {offsets = [0, 0], sizes = [4, 16], strides = [1, 1]} : vector<8x16xf32> to vector<4x16xf32>
    %261 = arith.truncf %260 : vector<4x16xf32> to vector<4x16xbf16>
    %262 = vector.extract_strided_slice %257 {offsets = [0, 0], sizes = [4, 16], strides = [1, 1]} : vector<8x16xf32> to vector<4x16xf32>
    %263 = arith.truncf %262 : vector<4x16xf32> to vector<4x16xbf16>
    %cst_74 = arith.constant dense<0.000000e+00> : vector<4x4xf32>
    %264 = tpu.matmul %259, %261, %cst_74 {dimension_numbers = #tpu.dot_dimension_numbers<[1], [1], [0], [0], [0, 0, 1, 0], [], []>} : vector<4x16xbf16>, vector<4x16xbf16>, vector<4x4xf32> -> vector<4x4xf32>
    %cst_75 = arith.constant 5.000000e-01 : f32
    %265 = vector.broadcast %cst_75 : f32 to vector<4x4xf32>
    %266 = arith.mulf %264, %265 : vector<4x4xf32>
    %cst_76 = arith.constant dense<0xFF800000> : vector<4xf32>
    %267 = vector.multi_reduction <maximumf>, %266, %cst_76 [1] : vector<4x4xf32> to vector<4xf32>
    %cst_77 = arith.constant 0xFF800000 : f32
    %268 = vector.broadcast %cst_77 : f32 to vector<4xf32>
    %269 = arith.maximumf %268, %267 : vector<4xf32>
    %270 = vector.shape_cast %269 : vector<4xf32> to vector<4x1xf32>
    %271 = vector.broadcast %270 : vector<4x1xf32> to vector<4x4xf32>
    %272 = arith.subf %266, %271 : vector<4x4xf32>
    %273 = math.exp %272 : vector<4x4xf32>
    %cst_78 = arith.constant dense<0.000000e+00> : vector<4xf32>
    %274 = vector.multi_reduction <add>, %273, %cst_78 [1] : vector<4x4xf32> to vector<4xf32>
    %275 = vector.shape_cast %274 : vector<4xf32> to vector<4x1xf32>
    %276 = vector.broadcast %275 : vector<4x1xf32> to vector<4x4xf32>
    %277 = arith.divf %273, %276 : vector<4x4xf32>
    %278 = arith.truncf %277 : vector<4x4xf32> to vector<4x4xbf16>
    %cst_79 = arith.constant dense<0.000000e+00> : vector<4x16xf32>
    %279 = tpu.matmul %278, %263, %cst_79 {dimension_numbers = #tpu.dot_dimension_numbers<[1], [0], [0], [1], [0, 0, 1, 1], [], []>} : vector<4x4xbf16>, vector<4x16xbf16>, vector<4x16xf32> -> vector<4x16xf32>
    %cst_80 = arith.constant dense<0.000000e+00> : vector<4xf32>
    %280 = vector.multi_reduction <add>, %279, %cst_80 [1] : vector<4x16xf32> to vector<4xf32>
    %281 = vector.shape_cast %280 : vector<4xf32> to vector<4x1xf32>
    %cst_81 = arith.constant 1.600000e+01 : f32
    %282 = vector.broadcast %cst_81 : f32 to vector<4x1xf32>
    %283 = arith.divf %281, %282 : vector<4x1xf32>
    %284 = vector.extract_strided_slice %253 {offsets = [4, 0], sizes = [4, 16], strides = [1, 1]} : vector<8x16xf32> to vector<4x16xf32>
    %285 = arith.truncf %284 : vector<4x16xf32> to vector<4x16xbf16>
    %286 = vector.extract_strided_slice %255 {offsets = [4, 0], sizes = [4, 16], strides = [1, 1]} : vector<8x16xf32> to vector<4x16xf32>
    %287 = arith.truncf %286 : vector<4x16xf32> to vector<4x16xbf16>
    %288 = vector.extract_strided_slice %257 {offsets = [4, 0], sizes = [4, 16], strides = [1, 1]} : vector<8x16xf32> to vector<4x16xf32>
    %289 = arith.truncf %288 : vector<4x16xf32> to vector<4x16xbf16>
    %cst_82 = arith.constant dense<0.000000e+00> : vector<4x4xf32>
    %290 = tpu.matmul %285, %287, %cst_82 {dimension_numbers = #tpu.dot_dimension_numbers<[1], [1], [0], [0], [0, 0, 1, 0], [], []>} : vector<4x16xbf16>, vector<4x16xbf16>, vector<4x4xf32> -> vector<4x4xf32>
    %cst_83 = arith.constant 5.000000e-01 : f32
    %291 = vector.broadcast %cst_83 : f32 to vector<4x4xf32>
    %292 = arith.mulf %290, %291 : vector<4x4xf32>
    %cst_84 = arith.constant dense<0xFF800000> : vector<4xf32>
    %293 = vector.multi_reduction <maximumf>, %292, %cst_84 [1] : vector<4x4xf32> to vector<4xf32>
    %cst_85 = arith.constant 0xFF800000 : f32
    %294 = vector.broadcast %cst_85 : f32 to vector<4xf32>
    %295 = arith.maximumf %294, %293 : vector<4xf32>
    %296 = vector.shape_cast %295 : vector<4xf32> to vector<4x1xf32>
    %297 = vector.broadcast %296 : vector<4x1xf32> to vector<4x4xf32>
    %298 = arith.subf %292, %297 : vector<4x4xf32>
    %299 = math.exp %298 : vector<4x4xf32>
    %cst_86 = arith.constant dense<0.000000e+00> : vector<4xf32>
    %300 = vector.multi_reduction <add>, %299, %cst_86 [1] : vector<4x4xf32> to vector<4xf32>
    %301 = vector.shape_cast %300 : vector<4xf32> to vector<4x1xf32>
    %302 = vector.broadcast %301 : vector<4x1xf32> to vector<4x4xf32>
    %303 = arith.divf %299, %302 : vector<4x4xf32>
    %304 = arith.truncf %303 : vector<4x4xf32> to vector<4x4xbf16>
    %cst_87 = arith.constant dense<0.000000e+00> : vector<4x16xf32>
    %305 = tpu.matmul %304, %289, %cst_87 {dimension_numbers = #tpu.dot_dimension_numbers<[1], [0], [0], [1], [0, 0, 1, 1], [], []>} : vector<4x4xbf16>, vector<4x16xbf16>, vector<4x16xf32> -> vector<4x16xf32>
    %cst_88 = arith.constant dense<0.000000e+00> : vector<4xf32>
    %306 = vector.multi_reduction <add>, %305, %cst_88 [1] : vector<4x16xf32> to vector<4xf32>
    %307 = vector.shape_cast %306 : vector<4xf32> to vector<4x1xf32>
    %cst_89 = arith.constant 1.600000e+01 : f32
    %308 = vector.broadcast %cst_89 : f32 to vector<4x1xf32>
    %309 = arith.divf %307, %308 : vector<4x1xf32>
    %310 = tpu.concatenate %283, %309 in 0 : vector<4x1xf32>, vector<4x1xf32> -> vector<8x1xf32>
    %311 = arith.negf %310 : vector<8x1xf32>
    %312 = math.exp %311 : vector<8x1xf32>
    %cst_90 = arith.constant 1.000000e+00 : f32
    %313 = vector.broadcast %cst_90 : f32 to vector<8x1xf32>
    %314 = arith.addf %313, %312 : vector<8x1xf32>
    %315 = arith.divf %313, %314 : vector<8x1xf32>
    %316 = vector.broadcast %315 : vector<8x1xf32> to vector<8x64xf32>
    %317 = arith.mulf %215, %316 : vector<8x64xf32>
    %318 = vector.extract_strided_slice %0 {offsets = [0, 64], sizes = [32, 64], strides = [1, 1]} : vector<32x128xbf16> to vector<32x64xbf16>
    %cst_91 = arith.constant dense<0.000000e+00> : vector<32x8xf32>
    %319 = tpu.matmul %318, %4, %cst_91 {dimension_numbers = #tpu.dot_dimension_numbers<[1], [0], [0], [1], [0, 0, 1, 1], [], []>} : vector<32x64xbf16>, vector<64x8xbf16>, vector<32x8xf32> -> vector<32x8xf32>
    %cst_92 = arith.constant dense<0.000000e+00> : vector<32x8xf32>
    %320 = tpu.matmul %318, %5, %cst_92 {dimension_numbers = #tpu.dot_dimension_numbers<[1], [0], [0], [1], [0, 0, 1, 1], [], []>} : vector<32x64xbf16>, vector<64x8xbf16>, vector<32x8xf32> -> vector<32x8xf32>
    %321 = arith.truncf %319 : vector<32x8xf32> to vector<32x8xbf16>
    %cst_93 = arith.constant dense<0.000000e+00> : vector<8x8xf32>
    %322 = tpu.matmul %1, %321, %cst_93 {dimension_numbers = #tpu.dot_dimension_numbers<[1], [0], [0], [1], [0, 0, 1, 1], [], []>} : vector<8x32xbf16>, vector<32x8xbf16>, vector<8x8xf32> -> vector<8x8xf32>
    %323 = arith.truncf %320 : vector<32x8xf32> to vector<32x8xbf16>
    %cst_94 = arith.constant dense<0.000000e+00> : vector<8x8xf32>
    %324 = tpu.matmul %1, %323, %cst_94 {dimension_numbers = #tpu.dot_dimension_numbers<[1], [0], [0], [1], [0, 0, 1, 1], [], []>} : vector<8x32xbf16>, vector<32x8xbf16>, vector<8x8xf32> -> vector<8x8xf32>
    %325 = vector.extract_strided_slice %322 {offsets = [0, 0], sizes = [2, 8], strides = [1, 1]} : vector<8x8xf32> to vector<2x8xf32>
    %326 = vector.shape_cast %325 : vector<2x8xf32> to vector<1x2x8xf32>
    %cst_95 = arith.constant dense<0.000000e+00> : vector<1xf32>
    %327 = vector.multi_reduction <add>, %326, %cst_95 [1, 2] : vector<1x2x8xf32> to vector<1xf32>
    %328 = vector.shape_cast %327 : vector<1xf32> to vector<1x1x1xf32>
    %329 = vector.extract %328[0, 0, 0] : f32 from vector<1x1x1xf32>
    %cst_96 = arith.constant 1.600000e+01 : f32
    %330 = arith.divf %329, %cst_96 : f32
    %331 = vector.broadcast %330 : f32 to vector<2x8xf32>
    %332 = arith.subf %325, %331 : vector<2x8xf32>
    %333 = arith.mulf %332, %332 : vector<2x8xf32>
    %334 = vector.shape_cast %333 : vector<2x8xf32> to vector<1x2x8xf32>
    %cst_97 = arith.constant dense<0.000000e+00> : vector<1xf32>
    %335 = vector.multi_reduction <add>, %334, %cst_97 [1, 2] : vector<1x2x8xf32> to vector<1xf32>
    %336 = vector.shape_cast %335 : vector<1xf32> to vector<1x1x1xf32>
    %337 = vector.extract %336[0, 0, 0] : f32 from vector<1x1x1xf32>
    %cst_98 = arith.constant 1.600000e+01 : f32
    %338 = arith.divf %337, %cst_98 : f32
    %339 = vector.broadcast %330 : f32 to vector<2x8xf32>
    %340 = arith.subf %325, %339 : vector<2x8xf32>
    %cst_99 = arith.constant 9.99999974E-6 : f32
    %341 = arith.addf %338, %cst_99 : f32
    %342 = math.rsqrt %341 : f32
    %343 = vector.broadcast %342 : f32 to vector<2x8xf32>
    %344 = arith.mulf %340, %343 : vector<2x8xf32>
    %345 = vector.extract_strided_slice %322 {offsets = [2, 0], sizes = [2, 8], strides = [1, 1]} : vector<8x8xf32> to vector<2x8xf32>
    %346 = vector.shape_cast %345 : vector<2x8xf32> to vector<1x2x8xf32>
    %cst_100 = arith.constant dense<0.000000e+00> : vector<1xf32>
    %347 = vector.multi_reduction <add>, %346, %cst_100 [1, 2] : vector<1x2x8xf32> to vector<1xf32>
    %348 = vector.shape_cast %347 : vector<1xf32> to vector<1x1x1xf32>
    %349 = vector.extract %348[0, 0, 0] : f32 from vector<1x1x1xf32>
    %cst_101 = arith.constant 1.600000e+01 : f32
    %350 = arith.divf %349, %cst_101 : f32
    %351 = vector.broadcast %350 : f32 to vector<2x8xf32>
    %352 = arith.subf %345, %351 : vector<2x8xf32>
    %353 = arith.mulf %352, %352 : vector<2x8xf32>
    %354 = vector.shape_cast %353 : vector<2x8xf32> to vector<1x2x8xf32>
    %cst_102 = arith.constant dense<0.000000e+00> : vector<1xf32>
    %355 = vector.multi_reduction <add>, %354, %cst_102 [1, 2] : vector<1x2x8xf32> to vector<1xf32>
    %356 = vector.shape_cast %355 : vector<1xf32> to vector<1x1x1xf32>
    %357 = vector.extract %356[0, 0, 0] : f32 from vector<1x1x1xf32>
    %cst_103 = arith.constant 1.600000e+01 : f32
    %358 = arith.divf %357, %cst_103 : f32
    %359 = vector.broadcast %350 : f32 to vector<2x8xf32>
    %360 = arith.subf %345, %359 : vector<2x8xf32>
    %cst_104 = arith.constant 9.99999974E-6 : f32
    %361 = arith.addf %358, %cst_104 : f32
    %362 = math.rsqrt %361 : f32
    %363 = vector.broadcast %362 : f32 to vector<2x8xf32>
    %364 = arith.mulf %360, %363 : vector<2x8xf32>
    %365 = vector.extract_strided_slice %322 {offsets = [4, 0], sizes = [2, 8], strides = [1, 1]} : vector<8x8xf32> to vector<2x8xf32>
    %366 = vector.shape_cast %365 : vector<2x8xf32> to vector<1x2x8xf32>
    %cst_105 = arith.constant dense<0.000000e+00> : vector<1xf32>
    %367 = vector.multi_reduction <add>, %366, %cst_105 [1, 2] : vector<1x2x8xf32> to vector<1xf32>
    %368 = vector.shape_cast %367 : vector<1xf32> to vector<1x1x1xf32>
    %369 = vector.extract %368[0, 0, 0] : f32 from vector<1x1x1xf32>
    %cst_106 = arith.constant 1.600000e+01 : f32
    %370 = arith.divf %369, %cst_106 : f32
    %371 = vector.broadcast %370 : f32 to vector<2x8xf32>
    %372 = arith.subf %365, %371 : vector<2x8xf32>
    %373 = arith.mulf %372, %372 : vector<2x8xf32>
    %374 = vector.shape_cast %373 : vector<2x8xf32> to vector<1x2x8xf32>
    %cst_107 = arith.constant dense<0.000000e+00> : vector<1xf32>
    %375 = vector.multi_reduction <add>, %374, %cst_107 [1, 2] : vector<1x2x8xf32> to vector<1xf32>
    %376 = vector.shape_cast %375 : vector<1xf32> to vector<1x1x1xf32>
    %377 = vector.extract %376[0, 0, 0] : f32 from vector<1x1x1xf32>
    %cst_108 = arith.constant 1.600000e+01 : f32
    %378 = arith.divf %377, %cst_108 : f32
    %379 = vector.broadcast %370 : f32 to vector<2x8xf32>
    %380 = arith.subf %365, %379 : vector<2x8xf32>
    %cst_109 = arith.constant 9.99999974E-6 : f32
    %381 = arith.addf %378, %cst_109 : f32
    %382 = math.rsqrt %381 : f32
    %383 = vector.broadcast %382 : f32 to vector<2x8xf32>
    %384 = arith.mulf %380, %383 : vector<2x8xf32>
    %385 = vector.extract_strided_slice %322 {offsets = [6, 0], sizes = [2, 8], strides = [1, 1]} : vector<8x8xf32> to vector<2x8xf32>
    %386 = vector.shape_cast %385 : vector<2x8xf32> to vector<1x2x8xf32>
    %cst_110 = arith.constant dense<0.000000e+00> : vector<1xf32>
    %387 = vector.multi_reduction <add>, %386, %cst_110 [1, 2] : vector<1x2x8xf32> to vector<1xf32>
    %388 = vector.shape_cast %387 : vector<1xf32> to vector<1x1x1xf32>
    %389 = vector.extract %388[0, 0, 0] : f32 from vector<1x1x1xf32>
    %cst_111 = arith.constant 1.600000e+01 : f32
    %390 = arith.divf %389, %cst_111 : f32
    %391 = vector.broadcast %390 : f32 to vector<2x8xf32>
    %392 = arith.subf %385, %391 : vector<2x8xf32>
    %393 = arith.mulf %392, %392 : vector<2x8xf32>
    %394 = vector.shape_cast %393 : vector<2x8xf32> to vector<1x2x8xf32>
    %cst_112 = arith.constant dense<0.000000e+00> : vector<1xf32>
    %395 = vector.multi_reduction <add>, %394, %cst_112 [1, 2] : vector<1x2x8xf32> to vector<1xf32>
    %396 = vector.shape_cast %395 : vector<1xf32> to vector<1x1x1xf32>
    %397 = vector.extract %396[0, 0, 0] : f32 from vector<1x1x1xf32>
    %cst_113 = arith.constant 1.600000e+01 : f32
    %398 = arith.divf %397, %cst_113 : f32
    %399 = vector.broadcast %390 : f32 to vector<2x8xf32>
    %400 = arith.subf %385, %399 : vector<2x8xf32>
    %cst_114 = arith.constant 9.99999974E-6 : f32
    %401 = arith.addf %398, %cst_114 : f32
    %402 = math.rsqrt %401 : f32
    %403 = vector.broadcast %402 : f32 to vector<2x8xf32>
    %404 = arith.mulf %400, %403 : vector<2x8xf32>
    %405 = tpu.concatenate %344, %364, %384, %404 in 0 : vector<2x8xf32>, vector<2x8xf32>, vector<2x8xf32>, vector<2x8xf32> -> vector<8x8xf32>
    %406 = vector.broadcast %8 : vector<8x1xf32> to vector<8x8xf32>
    %407 = arith.mulf %405, %406 : vector<8x8xf32>
    %408 = vector.broadcast %9 : vector<8x1xf32> to vector<8x8xf32>
    %409 = arith.addf %407, %408 : vector<8x8xf32>
    %410 = arith.negf %409 : vector<8x8xf32>
    %411 = math.exp %410 : vector<8x8xf32>
    %cst_115 = arith.constant 1.000000e+00 : f32
    %412 = vector.broadcast %cst_115 : f32 to vector<8x8xf32>
    %413 = arith.addf %412, %411 : vector<8x8xf32>
    %414 = arith.divf %412, %413 : vector<8x8xf32>
    %415 = vector.extract_strided_slice %324 {offsets = [0, 0], sizes = [2, 8], strides = [1, 1]} : vector<8x8xf32> to vector<2x8xf32>
    %416 = vector.shape_cast %415 : vector<2x8xf32> to vector<1x2x8xf32>
    %cst_116 = arith.constant dense<0.000000e+00> : vector<1xf32>
    %417 = vector.multi_reduction <add>, %416, %cst_116 [1, 2] : vector<1x2x8xf32> to vector<1xf32>
    %418 = vector.shape_cast %417 : vector<1xf32> to vector<1x1x1xf32>
    %419 = vector.extract %418[0, 0, 0] : f32 from vector<1x1x1xf32>
    %cst_117 = arith.constant 1.600000e+01 : f32
    %420 = arith.divf %419, %cst_117 : f32
    %421 = vector.broadcast %420 : f32 to vector<2x8xf32>
    %422 = arith.subf %415, %421 : vector<2x8xf32>
    %423 = arith.mulf %422, %422 : vector<2x8xf32>
    %424 = vector.shape_cast %423 : vector<2x8xf32> to vector<1x2x8xf32>
    %cst_118 = arith.constant dense<0.000000e+00> : vector<1xf32>
    %425 = vector.multi_reduction <add>, %424, %cst_118 [1, 2] : vector<1x2x8xf32> to vector<1xf32>
    %426 = vector.shape_cast %425 : vector<1xf32> to vector<1x1x1xf32>
    %427 = vector.extract %426[0, 0, 0] : f32 from vector<1x1x1xf32>
    %cst_119 = arith.constant 1.600000e+01 : f32
    %428 = arith.divf %427, %cst_119 : f32
    %429 = vector.broadcast %420 : f32 to vector<2x8xf32>
    %430 = arith.subf %415, %429 : vector<2x8xf32>
    %cst_120 = arith.constant 9.99999974E-6 : f32
    %431 = arith.addf %428, %cst_120 : f32
    %432 = math.rsqrt %431 : f32
    %433 = vector.broadcast %432 : f32 to vector<2x8xf32>
    %434 = arith.mulf %430, %433 : vector<2x8xf32>
    %435 = vector.extract_strided_slice %324 {offsets = [2, 0], sizes = [2, 8], strides = [1, 1]} : vector<8x8xf32> to vector<2x8xf32>
    %436 = vector.shape_cast %435 : vector<2x8xf32> to vector<1x2x8xf32>
    %cst_121 = arith.constant dense<0.000000e+00> : vector<1xf32>
    %437 = vector.multi_reduction <add>, %436, %cst_121 [1, 2] : vector<1x2x8xf32> to vector<1xf32>
    %438 = vector.shape_cast %437 : vector<1xf32> to vector<1x1x1xf32>
    %439 = vector.extract %438[0, 0, 0] : f32 from vector<1x1x1xf32>
    %cst_122 = arith.constant 1.600000e+01 : f32
    %440 = arith.divf %439, %cst_122 : f32
    %441 = vector.broadcast %440 : f32 to vector<2x8xf32>
    %442 = arith.subf %435, %441 : vector<2x8xf32>
    %443 = arith.mulf %442, %442 : vector<2x8xf32>
    %444 = vector.shape_cast %443 : vector<2x8xf32> to vector<1x2x8xf32>
    %cst_123 = arith.constant dense<0.000000e+00> : vector<1xf32>
    %445 = vector.multi_reduction <add>, %444, %cst_123 [1, 2] : vector<1x2x8xf32> to vector<1xf32>
    %446 = vector.shape_cast %445 : vector<1xf32> to vector<1x1x1xf32>
    %447 = vector.extract %446[0, 0, 0] : f32 from vector<1x1x1xf32>
    %cst_124 = arith.constant 1.600000e+01 : f32
    %448 = arith.divf %447, %cst_124 : f32
    %449 = vector.broadcast %440 : f32 to vector<2x8xf32>
    %450 = arith.subf %435, %449 : vector<2x8xf32>
    %cst_125 = arith.constant 9.99999974E-6 : f32
    %451 = arith.addf %448, %cst_125 : f32
    %452 = math.rsqrt %451 : f32
    %453 = vector.broadcast %452 : f32 to vector<2x8xf32>
    %454 = arith.mulf %450, %453 : vector<2x8xf32>
    %455 = vector.extract_strided_slice %324 {offsets = [4, 0], sizes = [2, 8], strides = [1, 1]} : vector<8x8xf32> to vector<2x8xf32>
    %456 = vector.shape_cast %455 : vector<2x8xf32> to vector<1x2x8xf32>
    %cst_126 = arith.constant dense<0.000000e+00> : vector<1xf32>
    %457 = vector.multi_reduction <add>, %456, %cst_126 [1, 2] : vector<1x2x8xf32> to vector<1xf32>
    %458 = vector.shape_cast %457 : vector<1xf32> to vector<1x1x1xf32>
    %459 = vector.extract %458[0, 0, 0] : f32 from vector<1x1x1xf32>
    %cst_127 = arith.constant 1.600000e+01 : f32
    %460 = arith.divf %459, %cst_127 : f32
    %461 = vector.broadcast %460 : f32 to vector<2x8xf32>
    %462 = arith.subf %455, %461 : vector<2x8xf32>
    %463 = arith.mulf %462, %462 : vector<2x8xf32>
    %464 = vector.shape_cast %463 : vector<2x8xf32> to vector<1x2x8xf32>
    %cst_128 = arith.constant dense<0.000000e+00> : vector<1xf32>
    %465 = vector.multi_reduction <add>, %464, %cst_128 [1, 2] : vector<1x2x8xf32> to vector<1xf32>
    %466 = vector.shape_cast %465 : vector<1xf32> to vector<1x1x1xf32>
    %467 = vector.extract %466[0, 0, 0] : f32 from vector<1x1x1xf32>
    %cst_129 = arith.constant 1.600000e+01 : f32
    %468 = arith.divf %467, %cst_129 : f32
    %469 = vector.broadcast %460 : f32 to vector<2x8xf32>
    %470 = arith.subf %455, %469 : vector<2x8xf32>
    %cst_130 = arith.constant 9.99999974E-6 : f32
    %471 = arith.addf %468, %cst_130 : f32
    %472 = math.rsqrt %471 : f32
    %473 = vector.broadcast %472 : f32 to vector<2x8xf32>
    %474 = arith.mulf %470, %473 : vector<2x8xf32>
    %475 = vector.extract_strided_slice %324 {offsets = [6, 0], sizes = [2, 8], strides = [1, 1]} : vector<8x8xf32> to vector<2x8xf32>
    %476 = vector.shape_cast %475 : vector<2x8xf32> to vector<1x2x8xf32>
    %cst_131 = arith.constant dense<0.000000e+00> : vector<1xf32>
    %477 = vector.multi_reduction <add>, %476, %cst_131 [1, 2] : vector<1x2x8xf32> to vector<1xf32>
    %478 = vector.shape_cast %477 : vector<1xf32> to vector<1x1x1xf32>
    %479 = vector.extract %478[0, 0, 0] : f32 from vector<1x1x1xf32>
    %cst_132 = arith.constant 1.600000e+01 : f32
    %480 = arith.divf %479, %cst_132 : f32
    %481 = vector.broadcast %480 : f32 to vector<2x8xf32>
    %482 = arith.subf %475, %481 : vector<2x8xf32>
    %483 = arith.mulf %482, %482 : vector<2x8xf32>
    %484 = vector.shape_cast %483 : vector<2x8xf32> to vector<1x2x8xf32>
    %cst_133 = arith.constant dense<0.000000e+00> : vector<1xf32>
    %485 = vector.multi_reduction <add>, %484, %cst_133 [1, 2] : vector<1x2x8xf32> to vector<1xf32>
    %486 = vector.shape_cast %485 : vector<1xf32> to vector<1x1x1xf32>
    %487 = vector.extract %486[0, 0, 0] : f32 from vector<1x1x1xf32>
    %cst_134 = arith.constant 1.600000e+01 : f32
    %488 = arith.divf %487, %cst_134 : f32
    %489 = vector.broadcast %480 : f32 to vector<2x8xf32>
    %490 = arith.subf %475, %489 : vector<2x8xf32>
    %cst_135 = arith.constant 9.99999974E-6 : f32
    %491 = arith.addf %488, %cst_135 : f32
    %492 = math.rsqrt %491 : f32
    %493 = vector.broadcast %492 : f32 to vector<2x8xf32>
    %494 = arith.mulf %490, %493 : vector<2x8xf32>
    %495 = tpu.concatenate %434, %454, %474, %494 in 0 : vector<2x8xf32>, vector<2x8xf32>, vector<2x8xf32>, vector<2x8xf32> -> vector<8x8xf32>
    %496 = vector.broadcast %10 : vector<8x1xf32> to vector<8x8xf32>
    %497 = arith.mulf %495, %496 : vector<8x8xf32>
    %498 = vector.broadcast %11 : vector<8x1xf32> to vector<8x8xf32>
    %499 = arith.addf %497, %498 : vector<8x8xf32>
    %500 = arith.negf %499 : vector<8x8xf32>
    %501 = math.exp %500 : vector<8x8xf32>
    %cst_136 = arith.constant 1.000000e+00 : f32
    %502 = vector.broadcast %cst_136 : f32 to vector<8x8xf32>
    %503 = arith.addf %502, %501 : vector<8x8xf32>
    %504 = arith.divf %502, %503 : vector<8x8xf32>
    %505 = arith.truncf %414 : vector<8x8xf32> to vector<8x8xbf16>
    %cst_137 = arith.constant dense<0.000000e+00> : vector<8x64xf32>
    %506 = tpu.matmul %505, %4, %cst_137 {dimension_numbers = #tpu.dot_dimension_numbers<[1], [1], [0], [0], [0, 0, 1, 0], [], []>} : vector<8x8xbf16>, vector<64x8xbf16>, vector<8x64xf32> -> vector<8x64xf32>
    %cst_138 = arith.constant 8.000000e+00 : f32
    %507 = vector.broadcast %cst_138 : f32 to vector<8x64xf32>
    %508 = arith.mulf %506, %507 : vector<8x64xf32>
    %509 = arith.truncf %504 : vector<8x8xf32> to vector<8x8xbf16>
    %cst_139 = arith.constant dense<0.000000e+00> : vector<8x64xf32>
    %510 = tpu.matmul %509, %5, %cst_139 {dimension_numbers = #tpu.dot_dimension_numbers<[1], [1], [0], [0], [0, 0, 1, 0], [], []>} : vector<8x8xbf16>, vector<64x8xbf16>, vector<8x64xf32> -> vector<8x64xf32>
    %cst_140 = arith.constant 8.000000e+00 : f32
    %511 = vector.broadcast %cst_140 : f32 to vector<8x64xf32>
    %512 = arith.mulf %510, %511 : vector<8x64xf32>
    %513 = vector.extract_strided_slice %17 {offsets = [0, 64], sizes = [8, 64], strides = [1, 1]} : vector<8x128xf32> to vector<8x64xf32>
    %514 = arith.mulf %513, %508 : vector<8x64xf32>
    %515 = arith.mulf %514, %512 : vector<8x64xf32>
    %516 = vector.extract_strided_slice %515 {offsets = [0, 0], sizes = [8, 16], strides = [1, 1]} : vector<8x64xf32> to vector<8x16xf32>
    %517 = arith.truncf %516 : vector<8x16xf32> to vector<8x16xbf16>
    %cst_141 = arith.constant dense<0.000000e+00> : vector<8x4xf32>
    %518 = tpu.matmul %517, %6, %cst_141 {dimension_numbers = #tpu.dot_dimension_numbers<[1], [0], [0], [1], [0, 0, 1, 1], [], []>} : vector<8x16xbf16>, vector<16x4xbf16>, vector<8x4xf32> -> vector<8x4xf32>
    %519 = vector.extract_strided_slice %515 {offsets = [0, 16], sizes = [8, 16], strides = [1, 1]} : vector<8x64xf32> to vector<8x16xf32>
    %520 = arith.truncf %519 : vector<8x16xf32> to vector<8x16xbf16>
    %cst_142 = arith.constant dense<0.000000e+00> : vector<8x4xf32>
    %521 = tpu.matmul %520, %6, %cst_142 {dimension_numbers = #tpu.dot_dimension_numbers<[1], [0], [0], [1], [0, 0, 1, 1], [], []>} : vector<8x16xbf16>, vector<16x4xbf16>, vector<8x4xf32> -> vector<8x4xf32>
    %522 = vector.extract_strided_slice %515 {offsets = [0, 32], sizes = [8, 16], strides = [1, 1]} : vector<8x64xf32> to vector<8x16xf32>
    %523 = arith.truncf %522 : vector<8x16xf32> to vector<8x16xbf16>
    %cst_143 = arith.constant dense<0.000000e+00> : vector<8x4xf32>
    %524 = tpu.matmul %523, %6, %cst_143 {dimension_numbers = #tpu.dot_dimension_numbers<[1], [0], [0], [1], [0, 0, 1, 1], [], []>} : vector<8x16xbf16>, vector<16x4xbf16>, vector<8x4xf32> -> vector<8x4xf32>
    %525 = vector.extract_strided_slice %515 {offsets = [0, 48], sizes = [8, 16], strides = [1, 1]} : vector<8x64xf32> to vector<8x16xf32>
    %526 = arith.truncf %525 : vector<8x16xf32> to vector<8x16xbf16>
    %cst_144 = arith.constant dense<0.000000e+00> : vector<8x4xf32>
    %527 = tpu.matmul %526, %6, %cst_144 {dimension_numbers = #tpu.dot_dimension_numbers<[1], [0], [0], [1], [0, 0, 1, 1], [], []>} : vector<8x16xbf16>, vector<16x4xbf16>, vector<8x4xf32> -> vector<8x4xf32>
    %528 = tpu.concatenate %518, %521, %524, %527 in 1 : vector<8x4xf32>, vector<8x4xf32>, vector<8x4xf32>, vector<8x4xf32> -> vector<8x16xf32>
    %529 = vector.shape_cast %528 : vector<8x16xf32> to vector<1x8x16xf32>
    %cst_145 = arith.constant dense<0.000000e+00> : vector<1xf32>
    %530 = vector.multi_reduction <add>, %529, %cst_145 [1, 2] : vector<1x8x16xf32> to vector<1xf32>
    %531 = vector.shape_cast %530 : vector<1xf32> to vector<1x1x1xf32>
    %532 = vector.extract %531[0, 0, 0] : f32 from vector<1x1x1xf32>
    %cst_146 = arith.constant 1.280000e+02 : f32
    %533 = arith.divf %532, %cst_146 : f32
    %534 = vector.broadcast %533 : f32 to vector<8x16xf32>
    %535 = arith.subf %528, %534 : vector<8x16xf32>
    %536 = arith.mulf %535, %535 : vector<8x16xf32>
    %537 = vector.shape_cast %536 : vector<8x16xf32> to vector<1x8x16xf32>
    %cst_147 = arith.constant dense<0.000000e+00> : vector<1xf32>
    %538 = vector.multi_reduction <add>, %537, %cst_147 [1, 2] : vector<1x8x16xf32> to vector<1xf32>
    %539 = vector.shape_cast %538 : vector<1xf32> to vector<1x1x1xf32>
    %540 = vector.extract %539[0, 0, 0] : f32 from vector<1x1x1xf32>
    %cst_148 = arith.constant 1.280000e+02 : f32
    %541 = arith.divf %540, %cst_148 : f32
    %542 = vector.broadcast %533 : f32 to vector<8x16xf32>
    %543 = arith.subf %528, %542 : vector<8x16xf32>
    %cst_149 = arith.constant 9.99999974E-6 : f32
    %544 = arith.addf %541, %cst_149 : f32
    %545 = math.rsqrt %544 : f32
    %546 = vector.broadcast %545 : f32 to vector<8x16xf32>
    %547 = arith.mulf %543, %546 : vector<8x16xf32>
    %548 = vector.broadcast %12 : vector<8x1xf32> to vector<8x16xf32>
    %549 = arith.mulf %547, %548 : vector<8x16xf32>
    %550 = vector.broadcast %13 : vector<8x1xf32> to vector<8x16xf32>
    %551 = arith.addf %549, %550 : vector<8x16xf32>
    %552 = vector.broadcast %14 : vector<8x1xf32> to vector<8x16xf32>
    %553 = arith.mulf %551, %552 : vector<8x16xf32>
    %554 = vector.broadcast %15 : vector<8x1xf32> to vector<8x16xf32>
    %555 = arith.mulf %551, %554 : vector<8x16xf32>
    %556 = vector.broadcast %16 : vector<8x1xf32> to vector<8x16xf32>
    %557 = arith.mulf %551, %556 : vector<8x16xf32>
    %558 = vector.extract_strided_slice %553 {offsets = [0, 0], sizes = [4, 16], strides = [1, 1]} : vector<8x16xf32> to vector<4x16xf32>
    %559 = arith.truncf %558 : vector<4x16xf32> to vector<4x16xbf16>
    %560 = vector.extract_strided_slice %555 {offsets = [0, 0], sizes = [4, 16], strides = [1, 1]} : vector<8x16xf32> to vector<4x16xf32>
    %561 = arith.truncf %560 : vector<4x16xf32> to vector<4x16xbf16>
    %562 = vector.extract_strided_slice %557 {offsets = [0, 0], sizes = [4, 16], strides = [1, 1]} : vector<8x16xf32> to vector<4x16xf32>
    %563 = arith.truncf %562 : vector<4x16xf32> to vector<4x16xbf16>
    %cst_150 = arith.constant dense<0.000000e+00> : vector<4x4xf32>
    %564 = tpu.matmul %559, %561, %cst_150 {dimension_numbers = #tpu.dot_dimension_numbers<[1], [1], [0], [0], [0, 0, 1, 0], [], []>} : vector<4x16xbf16>, vector<4x16xbf16>, vector<4x4xf32> -> vector<4x4xf32>
    %cst_151 = arith.constant 5.000000e-01 : f32
    %565 = vector.broadcast %cst_151 : f32 to vector<4x4xf32>
    %566 = arith.mulf %564, %565 : vector<4x4xf32>
    %cst_152 = arith.constant dense<0xFF800000> : vector<4xf32>
    %567 = vector.multi_reduction <maximumf>, %566, %cst_152 [1] : vector<4x4xf32> to vector<4xf32>
    %cst_153 = arith.constant 0xFF800000 : f32
    %568 = vector.broadcast %cst_153 : f32 to vector<4xf32>
    %569 = arith.maximumf %568, %567 : vector<4xf32>
    %570 = vector.shape_cast %569 : vector<4xf32> to vector<4x1xf32>
    %571 = vector.broadcast %570 : vector<4x1xf32> to vector<4x4xf32>
    %572 = arith.subf %566, %571 : vector<4x4xf32>
    %573 = math.exp %572 : vector<4x4xf32>
    %cst_154 = arith.constant dense<0.000000e+00> : vector<4xf32>
    %574 = vector.multi_reduction <add>, %573, %cst_154 [1] : vector<4x4xf32> to vector<4xf32>
    %575 = vector.shape_cast %574 : vector<4xf32> to vector<4x1xf32>
    %576 = vector.broadcast %575 : vector<4x1xf32> to vector<4x4xf32>
    %577 = arith.divf %573, %576 : vector<4x4xf32>
    %578 = arith.truncf %577 : vector<4x4xf32> to vector<4x4xbf16>
    %cst_155 = arith.constant dense<0.000000e+00> : vector<4x16xf32>
    %579 = tpu.matmul %578, %563, %cst_155 {dimension_numbers = #tpu.dot_dimension_numbers<[1], [0], [0], [1], [0, 0, 1, 1], [], []>} : vector<4x4xbf16>, vector<4x16xbf16>, vector<4x16xf32> -> vector<4x16xf32>
    %cst_156 = arith.constant dense<0.000000e+00> : vector<4xf32>
    %580 = vector.multi_reduction <add>, %579, %cst_156 [1] : vector<4x16xf32> to vector<4xf32>
    %581 = vector.shape_cast %580 : vector<4xf32> to vector<4x1xf32>
    %cst_157 = arith.constant 1.600000e+01 : f32
    %582 = vector.broadcast %cst_157 : f32 to vector<4x1xf32>
    %583 = arith.divf %581, %582 : vector<4x1xf32>
    %584 = vector.extract_strided_slice %553 {offsets = [4, 0], sizes = [4, 16], strides = [1, 1]} : vector<8x16xf32> to vector<4x16xf32>
    %585 = arith.truncf %584 : vector<4x16xf32> to vector<4x16xbf16>
    %586 = vector.extract_strided_slice %555 {offsets = [4, 0], sizes = [4, 16], strides = [1, 1]} : vector<8x16xf32> to vector<4x16xf32>
    %587 = arith.truncf %586 : vector<4x16xf32> to vector<4x16xbf16>
    %588 = vector.extract_strided_slice %557 {offsets = [4, 0], sizes = [4, 16], strides = [1, 1]} : vector<8x16xf32> to vector<4x16xf32>
    %589 = arith.truncf %588 : vector<4x16xf32> to vector<4x16xbf16>
    %cst_158 = arith.constant dense<0.000000e+00> : vector<4x4xf32>
    %590 = tpu.matmul %585, %587, %cst_158 {dimension_numbers = #tpu.dot_dimension_numbers<[1], [1], [0], [0], [0, 0, 1, 0], [], []>} : vector<4x16xbf16>, vector<4x16xbf16>, vector<4x4xf32> -> vector<4x4xf32>
    %cst_159 = arith.constant 5.000000e-01 : f32
    %591 = vector.broadcast %cst_159 : f32 to vector<4x4xf32>
    %592 = arith.mulf %590, %591 : vector<4x4xf32>
    %cst_160 = arith.constant dense<0xFF800000> : vector<4xf32>
    %593 = vector.multi_reduction <maximumf>, %592, %cst_160 [1] : vector<4x4xf32> to vector<4xf32>
    %cst_161 = arith.constant 0xFF800000 : f32
    %594 = vector.broadcast %cst_161 : f32 to vector<4xf32>
    %595 = arith.maximumf %594, %593 : vector<4xf32>
    %596 = vector.shape_cast %595 : vector<4xf32> to vector<4x1xf32>
    %597 = vector.broadcast %596 : vector<4x1xf32> to vector<4x4xf32>
    %598 = arith.subf %592, %597 : vector<4x4xf32>
    %599 = math.exp %598 : vector<4x4xf32>
    %cst_162 = arith.constant dense<0.000000e+00> : vector<4xf32>
    %600 = vector.multi_reduction <add>, %599, %cst_162 [1] : vector<4x4xf32> to vector<4xf32>
    %601 = vector.shape_cast %600 : vector<4xf32> to vector<4x1xf32>
    %602 = vector.broadcast %601 : vector<4x1xf32> to vector<4x4xf32>
    %603 = arith.divf %599, %602 : vector<4x4xf32>
    %604 = arith.truncf %603 : vector<4x4xf32> to vector<4x4xbf16>
    %cst_163 = arith.constant dense<0.000000e+00> : vector<4x16xf32>
    %605 = tpu.matmul %604, %589, %cst_163 {dimension_numbers = #tpu.dot_dimension_numbers<[1], [0], [0], [1], [0, 0, 1, 1], [], []>} : vector<4x4xbf16>, vector<4x16xbf16>, vector<4x16xf32> -> vector<4x16xf32>
    %cst_164 = arith.constant dense<0.000000e+00> : vector<4xf32>
    %606 = vector.multi_reduction <add>, %605, %cst_164 [1] : vector<4x16xf32> to vector<4xf32>
    %607 = vector.shape_cast %606 : vector<4xf32> to vector<4x1xf32>
    %cst_165 = arith.constant 1.600000e+01 : f32
    %608 = vector.broadcast %cst_165 : f32 to vector<4x1xf32>
    %609 = arith.divf %607, %608 : vector<4x1xf32>
    %610 = tpu.concatenate %583, %609 in 0 : vector<4x1xf32>, vector<4x1xf32> -> vector<8x1xf32>
    %611 = arith.negf %610 : vector<8x1xf32>
    %612 = math.exp %611 : vector<8x1xf32>
    %cst_166 = arith.constant 1.000000e+00 : f32
    %613 = vector.broadcast %cst_166 : f32 to vector<8x1xf32>
    %614 = arith.addf %613, %612 : vector<8x1xf32>
    %615 = arith.divf %613, %614 : vector<8x1xf32>
    %616 = vector.broadcast %615 : vector<8x1xf32> to vector<8x64xf32>
    %617 = arith.mulf %515, %616 : vector<8x64xf32>
    %618 = tpu.concatenate %317, %617 in 1 : vector<8x64xf32>, vector<8x64xf32> -> vector<8x128xf32>
    %619 = arith.truncf %618 : vector<8x128xf32> to vector<8x128xbf16>
    %cst_167 = arith.constant dense<0.000000e+00> : vector<32x128xf32>
    %620 = tpu.matmul %3, %619, %cst_167 {dimension_numbers = #tpu.dot_dimension_numbers<[1], [0], [0], [1], [0, 0, 1, 1], [], []>} : vector<32x8xbf16>, vector<8x128xbf16>, vector<32x128xf32> -> vector<32x128xf32>
    %c0_168 = arith.constant 0 : index
    %c0_169 = arith.constant 0 : index
    %621 = vector.load %arg9[%c0_168, %c0_169] : memref<32x128xf32, #tpu.memory_space<vmem>>, vector<32x128xf32>
    tpu.vector_store %arg9[%c0_168, %c0_169], %620 {strides = array<i32>} : memref<32x128xf32, #tpu.memory_space<vmem>>, vector<32x128xf32>,
    return
  }
  func.func @transform_0(%arg0: i32) -> (i32, i32) {
    %c0_i32 = arith.constant 0 : i32
    %c0_i32_0 = arith.constant 0 : i32
    return %c0_i32, %arg0 : i32, i32
  }
  func.func @transform_1(%arg0: i32) -> (i32, i32) {
    %c0_i32 = arith.constant 0 : i32
    %c0_i32_0 = arith.constant 0 : i32
    %c0_i32_1 = arith.constant 0 : i32
    return %c0_i32, %c0_i32_0 : i32, i32
  }
  func.func @transform_2(%arg0: i32) -> (i32, i32) {
    %c0_i32 = arith.constant 0 : i32
    %c0_i32_0 = arith.constant 0 : i32
    %c0_i32_1 = arith.constant 0 : i32
    return %c0_i32, %c0_i32_0 : i32, i32
  }
  func.func @transform_3(%arg0: i32) -> (i32, i32) {
    %c0_i32 = arith.constant 0 : i32
    %c0_i32_0 = arith.constant 0 : i32
    %c0_i32_1 = arith.constant 0 : i32
    return %c0_i32, %c0_i32_0 : i32, i32
  }
  func.func @transform_4(%arg0: i32) -> (i32, i32) {
    %c0_i32 = arith.constant 0 : i32
    %c0_i32_0 = arith.constant 0 : i32
    %c0_i32_1 = arith.constant 0 : i32
    return %c0_i32, %c0_i32_0 : i32, i32
  }
  func.func @transform_5(%arg0: i32) -> (i32, i32) {
    %c0_i32 = arith.constant 0 : i32
    %c0_i32_0 = arith.constant 0 : i32
    %c0_i32_1 = arith.constant 0 : i32
    return %c0_i32, %c0_i32_0 : i32, i32
  }
  func.func @transform_6(%arg0: i32) -> (i32, i32) {
    %c0_i32 = arith.constant 0 : i32
    %c0_i32_0 = arith.constant 0 : i32
    %c0_i32_1 = arith.constant 0 : i32
    return %c0_i32, %c0_i32_0 : i32, i32
  }
  func.func @transform_7(%arg0: i32) -> (i32, i32) {
    %c0_i32 = arith.constant 0 : i32
    %c0_i32_0 = arith.constant 0 : i32
    %c0_i32_1 = arith.constant 0 : i32
    return %c0_i32, %c0_i32_0 : i32, i32
  }
  func.func @transform_8(%arg0: i32) -> (i32, i32) {
    %c0_i32 = arith.constant 0 : i32
    %c0_i32_0 = arith.constant 0 : i32
    return %c0_i32, %arg0 : i32, i32
  }
}

</mosaic_0001>

<bundles_post_ra>
// kernel: fga_forward.1
= control target key start
LH: loop header
LB: loop body
LE: loop exit
PB: predicated region body
PF: predicated region fallthrough
CT: control target
= control target key end

     0   :  { %vm139_vm0 = vcmask 523264   ;;  %v3149_v6 = vmov 0.0   ;;  %vm3150_vm1 = vmmov 0   ;;  %vm71_vm2 = vcmask 261120   ;;  %s3821_s4 = inlined_call_operand.vmem [shape: bf16[64,8], index: 4, kind: input, shape index: {}]   ;;  %s3822_s0 = inlined_call_operand.vmem [shape: bf16[32,128], index: 0, kind: input, shape index: {}]   ;;  %s3823_s1 = inlined_call_operand.vmem [shape: bf16[8,32], index: 1, kind: input, shape index: {}]   ;;  %s3824_s5 = inlined_call_operand.vmem [shape: bf16[64,8], index: 5, kind: input, shape index: {}]   ;;  %s3825_s2 = inlined_call_operand.vmem [shape: bf16[8,32], index: 2, kind: input, shape index: {}]   ;;  %s3826_s7 = inlined_call_operand.vmem [shape: f32[8,9], index: 7, kind: input, shape index: {}]   ;;  %s3827_s6 = inlined_call_operand.vmem [shape: bf16[16,4], index: 6, kind: input, shape index: {}]   ;;  %s3828_s3 = inlined_call_operand.vmem [shape: bf16[32,8], index: 3, kind: input, shape index: {}]   ;;  %s3829_s8 = inlined_call_operand.vmem [shape: f32[32,128], index: 8, kind: output, shape index: {}]  }
   0x1   :  { %v3218_v0 = vld [vmem:[%s3821_s4 + $0x18] sm:$0xff]   ;;  %v3223_v1 = vld [vmem:[%s3821_s4 + $0x10] sm:$0xff]   ;;  %v3230_v2 = vld [vmem:[%s3821_s4 + $0x8] sm:$0xff]   ;;  %2669 = vmatprep.subr.bf16.mxu0 %v3149_v6  ;;  %2673 = vmatprep.mubr.msk.bf16.mxu0 %vm3150_vm1, %v3149_v6  ;;  %vm355_vm3 = vcmask 58368   ;;  %vm512_vm4 = vcmask 1041408   ;;  %vm514_vm5 = vcmask 1043456  }
   0x2   :  { %2677 = vmatprep.subr.bf16.mxu1 %v3218_v0  ;;  %v3236_v3 = vld [vmem:[%s3822_s0] sm:$0xff]   ;;  %v3252_v5 = vld [vmem:[%s3822_s0 + $0x8] sm:$0xff]   ;;  %v3300_v57 = vld [vmem:[%s3824_s5 + $0x18] sm:$0xff]   ;;  %vm516_vm6 = vcmask 1045504   ;;  %vm711_vm7 = vcmask 64512   ;;  %vm834_vm8 = vcmask 130048  }
   0x3   :  { %2678 = vmatpush3.bf16.msra.mxu1 %v3218_v0  ;;  %2685 = vmatprep.mubr.msk.bf16.mxu1 %vm139_vm0, %v3236_v3  ;;  %v3245_v4 = vld [vmem:[%s3821_s4] sm:$0xff]   ;;  %v3310_v59 = vld [vmem:[%s3824_s5 + $0x10] sm:$0xff]   ;;  %v3320_v60 = vld [vmem:[%s3824_s5 + $0x8] sm:$0xff]   ;;  %vm1026_vm9 = vcmask 31744   ;;  %vm1029_vm10 = vcmask 97280   ;;  %vm1141_vm11 = vcmask 27648  }
   0x4   :  { %2679 = vmatprep.subr.bf16.mxu1 %v3223_v1  ;;  %2670 = vmatpush3.bf16.msra.mxu0 %v3252_v5  ;;  %v3270_v13 = vld [vmem:[%s3823_s1] sm:$0xf]  ;;  %vm1200_vm12 = vcmask 125952  }
   0x5   :  { %2671 = vmatprep.subr.bf16.mxu0 %v3149_v6  ;;  %v35_v58 = vld [vmem:[%s3825_s2] sm:$0xf] }
   0x6   :  { %v3327_v61 = vld [vmem:[%s3824_s5] sm:$0xff]  }
   0x7   :  { %2680 = vmatpush3.bf16.msra.mxu1 %v3223_v1 }
   0x8   :  { %2681 = vmatprep.subr.bf16.mxu1 %v3230_v2  ;;  %2672 = vmatpush3.bf16.msra.mxu0 %v3236_v3 }
   0x9   :  { %2689 = vmatprep.subr.bf16.mxu0 %v3300_v57 }
   0xb   :  { %2682 = vmatpush3.bf16.msra.mxu1 %v3230_v2  ;;  %2674 = vmatmul.mubr.msk.bf16.vlgmr.msra.gmra.mxu0 %vm71_vm2, %v35_v58 }
   0xc   :  { %2683 = vmatprep.subr.bf16.mxu1 %v3245_v4  ;;  %2690 = vmatpush3.bf16.msra.mxu0 %v3300_v57 }
   0xd   :  { %2697 = vmatprep.mubr.msk.bf16.mxu0 %vm139_vm0, %v3236_v3  ;;  %2691 = vmatprep.subr.bf16.mxu0 %v3310_v59 }
   0xf   :  { %2684 = vmatpush3.bf16.msra.mxu1 %v3245_v4 }
  0x10   :  { %2701 = vmatprep.subr.bf16.mxu1 %v3149_v6  ;;  %2692 = vmatpush3.bf16.msra.mxu0 %v3310_v59 }
  0x11   :  { %2693 = vmatprep.subr.bf16.mxu0 %v3320_v60 }
  0x12   :  { %2686 = vmatmul.mubr.msk.bf16.vlgmr.msra.gmra.mxu1 %vm139_vm0, %v3252_v5 }
  0x13   :  { %2705 = vmatprep.mubr.msk.bf16.mxu1 %vm3150_vm1, %v3149_v6 }
  0x14   :  { %2694 = vmatpush3.bf16.msra.mxu0 %v3320_v60 }
  0x15   :  { %2695 = vmatprep.subr.bf16.mxu0 %v3327_v61 }
  0x18   :  { %2696 = vmatpush3.bf16.msra.mxu0 %v3327_v61 }
  0x19   :  { %2709 = vmatprep.subr.bf16.mxu0 %v3149_v6 }
  0x1b   :  { %2698 = vmatmul.mubr.msk.bf16.vlgmr.msra.gmra.mxu0 %vm139_vm0, %v3252_v5 }
  0x1c   :  { %2713 = vmatprep.mubr.msk.bf16.mxu0 %vm3150_vm1, %v3149_v6 }
  0xd2   :  { %v2687_v7 = vpop.f32.mrf.mxu1 }
  0xd4   :  { %v180_v8 = vpop.f32.mrf.mxu1 }
  0xd6   :  { %v2688_v9 = vpop.f32.mrf.mxu1 }
  0xd7   :  { %v269_v10 = vpack.c.bf16 %v2688_v9, %v2687_v7 }
  0xd8   :  { %v183_v11 = vpop.f32.mrf.mxu1 }
  0xd9   :  { %2702 = vmatpush3.bf16.msra.mxu1 %v269_v10  ;;  %v268_v12 = vpack.c.bf16 %v183_v11, %v180_v8 }
  0xda   :  { %2703 = vmatprep.subr.bf16.mxu1 %v3149_v6 }
  0xdd   :  { %2704 = vmatpush3.bf16.msra.mxu1 %v268_v12 }
  0xde   :  { %2717 = vmatprep.subr.bf16.mxu1 %v3149_v6 }
  0xe0   :  { %2706 = vmatmul.mubr.msk.bf16.vlgmr.msra.gmra.mxu1 %vm71_vm2, %v3270_v13 }
  0xe1   :  { %2725 = vmatprep.mubr.msk.bf16.mxu1 %vm3150_vm1, %v3149_v6 }
 0x1a0   :  { %v3277_v14 = vpop.f32.mrf.mxu1 }
 0x1a1   :  { %v356_v15 = vsel %vm355_vm3, %v3277_v14, 0.0  ;;  %v392_v16 = vrot.slane %v3277_v14, 2  ;;  %v432_v32 = vrot.slane %v3277_v14, 4  ;;  %v472_v34 = vrot.slane %v3277_v14, 6 }
 0x1a2   :  { %357 = vadd.xlane.f32.xlu0 %v356_v15  ;;  %v2707_v17 = vpop.f32.mrf.mxu1 }
 0x1a3   :  { %v394_v18 = vsel %vm355_vm3, %v392_v16, 0.0  ;;  %v434_v33 = vsel %vm355_vm3, %v432_v32, 0.0  ;;  %v474_v35 = vsel %vm355_vm3, %v472_v34, 0.0 }
 0x1a4   :  { %395 = vadd.xlane.f32.xlu1 %v394_v18  ;;  %v310_v19 = vpop.f32.mrf.mxu1 }
 0x1a5   :  { %v3336_v19 = vpop.f32.mrf.mxu0 }
 0x1a6   :  { %v2708_v20 = vpop.f32.mrf.mxu1 }
 0x22b   :  { %v358_v21 = vpop.xlane.xlu0 %357 }
 0x22c   :  { %v359_v22 = vrot.slane %v358_v21, 4 }
 0x22d   :  { %v396_v43 = vpop.xlane.xlu1 %395 }
 0x22e   :  { %v360_v23 = vadd.f32 %v359_v22, %v358_v21  ;;  %v397_v44 = vrot.slane %v396_v43, 4  ;;  %v2675_v22 = vpop.f32.mrf.mxu0 }
 0x230   :  { %v361_v24 = vrot.slane %v360_v23, 2  ;;  %v398_v45 = vadd.f32 %v397_v44, %v396_v43 }
 0x232   :  { %v362_v25 = vadd.f32 %v361_v24, %v360_v23  ;;  %v399_v47 = vrot.slane %v398_v45, 2  ;;  %v112_v23 = vpop.f32.mrf.mxu0 }
 0x233   :  { %v3151_v23 = vmov 0  }
 0x234   :  { %v363_v26 = vrot.slane %v362_v25, 1  ;;  %v400_v48 = vadd.f32 %v399_v47, %v398_v45  ;;  %v2676_v24 = vpop.f32.mrf.mxu0  ;;  %3037 = vset.pattern.permute.xlu0 %v3151_v23 }
 0x235   :  { %v3369_v24 = vld [vmem:[%s3826_s7] sm:$0xff] }
 0x236   :  { %v364_v27 = vadd.f32 %v363_v26, %v362_v25  ;;  %v401_v49 = vrot.slane %v400_v48, 1  ;;  %v2699_v34 = vpop.f32.mrf.mxu0 }
 0x238   :  { %2908 = vpush %v364_v27  ;;  %v402_v51 = vadd.f32 %v401_v49, %v400_v48 }
 0x269   :  { %s2909_s19 = spop %2908 }
 0x26a   :  { %s368_s20 = smul.f32 0.0625, %s2909_s19 }
 0x26c   :  { %v369_v28 = vstv %s368_s20 }
 0x26d   :  { %v3284_v29 = vsub.f32 %v3277_v14, %v369_v28 }
 0x26f   :  { %v371_v30 = vmul.f32 %v3284_v29, %v3284_v29 }
 0x271   :  { %v372_v31 = vsel %vm355_vm3, %v371_v30, 0.0 }
 0x272   :  { %373 = vadd.xlane.f32.xlu0 %v372_v31 }
 0x276   :  { %435 = vadd.xlane.f32.xlu0 %v434_v33 }
 0x27a   :  { %475 = vadd.xlane.f32.xlu0 %v474_v35 }
 0x2fb   :  { %v374_v36 = vpop.xlane.xlu0 %373 }
 0x2fc   :  { %v375_v37 = vrot.slane %v374_v36, 4 }
 0x2fe   :  { %v376_v38 = vadd.f32 %v375_v37, %v374_v36  ;;  %v253_v36 = vpop.f32.mrf.mxu0 }
 0x2ff   :  { %v436_v11 = vpop.xlane.xlu0 %435 }
 0x300   :  { %v377_v39 = vrot.slane %v376_v38, 2  ;;  %v437_v12 = vrot.slane %v436_v11, 4 }
 0x302   :  { %v378_v40 = vadd.f32 %v377_v39, %v376_v38  ;;  %v438_v15 = vadd.f32 %v437_v12, %v436_v11  ;;  %v2700_v38 = vpop.f32.mrf.mxu0 }
 0x303   :  { %v314_v39 = vpack.c.bf16 %v2700_v38, %v2699_v34  ;;  %v476_v48 = vpop.xlane.xlu0 %475 }
 0x304   :  { %v379_v41 = vrot.slane %v378_v40, 1  ;;  %v439_v5 = vrot.slane %v438_v15, 2  ;;  %v477_v49 = vrot.slane %v476_v48, 4 }
 0x305   :  { %2710 = vmatpush3.bf16.msra.mxu0 %v314_v39 }
 0x306   :  { %v380_v42 = vadd.f32 %v379_v41, %v378_v40  ;;  %v440_v17 = vadd.f32 %v439_v5, %v438_v15  ;;  %v256_v40 = vpop.f32.mrf.mxu0  ;;  %2711 = vmatprep.subr.bf16.mxu0 %v3149_v6 }
 0x308   :  { %2910 = vpush %v380_v42  ;;  %v441_v18 = vrot.slane %v440_v17, 1 }
 0x30a   :  { %v442_v21 = vadd.f32 %v441_v18, %v440_v17 }
 0x339   :  { %s2911_s21 = spop %2910 }
 0x33a   :  { %s384_s22 = smul.f32 0.0625, %s2911_s21 }
 0x33c   :  { %s385_s23 = sadd.f32 1e-05, %s384_s22 }
 0x33e   :  { %v386_v46 = vstv %s385_s23 }
 0x33f   :  { %3061 = vrsqrt.f32 %v386_v46 }
 0x34c   :  { %v3062_v50 = vpop.eup %3061 }
 0x34d   :  { %2912 = vpush %v3062_v50 }
 0x34e   :  { %2914 = vpush %v402_v51  ;;  %v478_v51 = vadd.f32 %v477_v49, %v476_v48 }
 0x37e   :  { %s3293_s24 = spop %2912 }
 0x37f   :  { %s2915_s25 = spop %2914  ;;  %v389_v25 = vstv %s3293_s24 }
 0x380   :  { %s406_s26 = smul.f32 0.0625, %s2915_s25  ;;  %v390_v27 = vmul.f32 %v389_v25, %v3284_v29  ;;  %v313_v29 = vpack.c.bf16 %v256_v40, %v253_v36 }
 0x382   :  { %v407_v52 = vstv %s406_s26  ;;  %2712 = vmatpush3.bf16.msra.mxu0 %v313_v29 }
 0x383   :  { %v408_v53 = vsub.f32 %v3277_v14, %v407_v52  ;;  %2729 = vmatprep.subr.bf16.mxu0 %v3149_v6 }
 0x385   :  { %v409_v54 = vmul.f32 %v408_v53, %v408_v53  ;;  %2714 = vmatmul.mubr.msk.bf16.vlgmr.msra.gmra.mxu0 %vm71_vm2, %v3270_v13 }
 0x386   :  { %2737 = vmatprep.mubr.msk.bf16.mxu0 %vm3150_vm1, %v3149_v6 }
 0x387   :  { %v411_v55 = vrot.slane %v409_v54, 2 }
 0x389   :  { %v413_v56 = vsel %vm355_vm3, %v411_v55, 0.0 }
 0x38a   :  { %414 = vadd.xlane.f32.xlu1 %v413_v56 }
 0x413   :  { %v415_v62 = vpop.xlane.xlu1 %414 }
 0x414   :  { %v416_v63 = vrot.slane %v415_v62, 4 }
 0x416   :  { %v417_v3 = vadd.f32 %v416_v63, %v415_v62  ;;  %v479_v62 = vrot.slane %v478_v51, 2 }
 0x418   :  { %v418_v7 = vrot.slane %v417_v3, 2 }
 0x41a   :  { %v419_v8 = vadd.f32 %v418_v7, %v417_v3 }
 0x41c   :  { %v420_v9 = vrot.slane %v419_v8, 1 }
 0x41e   :  { %v421_v10 = vadd.f32 %v420_v9, %v419_v8  ;;  %v480_v8 = vadd.f32 %v479_v62, %v478_v51 }
 0x420   :  { %2916 = vpush %v421_v10  ;;  %v481_v10 = vrot.slane %v480_v8, 1 }
 0x422   :  { %v482_v12 = vadd.f32 %v481_v10, %v480_v8 }
 0x445   :  { %v3351_v50 = vpop.f32.mrf.mxu0 }
 0x446   :  { %v535_v13 = vsel %vm355_vm3, %v3351_v50, 0.0  ;;  %v571_v52 = vrot.slane %v3351_v50, 2  ;;  %v611_v56 = vrot.slane %v3351_v50, 4  ;;  %v651_v7 = vrot.slane %v3351_v50, 6 }
 0x447   :  { %536 = vadd.xlane.f32.xlu0 %v535_v13 }
 0x448   :  { %v573_v55 = vsel %vm355_vm3, %v571_v52, 0.0  ;;  %v613_v3 = vsel %vm355_vm3, %v611_v56, 0.0  ;;  %v653_v9 = vsel %vm355_vm3, %v651_v7, 0.0 }
 0x44b   :  { %574 = vadd.xlane.f32.xlu0 %v573_v55 }
 0x44f   :  { %614 = vadd.xlane.f32.xlu0 %v613_v3 }
 0x451   :  { %s2917_s14 = spop %2916 }
 0x452   :  { %s425_s15 = smul.f32 0.0625, %s2917_s14 }
 0x453   :  { %654 = vadd.xlane.f32.xlu0 %v653_v9 }
 0x454   :  { %s426_s16 = sadd.f32 1e-05, %s425_s15 }
 0x456   :  { %v427_v16 = vstv %s426_s16 }
 0x457   :  { %3063 = vrsqrt.f32 %v427_v16 }
 0x464   :  { %v3064_v20 = vpop.eup %3063 }
 0x465   :  { %2918 = vpush %v3064_v20 }
 0x466   :  { %2920 = vpush %v442_v21 }
 0x469   :  { %520 = vperm.xlu0 %3037, %v3369_v24  }
 0x496   :  { %s2919_s17 = spop %2918 }
 0x497   :  { %v430_v26 = vstv %s2919_s17  ;;  %s2921_s18 = spop %2920 }
 0x498   :  { %v431_v28 = vmul.f32 %v430_v26, %v408_v53  ;;  %s446_s19 = smul.f32 0.0625, %s2921_s18  ;;  %v2715_v53 = vpop.f32.mrf.mxu0 }
 0x49a   :  { %v3341_v30 = vsel %vm512_vm4, %v390_v27, %v431_v28  ;;  %v447_v31 = vstv %s446_s19  ;;  %v352_v58 = vpop.f32.mrf.mxu0 }
 0x49b   :  { %v448_v32 = vsub.f32 %v3277_v14, %v447_v31 }
 0x49c   :  { %v2716_v63 = vpop.f32.mrf.mxu0 }
 0x49d   :  { %v449_v33 = vmul.f32 %v448_v32, %v448_v32 }
 0x49f   :  { %v451_v35 = vrot.slane %v449_v33, 4 }
 0x4a1   :  { %v453_v37 = vsel %vm355_vm3, %v451_v35, 0.0 }
 0x4a2   :  { %454 = vadd.xlane.f32.xlu1 %v453_v37 }
 0x52b   :  { %v455_v41 = vpop.xlane.xlu1 %454 }
 0x52c   :  { %v456_v42 = vrot.slane %v455_v41, 4 }
 0x52e   :  { %v457_v43 = vadd.f32 %v456_v42, %v455_v41 }
 0x530   :  { %v458_v44 = vrot.slane %v457_v43, 2 }
 0x532   :  { %v459_v45 = vadd.f32 %v458_v44, %v457_v43 }
 0x534   :  { %v460_v46 = vrot.slane %v459_v45, 1 }
 0x536   :  { %v461_v47 = vadd.f32 %v460_v46, %v459_v45 }
 0x538   :  { %2922 = vpush %v461_v47 }
 0x569   :  { %s2923_s20 = spop %2922 }
 0x56a   :  { %s465_s21 = smul.f32 0.0625, %s2923_s20 }
 0x56c   :  { %s466_s22 = sadd.f32 1e-05, %s465_s21 }
 0x56e   :  { %v467_v54 = vstv %s466_s22 }
 0x56f   :  { %3065 = vrsqrt.f32 %v467_v54 }
 0x57c   :  { %v3066_v11 = vpop.eup %3065 }
 0x57d   :  { %2924 = vpush %v3066_v11 }
 0x57e   :  { %2926 = vpush %v482_v12 }
 0x5ae   :  { %s2925_s23 = spop %2924 }
 0x5af   :  { %v470_v15 = vstv %s2925_s23  ;;  %s2927_s24 = spop %2926 }
 0x5b0   :  { %v471_v16 = vmul.f32 %v470_v15, %v448_v32  ;;  %s486_s25 = smul.f32 0.0625, %s2927_s24  ;;  %v537_v32 = vpop.xlane.xlu0 %536 }
 0x5b1   :  { %v538_v33 = vrot.slane %v537_v32, 4 }
 0x5b2   :  { %v487_v5 = vstv %s486_s25  ;;  %v515_v17 = vsel %vm514_vm5, %v3341_v30, %v471_v16 }
 0x5b3   :  { %v488_v18 = vsub.f32 %v3277_v14, %v487_v5  ;;  %v539_v34 = vadd.f32 %v538_v33, %v537_v32 }
 0x5b4   :  { %v575_v54 = vpop.xlane.xlu0 %574 }
 0x5b5   :  { %v489_v20 = vmul.f32 %v488_v18, %v488_v18  ;;  %v540_v36 = vrot.slane %v539_v34, 2  ;;  %v576_v55 = vrot.slane %v575_v54, 4 }
 0x5b7   :  { %v491_v21 = vrot.slane %v489_v20, 6  ;;  %v541_v37 = vadd.f32 %v540_v36, %v539_v34  ;;  %v577_v56 = vadd.f32 %v576_v55, %v575_v54 }
 0x5b9   :  { %v493_v22 = vsel %vm355_vm3, %v491_v21, 0.0  ;;  %v542_v38 = vrot.slane %v541_v37, 1  ;;  %v578_v62 = vrot.slane %v577_v56, 2 }
 0x5ba   :  { %494 = vadd.xlane.f32.xlu1 %v493_v22 }
 0x5bb   :  { %v543_v40 = vadd.f32 %v542_v38, %v541_v37  ;;  %v579_v63 = vadd.f32 %v578_v62, %v577_v56 }
 0x5bd   :  { %v580_v3 = vrot.slane %v579_v63, 1 }
 0x5bf   :  { %v581_v8 = vadd.f32 %v580_v3, %v579_v63 }
 0x643   :  { %v495_v25 = vpop.xlane.xlu1 %494 }
 0x644   :  { %v496_v26 = vrot.slane %v495_v25, 4 }
 0x646   :  { %v497_v27 = vadd.f32 %v496_v26, %v495_v25  ;;  %v615_v25 = vpop.xlane.xlu0 %614 }
 0x647   :  { %v616_v26 = vrot.slane %v615_v25, 4 }
 0x648   :  { %v498_v28 = vrot.slane %v497_v27, 2 }
 0x64a   :  { %v499_v14 = vadd.f32 %v498_v28, %v497_v27  ;;  %v617_v27 = vadd.f32 %v616_v26, %v615_v25 }
 0x64c   :  { %v500_v30 = vrot.slane %v499_v14, 1 }
 0x64e   :  { %v501_v31 = vadd.f32 %v500_v30, %v499_v14  ;;  %v618_v14 = vrot.slane %v617_v27, 2 }
 0x650   :  { %2928 = vpush %v501_v31  ;;  %v619_v30 = vadd.f32 %v618_v14, %v617_v27 }
 0x652   :  { %v620_v31 = vrot.slane %v619_v30, 1 }
 0x654   :  { %v621_v33 = vadd.f32 %v620_v31, %v619_v30 }
 0x681   :  { %s2929_s28 = spop %2928 }
 0x682   :  { %s505_s29 = smul.f32 0.0625, %s2929_s28 }
 0x684   :  { %s506_s30 = sadd.f32 1e-05, %s505_s29 }
 0x686   :  { %v507_v35 = vstv %s506_s30 }
 0x687   :  { %3067 = vrsqrt.f32 %v507_v35 }
 0x694   :  { %v3068_v39 = vpop.eup %3067 }
 0x695   :  { %2930 = vpush %v3068_v39 }
 0x696   :  { %2932 = vpush %v543_v40 }
 0x6c6   :  { %s2931_s7 = spop %2930 }
 0x6c7   :  { %v510_v29 = vstv %s2931_s7  ;;  %s2933_s9 = spop %2932 }
 0x6c8   :  { %v511_v41 = vmul.f32 %v510_v29, %v488_v18  ;;  %s547_s10 = smul.f32 0.0625, %s2933_s9 }
 0x6ca   :  { %v548_v42 = vstv %s547_s10  ;;  %v3373_v43 = vsel %vm516_vm6, %v515_v17, %v511_v41 }
 0x6cb   :  { %v3376_v44 = vsub.f32 %v3351_v50, %v548_v42 }
 0x6cd   :  { %v550_v45 = vmul.f32 %v3376_v44, %v3376_v44 }
 0x6cf   :  { %v551_v46 = vsel %vm355_vm3, %v550_v45, 0.0 }
 0x6d0   :  { %552 = vadd.xlane.f32.xlu1 %v551_v46 }
 0x759   :  { %v553_v47 = vpop.xlane.xlu1 %552 }
 0x75a   :  { %v554_v48 = vrot.slane %v553_v47, 4 }
 0x75c   :  { %v555_v49 = vadd.f32 %v554_v48, %v553_v47 }
 0x75e   :  { %v556_v51 = vrot.slane %v555_v49, 2 }
 0x760   :  { %v557_v13 = vadd.f32 %v556_v51, %v555_v49 }
 0x762   :  { %v558_v52 = vrot.slane %v557_v13, 1 }
 0x764   :  { %v559_v53 = vadd.f32 %v558_v52, %v557_v13  ;;  %v655_v52 = vpop.xlane.xlu0 %654 }
 0x766   :  { %2934 = vpush %v559_v53  ;;  %v656_v53 = vrot.slane %v655_v52, 4 }
 0x768   :  { %v657_v54 = vadd.f32 %v656_v53, %v655_v52  ;;  %v3475_v53 = vld [vmem:[%s3827_s6] sm:$0xff]  }
 0x76a   :  { %v658_v56 = vrot.slane %v657_v54, 2 }
 0x797   :  { %s2935_s11 = spop %2934 }
 0x798   :  { %s563_s2 = smul.f32 0.0625, %s2935_s11  ;;  %s3155_s11 = smov 112  }
 0x79a   :  { %s564_s12 = sadd.f32 1e-05, %s563_s2  ;;  %s3156_s2 = smov 96  }
 0x79c   :  { %v565_v58 = vstv %s564_s12  ;;  %s3157_s12 = smov 80  }
 0x79d   :  { %3069 = vrsqrt.f32 %v565_v58  ;;  %v659_v58 = vadd.f32 %v658_v56, %v657_v54 }
 0x79f   :  { %v660_v62 = vrot.slane %v659_v58, 1 }
 0x7a1   :  { %v661_v3 = vadd.f32 %v660_v62, %v659_v58 }
 0x7aa   :  { %v3070_v7 = vpop.eup %3069 }
 0x7ab   :  { %2936 = vpush %v3070_v7 }
 0x7ac   :  { %2938 = vpush %v581_v8 }
 0x7dc   :  { %s3381_s13 = spop %2936 }
 0x7dd   :  { %s2939_s14 = spop %2938  ;;  %v568_v34 = vstv %s3381_s13  ;;  %s3158_s13 = smov 4  }
 0x7de   :  { %s585_s15 = smul.f32 0.0625, %s2939_s14  ;;  %v569_v36 = vmul.f32 %v568_v34, %v3376_v44  ;;  %v3152_v44 = vmov 1   ;;  %s3159_s14 = smov 8  }
 0x7df   :  { %3038 = vset.pattern.permute.xlu1 %v3152_v44 }
 0x7e0   :  { %v586_v9 = vstv %s585_s15  ;;  %s3160_s15 = smov 12  }
 0x7e1   :  { %v587_v10 = vsub.f32 %v3351_v50, %v586_v9 }
 0x7e3   :  { %v588_v11 = vmul.f32 %v587_v10, %v587_v10 }
 0x7e5   :  { %v590_v12 = vrot.slane %v588_v11, 2 }
 0x7e7   :  { %v592_v15 = vsel %vm355_vm3, %v590_v12, 0.0 }
 0x7e8   :  { %593 = vadd.xlane.f32.xlu1 %v592_v15 }
 0x871   :  { %v594_v16 = vpop.xlane.xlu1 %593 }
 0x872   :  { %v595_v5 = vrot.slane %v594_v16, 4 }
 0x874   :  { %v596_v17 = vadd.f32 %v595_v5, %v594_v16  ;;  %v3402_v5 = vsel %vm711_vm7, %v3218_v0, 0  ;;  %v3416_v0 = vsel %vm711_vm7, %v3230_v2, 0 }
 0x875   :  { %2718 = vmatpush3.bf16.xpose.msra.mxu1 %v3402_v5 }
 0x876   :  { %v597_v18 = vrot.slane %v596_v17, 2  ;;  %2719 = vmatprep.subr.bf16.mxu1 %v3149_v6 }
 0x878   :  { %v598_v20 = vadd.f32 %v597_v18, %v596_v17  ;;  %v3154_v17 = vmov 3   ;;  %v3409_v18 = vsel %vm711_vm7, %v3223_v1, 0  ;;  %v3426_v1 = vpop.permute.xlu0 %520 }
 0x879   :  { %v523_v2 = vmul.f32 %v3426_v1, %v3373_v43 }
 0x87a   :  { %v599_v21 = vrot.slane %v598_v20, 1 }
 0x87c   :  { %v600_v22 = vadd.f32 %v599_v21, %v598_v20  ;;  %v3422_v20 = vsel %vm711_vm7, %v3245_v4, 0 }
 0x87d   :  { %2720 = vmatpush3.bf16.xpose.msra.mxu1 %v3409_v18 }
 0x87e   :  { %2940 = vpush %v600_v22  ;;  %2721 = vmatprep.subr.bf16.mxu1 %v3149_v6 }
 0x885   :  { %2722 = vmatpush3.bf16.xpose.msra.mxu1 %v3416_v0 }
 0x886   :  { %2723 = vmatprep.subr.bf16.mxu1 %v3149_v6 }
 0x88d   :  { %2724 = vmatpush3.bf16.xpose.msra.mxu1 %v3422_v20 }
 0x88e   :  { %2741 = vmatprep.subr.bf16.mxu1 %v3149_v6 }
 0x8af   :  { %s2941_s16 = spop %2940 }
 0x8b0   :  { %s604_s17 = smul.f32 0.0625, %s2941_s16 }
 0x8b2   :  { %s605_s18 = sadd.f32 1e-05, %s604_s17 }
 0x8b4   :  { %v606_v28 = vstv %s605_s18 }
 0x8b5   :  { %3071 = vrsqrt.f32 %v606_v28 }
 0x8c2   :  { %v3072_v32 = vpop.eup %3071 }
 0x8c3   :  { %2942 = vpush %v3072_v32  ;;  %v3435_v32 = vsel %vm711_vm7, %v3300_v57, 0 }
 0x8c4   :  { %2944 = vpush %v621_v33  ;;  %2730 = vmatpush3.bf16.xpose.msra.mxu0 %v3435_v32  ;;  %v3441_v33 = vsel %vm711_vm7, %v3310_v59, 0 }
 0x8c5   :  { %2731 = vmatprep.subr.bf16.mxu0 %v3149_v6 }
 0x8cc   :  { %2732 = vmatpush3.bf16.xpose.msra.mxu0 %v3441_v33 }
 0x8cd   :  { %2733 = vmatprep.subr.bf16.mxu0 %v3149_v6 }
 0x8f4   :  { %s2943_s19 = spop %2942 }
 0x8f5   :  { %v609_v35 = vstv %s2943_s19  ;;  %s2945_s20 = spop %2944 }
 0x8f6   :  { %v610_v37 = vmul.f32 %v609_v35, %v587_v10  ;;  %s625_s21 = smul.f32 0.0625, %s2945_s20  ;;  %v3447_v35 = vsel %vm711_vm7, %v3320_v60, 0  ;;  %s3165_s20 = smov 64  }
 0x8f7   :  { %2734 = vmatpush3.bf16.xpose.msra.mxu0 %v3447_v35 }
 0x8f8   :  { %v691_v38 = vsel %vm512_vm4, %v569_v36, %v610_v37  ;;  %v626_v39 = vstv %s625_s21  ;;  %2735 = vmatprep.subr.bf16.mxu0 %v3149_v6  ;;  %v3453_v36 = vsel %vm711_vm7, %v3327_v61, 0 }
 0x8f9   :  { %v627_v40 = vsub.f32 %v3351_v50, %v626_v39 }
 0x8fb   :  { %v628_v29 = vmul.f32 %v627_v40, %v627_v40 }
 0x8fd   :  { %v630_v41 = vrot.slane %v628_v29, 4 }
 0x8ff   :  { %v632_v42 = vsel %vm355_vm3, %v630_v41, 0.0  ;;  %2736 = vmatpush3.bf16.xpose.msra.mxu0 %v3453_v36 }
 0x900   :  { %633 = vadd.xlane.f32.xlu1 %v632_v42  ;;  %2747 = vmatprep.subr.bf16.mxu0 %v3149_v6 }
 0x989   :  { %v634_v45 = vpop.xlane.xlu1 %633 }
 0x98a   :  { %v635_v46 = vrot.slane %v634_v45, 4 }
 0x98c   :  { %v636_v47 = vadd.f32 %v635_v46, %v634_v45 }
 0x98e   :  { %v637_v48 = vrot.slane %v636_v47, 2 }
 0x990   :  { %v638_v49 = vadd.f32 %v637_v48, %v636_v47 }
 0x992   :  { %v639_v51 = vrot.slane %v638_v49, 1 }
 0x994   :  { %v640_v13 = vadd.f32 %v639_v51, %v638_v49 }
 0x996   :  { %2946 = vpush %v640_v13 }
 0x9c7   :  { %s2947_s22 = spop %2946 }
 0x9c8   :  { %s644_s23 = smul.f32 0.0625, %s2947_s22 }
 0x9ca   :  { %s645_s24 = sadd.f32 1e-05, %s644_s23 }
 0x9cc   :  { %v646_v55 = vstv %s645_s24 }
 0x9cd   :  { %3073 = vrsqrt.f32 %v646_v55 }
 0x9da   :  { %v3074_v63 = vpop.eup %3073 }
 0x9db   :  { %2948 = vpush %v3074_v63 }
 0x9dc   :  { %2950 = vpush %v661_v3 }
 0xa0c   :  { %s2949_s25 = spop %2948 }
 0xa0d   :  { %v649_v7 = vstv %s2949_s25  ;;  %s2951_s26 = spop %2950 }
 0xa0e   :  { %v650_v8 = vmul.f32 %v649_v7, %v627_v40  ;;  %s665_s27 = smul.f32 0.0625, %s2951_s26 }
 0xa10   :  { %v666_v9 = vstv %s665_s27  ;;  %v3391_v10 = vsel %vm514_vm5, %v691_v38, %v650_v8 }
 0xa11   :  { %v3394_v11 = vsub.f32 %v3351_v50, %v666_v9  ;;  %v3153_v50 = vmov 2  }
 0xa13   :  { %v668_v12 = vmul.f32 %v3394_v11, %v3394_v11 }
 0xa15   :  { %v670_v15 = vrot.slane %v668_v12, 6 }
 0xa17   :  { %v672_v16 = vsel %vm355_vm3, %v670_v15, 0.0 }
 0xa18   :  { %673 = vadd.xlane.f32.xlu1 %v672_v16 }
 0xa29   :  { %525 = vperm.xlu1 %3038, %v3369_v24  }
 0xa2d   :  { %3039 = vset.pattern.permute.xlu1 %v3153_v50 }
 0xa2e   :  { %695 = vperm.xlu1 %3039, %v3369_v24  }
 0xa32   :  { %3040 = vset.pattern.permute.xlu1 %v3154_v17 }
 0xa33   :  { %700 = vperm.xlu1 %3040, %v3369_v24  }
 0xaa1   :  { %v674_v21 = vpop.xlane.xlu1 %673 }
 0xaa2   :  { %v675_v22 = vrot.slane %v674_v21, 4 }
 0xaa4   :  { %v676_v25 = vadd.f32 %v675_v22, %v674_v21 }
 0xaa5   :  { %v3430_v26 = vpop.permute.xlu1 %525 }
 0xaa6   :  { %v677_v27 = vrot.slane %v676_v25, 2  ;;  %v528_v28 = vadd.f32 %v3430_v26, %v523_v2 }
 0xaa8   :  { %v2538_v14 = vmul.f32 -1.442695, %v528_v28  ;;  %v678_v4 = vadd.f32 %v677_v27, %v676_v25 }
 0xaa9   :  { %v3460_v38 = vpop.permute.xlu1 %695 }
 0xaaa   :  { %3075 = vpow2.f32 %v2538_v14  ;;  %v679_v30 = vrot.slane %v678_v4, 1 }
 0xaac   :  { %v680_v31 = vadd.f32 %v679_v30, %v678_v4 }
 0xaae   :  { %2952 = vpush %v680_v31  ;;  %v3465_v29 = vpop.permute.xlu1 %700 }
 0xab7   :  { %v3076_v43 = vpop.eup %3075 }
 0xab8   :  { %v532_v34 = vadd.f32 1.0, %v3076_v43 }
 0xaba   :  { %3077 = vrcp.f32 %v532_v34 }
 0xac7   :  { %v3078_v57 = vpop.eup %3077 }
 0xac8   :  { %v710_v59 = vpack.c.bf16 %v3078_v57, %v3078_v57 }
 0xaca   :  { %2726 = vmatmul.mubr.msk.bf16.vlgmr.msra.gmra.mxu1 %vm711_vm7, %v710_v59 }
 0xacb   :  { %2743 = vmatprep.mubr.msk.bf16.mxu1 %vm3150_vm1, %v3149_v6  ;;  %2742 = vmatpush3.bf16.msra.mxu1 %v3475_v53 }
 0xacc   :  { %2753 = vmatprep.subr.bf16.mxu1 %v3149_v6 }
 0xadf   :  { %s2953_s28 = spop %2952 }
 0xae0   :  { %s684_s29 = smul.f32 0.0625, %s2953_s28 }
 0xae2   :  { %s685_s30 = sadd.f32 1e-05, %s684_s29 }
 0xae4   :  { %v686_v60 = vstv %s685_s30 }
 0xae5   :  { %3079 = vrsqrt.f32 %v686_v60 }
 0xaf2   :  { %v3080_v37 = vpop.eup %3079 }
 0xaf3   :  { %2954 = vpush %v3080_v37 }
 0xb24   :  { %s2955_s7 = spop %2954 }
 0xb25   :  { %v689_v61 = vstv %s2955_s7 }
 0xb26   :  { %v690_v39 = vmul.f32 %v689_v61, %v3394_v11 }
 0xb28   :  { %v693_v40 = vsel %vm516_vm6, %v3391_v10, %v690_v39 }
 0xb29   :  { %v698_v41 = vmul.f32 %v3460_v38, %v693_v40 }
 0xb2b   :  { %v703_v42 = vadd.f32 %v3465_v29, %v698_v41 }
 0xb2d   :  { %v2539_v45 = vmul.f32 -1.442695, %v703_v42 }
 0xb2f   :  { %3081 = vpow2.f32 %v2539_v45 }
 0xb3c   :  { %v3082_v46 = vpop.eup %3081 }
 0xb3d   :  { %v707_v47 = vadd.f32 1.0, %v3082_v46 }
 0xb3f   :  { %3083 = vrcp.f32 %v707_v47 }
 0xb4c   :  { %v3084_v48 = vpop.eup %3083 }
 0xb4d   :  { %v768_v49 = vpack.c.bf16 %v3084_v48, %v3084_v48 }
 0xb4f   :  { %2738 = vmatmul.mubr.msk.bf16.vlgmr.msra.gmra.mxu0 %vm711_vm7, %v768_v49 }
 0xb50   :  { %2749 = vmatprep.mubr.msk.bf16.mxu0 %vm3150_vm1, %v3149_v6  ;;  %2748 = vmatpush3.bf16.msra.mxu0 %v3475_v53 }
 0xb51   :  { %2759 = vmatprep.subr.bf16.mxu0 %v3149_v6 }
 0xb8a   :  { %v761_v51 = vpop.f32.mrf.mxu1 }
 0xb8b   :  { %v767_v54 = vmul.f32 8.0, %v761_v51 }
 0xb8c   :  { %v2727_v13 = vpop.f32.mrf.mxu1 }
 0xb8d   :  { %v825_v56 = vmul.f32 %v767_v54, %v3336_v19  ;;  %v3162_v54 = vmov 4  }
 0xb8e   :  { %v764_v44 = vpop.f32.mrf.mxu1  ;;  %3041 = vset.pattern.permute.xlu0 %v3162_v54 }
 0xb90   :  { %v2728_v52 = vpop.f32.mrf.mxu1 }
 0xb91   :  { %v3161_v52 = vmov 5  }
 0xb92   :  { %3042 = vset.pattern.permute.xlu1 %v3161_v52 }
 0xc0f   :  { %v818_v55 = vpop.f32.mrf.mxu0 }
 0xc10   :  { %v824_v58 = vmul.f32 8.0, %v818_v55  ;;  %v3163_v55 = vmov 7  }
 0xc11   :  { %v2739_v62 = vpop.f32.mrf.mxu0 }
 0xc12   :  { %v3482_v63 = vmul.f32 %v825_v56, %v824_v58  ;;  %v3164_v56 = vmov 6   ;;  %v3137_v58 = vld [vmem:[%s3822_s0] sm:$0xff]   ;;  %v3138_v62 = vld [vmem:[%s3822_s0 + $0x8] sm:$0xff]  }
 0xc13   :  { %v821_v3 = vpop.f32.mrf.mxu0 }
 0xc14   :  { %v827_v7 = vpack.c.bf16 %v3482_v63, %v3482_v63 }
 0xc15   :  { %v2740_v8 = vpop.f32.mrf.mxu0 }
 0xc16   :  { %879 = vrot.lane.b32.xlu1 %v827_v7, %s3155_s11  ;;  %2744 = vmatmul.mubr.msk.bf16.vlgmr.msra.gmra.mxu1 %vm834_vm8, %v827_v7 }
 0xc17   :  { %2754 = vmatpush3.bf16.msra.mxu1 %v3475_v53  ;;  %2755 = vmatprep.mubr.msk.bf16.mxu1 %vm3150_vm1, %v3149_v6 }
 0xc18   :  { %2765 = vmatprep.subr.bf16.mxu1 %v3149_v6 }
 0xc1a   :  { %924 = vrot.lane.b32.xlu1 %v827_v7, %s3156_s2 }
 0xc1e   :  { %969 = vrot.lane.b32.xlu1 %v827_v7, %s3157_s12 }
 0xc88   :  { %v880_v9 = vpop.permute.xlu1 %879 }
 0xc89   :  { %2750 = vmatmul.mubr.msk.bf16.vlgmr.msra.gmra.mxu0 %vm834_vm8, %v880_v9 }
 0xc8a   :  { %2760 = vmatpush3.bf16.msra.mxu0 %v3475_v53  ;;  %2761 = vmatprep.mubr.msk.bf16.mxu0 %vm3150_vm1, %v3149_v6 }
 0xc8b   :  { %2771 = vmatprep.subr.bf16.mxu0 %v3149_v6 }
 0xc8c   :  { %v925_v10 = vpop.permute.xlu1 %924 }
 0xc8d   :  { %2756 = vmatmul.mubr.msk.bf16.vlgmr.msra.gmra.mxu1 %vm834_vm8, %v925_v10 }
 0xc8e   :  { %2767 = vmatprep.mubr.msk.bf16.mxu1 %vm3150_vm1, %v3149_v6 }
 0xc90   :  { %v970_v11 = vpop.permute.xlu1 %969 }
 0xc91   :  { %2762 = vmatmul.mubr.msk.bf16.vlgmr.msra.gmra.mxu0 %vm834_vm8, %v970_v11 }
 0xc92   :  { %2773 = vmatprep.mubr.msk.bf16.mxu0 %vm3150_vm1, %v3149_v6 }
 0xcd6   :  { %v872_v12 = vpop.f32.mrf.mxu1 }
 0xcd8   :  { %v2745_v15 = vpop.f32.mrf.mxu1 }
 0xcda   :  { %v875_v16 = vpop.f32.mrf.mxu1 }
 0xcdc   :  { %v2746_v50 = vpop.f32.mrf.mxu1 }
 0xd49   :  { %v918_v17 = vpop.f32.mrf.mxu0 }
 0xd4a   :  { %1015 = vrot.lane.b32.xlu1 %v918_v17, %s3158_s13 }
 0xd4b   :  { %v2751_v21 = vpop.f32.mrf.mxu0 }
 0xd4d   :  { %v921_v22 = vpop.f32.mrf.mxu0  ;;  %v963_v2 = vpop.f32.mrf.mxu1 }
 0xd4e   :  { %1019 = vrot.lane.b32.xlu1 %v963_v2, %s3159_s14 }
 0xd4f   :  { %v2752_v25 = vpop.f32.mrf.mxu0  ;;  %v2757_v27 = vpop.f32.mrf.mxu1 }
 0xd51   :  { %v966_v28 = vpop.f32.mrf.mxu1  ;;  %v1008_v14 = vpop.f32.mrf.mxu0 }
 0xd52   :  { %1023 = vrot.lane.b32.xlu0 %v1008_v14, %s3160_s15 }
 0xd53   :  { %v2758_v4 = vpop.f32.mrf.mxu1  ;;  %v2763_v30 = vpop.f32.mrf.mxu0 }
 0xd55   :  { %v1011_v31 = vpop.f32.mrf.mxu0 }
 0xd57   :  { %v2764_v43 = vpop.f32.mrf.mxu0 }
 0xdbc   :  { %v1016_v34 = vpop.permute.xlu1 %1015 }
 0xdbd   :  { %v1027_v59 = vsel %vm1026_vm9, %v872_v12, %v1016_v34 }
 0xdc0   :  { %v1020_v57 = vpop.permute.xlu1 %1019 }
 0xdc1   :  { %v1028_v60 = vsel %vm711_vm7, %v1027_v59, %v1020_v57  ;;  %v3139_v59 = vld [vmem:[%s3821_s4 + $0x18] sm:$0xff]  }
 0xdc4   :  { %v1024_v37 = vpop.permute.xlu0 %1023 }
 0xdc5   :  { %v1030_v61 = vsel %vm1029_vm10, %v1028_v60, %v1024_v37 }
 0xdc6   :  { %v1031_v39 = vsel %vm834_vm8, %v1030_v61, 0.0 }
 0xdc7   :  { %1032 = vadd.xlane.f32.xlu1 %v1031_v39  ;;  %v3141_v39 = vld [vmem:[%s3821_s4 + $0x8] sm:$0xff]  }
 0xdd8   :  { %1072 = vperm.xlu1 %3042, %v3369_v24  }
 0xddc   :  { %3043 = vset.pattern.permute.xlu1 %v3163_v55 }
 0xddd   :  { %1082 = vperm.xlu1 %3043, %v3369_v24  }
 0xde1   :  { %3044 = vset.pattern.permute.xlu1 %v3164_v56 }
 0xde2   :  { %1077 = vperm.xlu1 %3044, %v3369_v24  }
 0xde6   :  { %1337 = vrot.lane.b32.xlu1 %v3137_v58, %s3165_s20 }
 0xde7   :  { %3047 = vset.pattern.permute.xlu1 %v3151_v23 }
 0xdea   :  { %1339 = vrot.lane.b32.xlu1 %v3138_v62, %s3165_s20  ;;  %v3576_v62 = vld [vmem:[%s3823_s1] sm:$0xf] }
 0xe50   :  { %v1033_v40 = vpop.xlane.xlu1 %1032 }
 0xe51   :  { %v1034_v41 = vrot.slane %v1033_v40, 4 }
 0xe53   :  { %v1035_v42 = vadd.f32 %v1034_v41, %v1033_v40  ;;  %v3142_v40 = vld [vmem:[%s3821_s4] sm:$0xff]  }
 0xe54   :  { %v3523_v50 = vpop.permute.xlu1 %1072 }
 0xe55   :  { %v1036_v45 = vrot.slane %v1035_v42, 2 }
 0xe57   :  { %v1037_v46 = vadd.f32 %v1036_v45, %v1035_v42 }
 0xe58   :  { %v3528_v25 = vpop.permute.xlu1 %1082 }
 0xe59   :  { %v1038_v47 = vrot.slane %v1037_v46, 1 }
 0xe5b   :  { %v1039_v48 = vadd.f32 %v1038_v47, %v1037_v46 }
 0xe5d   :  { %2956 = vpush %v1039_v48  ;;  %v3535_v4 = vpop.permute.xlu1 %1077 }
 0xe61   :  { %v3548_v37 = vpop.permute.xlu1 %1337 }
 0xe65   :  { %v3562_v41 = vpop.permute.xlu1 %1339 }
 0xe8e   :  { %s2957_s16 = spop %2956 }
 0xe8f   :  { %s1043_s17 = smul.f32 0.0078125, %s2957_s16 }
 0xe91   :  { %v1044_v49 = vstv %s1043_s17 }
 0xe92   :  { %v1045_v51 = vsub.f32 %v1030_v61, %v1044_v49  ;;  %v3140_v61 = vld [vmem:[%s3821_s4 + $0x10] sm:$0xff]  }
 0xe94   :  { %v1046_v13 = vmul.f32 %v1045_v51, %v1045_v51 }
 0xe96   :  { %v1047_v44 = vsel %vm834_vm8, %v1046_v13, 0.0 }
 0xe97   :  { %1048 = vadd.xlane.f32.xlu0 %v1047_v44 }
 0xead   :  { %1067 = vperm.xlu0 %3041, %v3369_v24  }
 0xf20   :  { %v1049_v3 = vpop.xlane.xlu0 %1048 }
 0xf21   :  { %v1050_v7 = vrot.slane %v1049_v3, 4 }
 0xf23   :  { %v1051_v8 = vadd.f32 %v1050_v7, %v1049_v3 }
 0xf25   :  { %v1052_v9 = vrot.slane %v1051_v8, 2 }
 0xf27   :  { %v1053_v10 = vadd.f32 %v1052_v9, %v1051_v8 }
 0xf28   :  { %v3525_v21 = vpop.permute.xlu0 %1067 }
 0xf29   :  { %v1054_v11 = vrot.slane %v1053_v10, 1 }
 0xf2b   :  { %v1055_v12 = vadd.f32 %v1054_v11, %v1053_v10 }
 0xf2d   :  { %2958 = vpush %v1055_v12 }
 0xf5e   :  { %s2959_s23 = spop %2958 }
 0xf5f   :  { %s1059_s24 = smul.f32 0.0078125, %s2959_s23 }
 0xf61   :  { %s1060_s25 = sadd.f32 1e-05, %s1059_s24 }
 0xf63   :  { %v1061_v15 = vstv %s1060_s25 }
 0xf64   :  { %3085 = vrsqrt.f32 %v1061_v15 }
 0xf71   :  { %v3086_v16 = vpop.eup %3085 }
 0xf72   :  { %2960 = vpush %v3086_v16 }
 0xfa3   :  { %s2961_s0 = spop %2960 }
 0xfa4   :  { %v1064_v17 = vstv %s2961_s0 }
 0xfa5   :  { %v1065_v22 = vmul.f32 %v1064_v17, %v1045_v51 }
 0xfa7   :  { %v1070_v2 = vmul.f32 %v3525_v21, %v1065_v22 }
 0xfa9   :  { %v3531_v27 = vadd.f32 %v3523_v50, %v1070_v2 }
 0xfab   :  { %v1085_v28 = vmul.f32 %v3528_v25, %v3531_v27  ;;  %v1080_v31 = vmul.f32 %v3535_v4, %v3531_v27 }
 0xfad   :  { %v1092_v14 = vpack.c.bf16 %v1085_v28, %v1085_v28  ;;  %v1091_v34 = vpack.c.bf16 %v1080_v31, %v1080_v31 }
 0xfaf   :  { %v1098_v30 = vsel %vm834_vm8, %v1092_v14, 0  ;;  %v1209_v43 = vrot.slane %v1092_v14, 2  ;;  %v1207_v60 = vrot.slane %v1091_v34, 2 }
 0xfb0   :  { %2766 = vmatpush3.bf16.xpose.msra.mxu1 %v1098_v30 }
 0xfb1   :  { %2777 = vmatprep.subr.bf16.mxu1 %v3149_v6  ;;  %v1214_v57 = vsel %vm834_vm8, %v1209_v43, 0 }
 0xfb7   :  { %2768 = vmatmul.mubr.msk.bf16.vlgmr.msra.gmra.mxu1 %vm834_vm8, %v1091_v34 }
 0xfb8   :  { %2778 = vmatpush3.bf16.xpose.msra.mxu1 %v1214_v57  ;;  %2779 = vmatprep.mubr.msk.bf16.mxu1 %vm3150_vm1, %v3149_v6 }
 0xfb9   :  { %2789 = vmatprep.subr.bf16.mxu1 %v3139_v59 }
 0xfbf   :  { %2780 = vmatmul.mubr.msk.bf16.vlgmr.msra.gmra.mxu1 %vm834_vm8, %v1207_v60 }
 0xfc0   :  { %2790 = vmatpush3.bf16.msra.mxu1 %v3139_v59  ;;  %2797 = vmatprep.mubr.msk.bf16.mxu1 %vm139_vm0, %v3548_v37 }
 0xfc1   :  { %2791 = vmatprep.subr.bf16.mxu1 %v3140_v61 }
 0xfc4   :  { %2792 = vmatpush3.bf16.msra.mxu1 %v3140_v61 }
 0xfc5   :  { %2793 = vmatprep.subr.bf16.mxu1 %v3141_v39 }
 0xfc8   :  { %2794 = vmatpush3.bf16.msra.mxu1 %v3141_v39 }
 0xfc9   :  { %2795 = vmatprep.subr.bf16.mxu1 %v3142_v40 }
 0xfcc   :  { %2796 = vmatpush3.bf16.msra.mxu1 %v3142_v40 }
 0xfcd   :  { %2813 = vmatprep.subr.bf16.mxu1 %v3149_v6 }
 0xfcf   :  { %2798 = vmatmul.mubr.msk.bf16.vlgmr.msra.gmra.mxu1 %vm139_vm0, %v3562_v41 }
 0xfd0   :  { %2817 = vmatprep.mubr.msk.bf16.mxu1 %vm3150_vm1, %v3149_v6 }
0x1077   :  { %v3569_v42 = vpop.f32.mrf.mxu1 }
0x1078   :  { %v1140_v61 = vmul.f32 0.5, %v3569_v42 }
0x1079   :  { %v2769_v45 = vpop.f32.mrf.mxu1 }
0x107a   :  { %v1142_v40 = vsel %vm1141_vm11, %v1140_v61, -inf  ;;  %v3166_v45 = vmov 8  }
0x107b   :  { %v1137_v46 = vpop.f32.mrf.mxu1  ;;  %3045 = vset.pattern.permute.xlu0 %v3166_v45 }
0x107d   :  { %v2770_v47 = vpop.f32.mrf.mxu1 }
0x107f   :  { %v1250_v48 = vpop.f32.mrf.mxu1 }
0x1080   :  { %v1256_v9 = vmul.f32 0.5, %v1250_v48 }
0x1081   :  { %v2781_v49 = vpop.f32.mrf.mxu1 }
0x1083   :  { %v1253_v51 = vpop.f32.mrf.mxu1 }
0x1085   :  { %v2782_v13 = vpop.f32.mrf.mxu1 }
0x108f   :  { %v2799_v44 = vpop.f32.mrf.mxu1 }
0x1091   :  { %v1381_v52 = vpop.f32.mrf.mxu1 }
0x1093   :  { %v2800_v54 = vpop.f32.mrf.mxu1 }
0x1094   :  { %v1446_v55 = vpack.c.bf16 %v2800_v54, %v2799_v44 }
0x1095   :  { %v1384_v56 = vpop.f32.mrf.mxu1 }
0x1096   :  { %2814 = vmatpush3.bf16.msra.mxu1 %v1446_v55  ;;  %v1445_v58 = vpack.c.bf16 %v1384_v56, %v1381_v52 }
0x1097   :  { %2815 = vmatprep.subr.bf16.mxu1 %v3149_v6 }
0x109a   :  { %2816 = vmatpush3.bf16.msra.mxu1 %v1445_v58 }
0x109b   :  { %2829 = vmatprep.subr.bf16.mxu1 %v3149_v6 }
0x109d   :  { %2818 = vmatmul.mubr.msk.bf16.vlgmr.msra.gmra.mxu1 %vm71_vm2, %v3576_v62 }
0x109e   :  { %2830 = vmatpush3.bf16.xpose.msra.mxu1 %v3402_v5  ;;  %2837 = vmatprep.mubr.msk.bf16.mxu1 %vm3150_vm1, %v3149_v6 }
0x109f   :  { %2831 = vmatprep.subr.bf16.mxu1 %v3149_v6 }
0x10a6   :  { %2832 = vmatpush3.bf16.xpose.msra.mxu1 %v3409_v18 }
0x10a7   :  { %2833 = vmatprep.subr.bf16.mxu1 %v3149_v6 }
0x10ae   :  { %2834 = vmatpush3.bf16.xpose.msra.mxu1 %v3416_v0 }
0x10af   :  { %2835 = vmatprep.subr.bf16.mxu1 %v3149_v6 }
0x10b6   :  { %2836 = vmatpush3.bf16.xpose.msra.mxu1 %v3422_v20  ;;  %v1257_v20 = vsel %vm1141_vm11, %v1256_v9, -inf }
0x10b7   :  { %2853 = vmatprep.subr.bf16.mxu1 %v3149_v6 }
0x115d   :  { %v3590_v3 = vpop.f32.mrf.mxu1 }
0x115e   :  { %v1529_v5 = vsel %vm355_vm3, %v3590_v3, 0.0  ;;  %v1565_v7 = vrot.slane %v3590_v3, 2 }
0x115f   :  { %1530 = vadd.xlane.f32.xlu1 %v1529_v5  ;;  %v2819_v8 = vpop.f32.mrf.mxu1 }
0x1160   :  { %v1567_v10 = vsel %vm355_vm3, %v1565_v7, 0.0 }
0x1161   :  { %v1484_v18 = vpop.f32.mrf.mxu1 }
0x1163   :  { %1568 = vadd.xlane.f32.xlu1 %v1567_v10  ;;  %v2820_v0 = vpop.f32.mrf.mxu1 }
0x1167   :  { %1258 = vmax.xlane.f32.xlu1 %v1257_v20 }
0x11e8   :  { %v1531_v11 = vpop.xlane.xlu1 %1530 }
0x11e9   :  { %v1532_v12 = vrot.slane %v1531_v11, 4 }
0x11eb   :  { %v1533_v15 = vadd.f32 %v1532_v12, %v1531_v11 }
0x11ec   :  { %v1569_v16 = vpop.xlane.xlu1 %1568 }
0x11ed   :  { %v1534_v17 = vrot.slane %v1533_v15, 2  ;;  %v1570_v58 = vrot.slane %v1569_v16, 4 }
0x11ef   :  { %v1535_v22 = vadd.f32 %v1534_v17, %v1533_v15  ;;  %v1571_v5 = vadd.f32 %v1570_v58, %v1569_v16  ;;  %v1605_v15 = vrot.slane %v3590_v3, 4 }
0x11f0   :  { %v1259_v2 = vpop.xlane.xlu1 %1258 }
0x11f1   :  { %v1260_v28 = vsub.f32 %v1256_v9, %v1259_v2  ;;  %v1536_v14 = vrot.slane %v1535_v22, 1  ;;  %v1572_v8 = vrot.slane %v1571_v5, 2  ;;  %v1607_v16 = vsel %vm355_vm3, %v1605_v15, 0.0 }
0x11f3   :  { %v1261_v30 = vmul.f32 1.442695, %v1260_v28  ;;  %v1537_v31 = vadd.f32 %v1536_v14, %v1535_v22  ;;  %v1573_v18 = vadd.f32 %v1572_v8, %v1571_v5 }
0x11f5   :  { %3087 = vpow2.f32 %v1261_v30  ;;  %2962 = vpush %v1537_v31  ;;  %v1574_v9 = vrot.slane %v1573_v18, 1 }
0x11f7   :  { %v1575_v0 = vadd.f32 %v1574_v9, %v1573_v18 }
0x1202   :  { %v3597_v43 = vpop.eup %3087 }
0x1203   :  { %v1263_v34 = vsel %vm1141_vm11, %v3597_v43, 0.0 }
0x1204   :  { %1264 = vadd.xlane.f32.xlu1 %v1263_v34 }
0x1226   :  { %s2963_s1 = spop %2962 }
0x1227   :  { %s1541_s2 = smul.f32 0.0625, %s2963_s1 }
0x1229   :  { %v1542_v57 = vstv %s1541_s2 }
0x122a   :  { %v3602_v59 = vsub.f32 %v3590_v3, %v1542_v57 }
0x122c   :  { %v1544_v60 = vmul.f32 %v3602_v59, %v3602_v59 }
0x122e   :  { %v1545_v39 = vsel %vm355_vm3, %v1544_v60, 0.0 }
0x122f   :  { %1546 = vadd.xlane.f32.xlu0 %v1545_v39 }
0x1233   :  { %1143 = vmax.xlane.f32.xlu0 %v1142_v40 }
0x128d   :  { %v1265_v22 = vpop.xlane.xlu1 %1264 }
0x12b8   :  { %v1547_v46 = vpop.xlane.xlu0 %1546 }
0x12b9   :  { %v1548_v47 = vrot.slane %v1547_v46, 4 }
0x12bb   :  { %v1549_v48 = vadd.f32 %v1548_v47, %v1547_v46  ;;  %v3145_v46 = vld [vmem:[%s3824_s5 + $0x10] sm:$0xff]   ;;  %v3146_v47 = vld [vmem:[%s3824_s5 + $0x8] sm:$0xff]  }
0x12bc   :  { %v1144_v49 = vpop.xlane.xlu0 %1143 }
0x12bd   :  { %v1550_v51 = vrot.slane %v1549_v48, 2  ;;  %v1145_v13 = vsub.f32 %v1140_v61, %v1144_v49 }
0x12bf   :  { %v1146_v44 = vmul.f32 1.442695, %v1145_v13  ;;  %v1551_v52 = vadd.f32 %v1550_v51, %v1549_v48 }
0x12c1   :  { %3089 = vpow2.f32 %v1146_v44  ;;  %v1552_v54 = vrot.slane %v1551_v52, 1 }
0x12c3   :  { %v1553_v55 = vadd.f32 %v1552_v54, %v1551_v52 }
0x12c5   :  { %2964 = vpush %v1553_v55 }
0x12ce   :  { %v3090_v42 = vpop.eup %3089 }
0x12cf   :  { %v1148_v56 = vsel %vm1141_vm11, %v3090_v42, 0.0 }
0x12d0   :  { %1149 = vadd.xlane.f32.xlu0 %v1148_v56 }
0x12e6   :  { %1087 = vperm.xlu0 %3045, %v3369_v24  }
0x12ea   :  { %3046 = vset.pattern.permute.xlu0 %v3151_v23 }
0x12f6   :  { %s2965_s12 = spop %2964 }
0x12f7   :  { %s1557_s16 = smul.f32 0.0625, %s2965_s12 }
0x12f9   :  { %s1558_s17 = sadd.f32 1e-05, %s1557_s16 }
0x12fb   :  { %v1559_v7 = vstv %s1558_s17 }
0x12fc   :  { %3091 = vrsqrt.f32 %v1559_v7 }
0x1309   :  { %v3092_v10 = vpop.eup %3091 }
0x130a   :  { %2966 = vpush %v3092_v10 }
0x130b   :  { %2968 = vpush %v1575_v0 }
0x133b   :  { %s3612_s18 = spop %2966 }
0x133c   :  { %s2969_s19 = spop %2968 }
0x133d   :  { %s1579_s21 = smul.f32 0.0625, %s2969_s19 }
0x133f   :  { %v1580_v24 = vstv %s1579_s21 }
0x1340   :  { %v3615_v23 = vsub.f32 %v3590_v3, %v1580_v24 }
0x1342   :  { %v1582_v20 = vmul.f32 %v3615_v23, %v3615_v23 }
0x1344   :  { %v1584_v11 = vrot.slane %v1582_v20, 2 }
0x1346   :  { %v1586_v12 = vsel %vm355_vm3, %v1584_v11, 0.0 }
0x1347   :  { %1587 = vadd.xlane.f32.xlu1 %v1586_v12 }
0x134b   :  { %1608 = vadd.xlane.f32.xlu1 %v1607_v16 }
0x1359   :  { %v1150_v17 = vpop.xlane.xlu0 %1149 }
0x135a   :  { %3093 = vrcp.f32 %v1150_v17 }
0x135b   :  { %3095 = vrcp.f32 %v1265_v22 }
0x1361   :  { %v3622_v2 = vpop.permute.xlu0 %1087 }
0x1362   :  { %v1090_v28 = vmul.f32 %v3622_v2, %v3531_v27  ;;  %v3144_v27 = vld [vmem:[%s3824_s5 + $0x18] sm:$0xff]  }
0x1364   :  { %v1093_v14 = vpack.c.bf16 %v1090_v28, %v1090_v28 }
0x1366   :  { %v1158_v30 = vsel %vm512_vm4, %v1093_v14, 0  ;;  %v1270_v34 = vrot.slane %v1093_v14, 2 }
0x1367   :  { %v3094_v31 = vpop.eup %3093  ;;  %2772 = vmatpush3.bf16.msra.mxu0 %v1158_v30  ;;  %v1562_v30 = vstv %s3612_s18 }
0x1368   :  { %2783 = vmatprep.subr.bf16.mxu0 %v3149_v6  ;;  %v1152_v57 = vmul.f32 %v3094_v31, %v3090_v42  ;;  %v3096_v61 = vpop.eup %3095  ;;  %v1275_v39 = vsel %vm512_vm4, %v1270_v34, 0  ;;  %v1563_v34 = vmul.f32 %v1562_v30, %v3602_v59 }
0x1369   :  { %v1267_v40 = vmul.f32 %v3096_v61, %v3597_v43  ;;  %v3147_v43 = vld [vmem:[%s3824_s5] sm:$0xff]  }
0x136a   :  { %v1153_v60 = vpack.c.bf16 %v1152_v57, %v1152_v57 }
0x136b   :  { %v1268_v45 = vpack.c.bf16 %v1267_v40, %v1267_v40  ;;  %v1645_v40 = vrot.slane %v3590_v3, 6 }
0x136c   :  { %2774 = vmatmul.mubr.msk.bf16.vlgmr.msra.gmra.mxu0 %vm1026_vm9, %v1153_v60 }
0x136d   :  { %2784 = vmatpush3.bf16.msra.mxu0 %v1275_v39  ;;  %2785 = vmatprep.mubr.msk.bf16.mxu0 %vm3150_vm1, %v3149_v6  ;;  %v1647_v59 = vsel %vm355_vm3, %v1645_v40, 0.0 }
0x136e   :  { %2801 = vmatprep.subr.bf16.mxu0 %v3144_v27 }
0x1374   :  { %2786 = vmatmul.mubr.msk.bf16.vlgmr.msra.gmra.mxu0 %vm1026_vm9, %v1268_v45 }
0x1375   :  { %2802 = vmatpush3.bf16.msra.mxu0 %v3144_v27  ;;  %2809 = vmatprep.mubr.msk.bf16.mxu0 %vm139_vm0, %v3548_v37 }
0x1376   :  { %2803 = vmatprep.subr.bf16.mxu0 %v3145_v46 }
0x1379   :  { %2804 = vmatpush3.bf16.msra.mxu0 %v3145_v46 }
0x137a   :  { %2805 = vmatprep.subr.bf16.mxu0 %v3146_v47 }
0x137d   :  { %2806 = vmatpush3.bf16.msra.mxu0 %v3146_v47 }
0x137e   :  { %2807 = vmatprep.subr.bf16.mxu0 %v3147_v43 }
0x1381   :  { %2808 = vmatpush3.bf16.msra.mxu0 %v3147_v43 }
0x1382   :  { %2821 = vmatprep.subr.bf16.mxu0 %v3149_v6 }
0x1384   :  { %2810 = vmatmul.mubr.msk.bf16.vlgmr.msra.gmra.mxu0 %vm139_vm0, %v3562_v41 }
0x1385   :  { %2825 = vmatprep.mubr.msk.bf16.mxu0 %vm3150_vm1, %v3149_v6 }
0x13d0   :  { %v1588_v37 = vpop.xlane.xlu1 %1587 }
0x13d1   :  { %v1589_v48 = vrot.slane %v1588_v37, 4 }
0x13d3   :  { %v1590_v49 = vadd.f32 %v1589_v48, %v1588_v37 }
0x13d4   :  { %v1609_v54 = vpop.xlane.xlu1 %1608 }
0x13d5   :  { %v1591_v51 = vrot.slane %v1590_v49, 2  ;;  %v1610_v55 = vrot.slane %v1609_v54, 4 }
0x13d7   :  { %v1592_v13 = vadd.f32 %v1591_v51, %v1590_v49  ;;  %v1611_v42 = vadd.f32 %v1610_v55, %v1609_v54 }
0x13d9   :  { %v1593_v44 = vrot.slane %v1592_v13, 1  ;;  %v1612_v41 = vrot.slane %v1611_v42, 2 }
0x13db   :  { %v1594_v52 = vadd.f32 %v1593_v44, %v1592_v13  ;;  %v1613_v58 = vadd.f32 %v1612_v41, %v1611_v42 }
0x13dd   :  { %2970 = vpush %v1594_v52  ;;  %v1614_v5 = vrot.slane %v1613_v58, 1 }
0x13df   :  { %v1615_v8 = vadd.f32 %v1614_v5, %v1613_v58 }
0x140e   :  { %s2971_s5 = spop %2970 }
0x140f   :  { %s1598_s29 = smul.f32 0.0625, %s2971_s5 }
0x1411   :  { %s1599_s30 = sadd.f32 1e-05, %s1598_s29 }
0x1413   :  { %v1600_v56 = vstv %s1599_s30 }
0x1414   :  { %3097 = vrsqrt.f32 %v1600_v56 }
0x1421   :  { %v3098_v7 = vpop.eup %3097 }
0x1422   :  { %2972 = vpush %v3098_v7 }
0x1423   :  { %2974 = vpush %v1615_v8 }
0x142c   :  { %v3653_v18 = vpop.f32.mrf.mxu0 }
0x142e   :  { %v2775_v9 = vpop.f32.mrf.mxu0 }
0x1430   :  { %v1197_v10 = vpop.f32.mrf.mxu0 }
0x1432   :  { %v2776_v0 = vpop.f32.mrf.mxu0 }
0x1434   :  { %v3655_v24 = vpop.f32.mrf.mxu0 }
0x1436   :  { %v2787_v20 = vpop.f32.mrf.mxu0 }
0x1438   :  { %v1314_v11 = vpop.f32.mrf.mxu0 }
0x143a   :  { %v2788_v12 = vpop.f32.mrf.mxu0 }
0x1444   :  { %v2811_v15 = vpop.f32.mrf.mxu0 }
0x1446   :  { %v1430_v16 = vpop.f32.mrf.mxu0 }
0x1448   :  { %v2812_v17 = vpop.f32.mrf.mxu0 }
0x1449   :  { %v1488_v22 = vpack.c.bf16 %v2812_v17, %v2811_v15 }
0x144a   :  { %v1433_v28 = vpop.f32.mrf.mxu0 }
0x144b   :  { %2822 = vmatpush3.bf16.msra.mxu0 %v1488_v22  ;;  %v1487_v14 = vpack.c.bf16 %v1433_v28, %v1430_v16 }
0x144c   :  { %2823 = vmatprep.subr.bf16.mxu0 %v3149_v6 }
0x144f   :  { %2824 = vmatpush3.bf16.msra.mxu0 %v1487_v14 }
0x1450   :  { %2841 = vmatprep.subr.bf16.mxu0 %v3149_v6 }
0x1452   :  { %2826 = vmatmul.mubr.msk.bf16.vlgmr.msra.gmra.mxu0 %vm71_vm2, %v3576_v62 }
0x1453   :  { %s2973_s7 = spop %2972  ;;  %2842 = vmatpush3.bf16.xpose.msra.mxu0 %v3435_v32  ;;  %2849 = vmatprep.mubr.msk.bf16.mxu0 %vm3150_vm1, %v3149_v6 }
0x1454   :  { %v1603_v31 = vstv %s2973_s7  ;;  %s2975_s9 = spop %2974  ;;  %2843 = vmatprep.subr.bf16.mxu0 %v3149_v6 }
0x1455   :  { %v1604_v57 = vmul.f32 %v1603_v31, %v3615_v23  ;;  %s1619_s10 = smul.f32 0.0625, %s2975_s9 }
0x1457   :  { %v1685_v60 = vsel %vm512_vm4, %v1563_v34, %v1604_v57  ;;  %v1620_v61 = vstv %s1619_s10 }
0x1458   :  { %v1621_v62 = vsub.f32 %v3590_v3, %v1620_v61 }
0x145a   :  { %v1622_v39 = vmul.f32 %v1621_v62, %v1621_v62 }
0x145b   :  { %2844 = vmatpush3.bf16.xpose.msra.mxu0 %v3441_v33 }
0x145c   :  { %v1624_v32 = vrot.slane %v1622_v39, 4  ;;  %2845 = vmatprep.subr.bf16.mxu0 %v3149_v6 }
0x145e   :  { %v1626_v27 = vsel %vm355_vm3, %v1624_v32, 0.0 }
0x145f   :  { %1627 = vadd.xlane.f32.xlu1 %v1626_v27 }
0x1463   :  { %1648 = vadd.xlane.f32.xlu1 %v1647_v59  ;;  %2846 = vmatpush3.bf16.xpose.msra.mxu0 %v3447_v35 }
0x1464   :  { %2847 = vmatprep.subr.bf16.mxu0 %v3149_v6 }
0x146b   :  { %2848 = vmatpush3.bf16.xpose.msra.mxu0 %v3453_v36 }
0x146c   :  { %2859 = vmatprep.subr.bf16.mxu0 %v3149_v6 }
0x14e8   :  { %v1628_v33 = vpop.xlane.xlu1 %1627 }
0x14e9   :  { %v1629_v23 = vrot.slane %v1628_v33, 4 }
0x14eb   :  { %v1630_v45 = vadd.f32 %v1629_v23, %v1628_v33 }
0x14ec   :  { %v1649_v44 = vpop.xlane.xlu1 %1648 }
0x14ed   :  { %v1631_v46 = vrot.slane %v1630_v45, 2  ;;  %v1650_v52 = vrot.slane %v1649_v44, 4 }
0x14ef   :  { %v1632_v47 = vadd.f32 %v1631_v46, %v1630_v45  ;;  %v1651_v54 = vadd.f32 %v1650_v52, %v1649_v44 }
0x14f1   :  { %v1633_v43 = vrot.slane %v1632_v47, 1  ;;  %v1652_v42 = vrot.slane %v1651_v54, 2 }
0x14f3   :  { %v1634_v37 = vadd.f32 %v1633_v43, %v1632_v47  ;;  %v1653_v56 = vadd.f32 %v1652_v42, %v1651_v54 }
0x14f5   :  { %2976 = vpush %v1634_v37  ;;  %v1654_v41 = vrot.slane %v1653_v56, 1 }
0x14f7   :  { %v1655_v5 = vadd.f32 %v1654_v41, %v1653_v56 }
0x1512   :  { %v3679_v48 = vpop.f32.mrf.mxu0 }
0x1513   :  { %v1812_v49 = vrot.slane %v3679_v48, 6  ;;  %v1696_v15 = vsel %vm355_vm3, %v3679_v48, 0.0 }
0x1514   :  { %v2827_v51 = vpop.f32.mrf.mxu0 }
0x1515   :  { %v1814_v35 = vsel %vm355_vm3, %v1812_v49, 0.0  ;;  %v1732_v51 = vrot.slane %v3679_v48, 2 }
0x1516   :  { %1815 = vadd.xlane.f32.xlu0 %v1814_v35  ;;  %v1526_v13 = vpop.f32.mrf.mxu0 }
0x1517   :  { %v1734_v35 = vsel %vm355_vm3, %v1732_v51, 0.0 }
0x1518   :  { %v2828_v36 = vpop.f32.mrf.mxu0 }
0x1526   :  { %s2977_s4 = spop %2976 }
0x1527   :  { %s1638_s11 = smul.f32 0.0625, %s2977_s4 }
0x1529   :  { %s1639_s1 = sadd.f32 1e-05, %s1638_s11 }
0x152b   :  { %v1640_v55 = vstv %s1639_s1 }
0x152c   :  { %3099 = vrsqrt.f32 %v1640_v55 }
0x1539   :  { %v3100_v58 = vpop.eup %3099 }
0x153a   :  { %2978 = vpush %v3100_v58 }
0x153b   :  { %2980 = vpush %v1655_v5 }
0x156b   :  { %s2979_s2 = spop %2978 }
0x156c   :  { %v1643_v7 = vstv %s2979_s2  ;;  %s2981_s12 = spop %2980 }
0x156d   :  { %v1644_v8 = vmul.f32 %v1643_v7, %v1621_v62  ;;  %s1659_s16 = smul.f32 0.0625, %s2981_s12 }
0x156f   :  { %v1686_v9 = vsel %vm514_vm5, %v1685_v60, %v1644_v8  ;;  %v1660_v10 = vstv %s1659_s16 }
0x1570   :  { %v1661_v0 = vsub.f32 %v3590_v3, %v1660_v10 }
0x1572   :  { %v1662_v20 = vmul.f32 %v1661_v0, %v1661_v0 }
0x1574   :  { %v1664_v11 = vrot.slane %v1662_v20, 6 }
0x1576   :  { %v1666_v12 = vsel %vm355_vm3, %v1664_v11, 0.0 }
0x1577   :  { %1667 = vadd.xlane.f32.xlu1 %v1666_v12 }
0x157b   :  { %1697 = vadd.xlane.f32.xlu1 %v1696_v15 }
0x1600   :  { %v1668_v16 = vpop.xlane.xlu1 %1667 }
0x1601   :  { %v1669_v17 = vrot.slane %v1668_v16, 4 }
0x1603   :  { %v1670_v22 = vadd.f32 %v1669_v17, %v1668_v16 }
0x1604   :  { %v1698_v34 = vpop.xlane.xlu1 %1697 }
0x1605   :  { %v1671_v28 = vrot.slane %v1670_v22, 2  ;;  %v1699_v57 = vrot.slane %v1698_v34, 4 }
0x1607   :  { %v1672_v14 = vadd.f32 %v1671_v28, %v1670_v22  ;;  %v1700_v3 = vadd.f32 %v1699_v57, %v1698_v34 }
0x1609   :  { %v1673_v30 = vrot.slane %v1672_v14, 1  ;;  %v1701_v61 = vrot.slane %v1700_v3, 2 }
0x160b   :  { %v1674_v31 = vadd.f32 %v1673_v30, %v1672_v14  ;;  %v1702_v62 = vadd.f32 %v1701_v61, %v1700_v3 }
0x160d   :  { %2982 = vpush %v1674_v31  ;;  %v1703_v39 = vrot.slane %v1702_v62, 1  ;;  %v1772_v31 = vrot.slane %v3679_v48, 4 }
0x160f   :  { %v1704_v27 = vadd.f32 %v1703_v39, %v1702_v62  ;;  %v1774_v34 = vsel %vm355_vm3, %v1772_v31, 0.0 }
0x163e   :  { %s2983_s17 = spop %2982 }
0x163f   :  { %s1678_s18 = smul.f32 0.0625, %s2983_s17 }
0x1641   :  { %s1679_s19 = sadd.f32 1e-05, %s1678_s18 }
0x1643   :  { %v1680_v60 = vstv %s1679_s19 }
0x1644   :  { %3101 = vrsqrt.f32 %v1680_v60 }
0x1651   :  { %v3102_v32 = vpop.eup %3101 }
0x1652   :  { %2984 = vpush %v3102_v32 }
0x1653   :  { %2986 = vpush %v1704_v27 }
0x1683   :  { %s2985_s21 = spop %2984 }
0x1684   :  { %v1683_v40 = vstv %s2985_s21  ;;  %s2987_s22 = spop %2986 }
0x1685   :  { %v1684_v59 = vmul.f32 %v1683_v40, %v1661_v0  ;;  %s1708_s23 = smul.f32 0.0625, %s2987_s22 }
0x1687   :  { %v1687_v33 = vsel %vm516_vm6, %v1686_v9, %v1684_v59  ;;  %v1709_v23 = vstv %s1708_s23 }
0x1688   :  { %v1688_v45 = vmul.f32 %v1687_v33, %v3426_v1  ;;  %v3691_v46 = vsub.f32 %v3679_v48, %v1709_v23 }
0x168a   :  { %v1689_v47 = vadd.f32 %v1688_v45, %v3430_v26  ;;  %v1711_v43 = vmul.f32 %v3691_v46, %v3691_v46 }
0x168c   :  { %v2558_v37 = vmul.f32 -1.442695, %v1689_v47  ;;  %v1712_v49 = vsel %vm355_vm3, %v1711_v43, 0.0 }
0x168d   :  { %1713 = vadd.xlane.f32.xlu1 %v1712_v49 }
0x168e   :  { %3103 = vpow2.f32 %v2558_v37 }
0x1691   :  { %1735 = vadd.xlane.f32.xlu1 %v1734_v35 }
0x169b   :  { %v3104_v13 = vpop.eup %3103 }
0x169c   :  { %v1693_v1 = vadd.f32 1.0, %v3104_v13 }
0x169e   :  { %3105 = vrcp.f32 %v1693_v1 }
0x16ab   :  { %v3106_v36 = vpop.eup %3105 }
0x16ac   :  { %v1863_v44 = vpack.c.bf16 %v3106_v36, %v3106_v36 }
0x16ae   :  { %2838 = vmatmul.mubr.msk.bf16.vlgmr.msra.gmra.mxu1 %vm711_vm7, %v1863_v44 }
0x16af   :  { %2854 = vmatpush3.bf16.msra.mxu1 %v3475_v53  ;;  %2855 = vmatprep.mubr.msk.bf16.mxu1 %vm3150_vm1, %v3149_v6 }
0x16b0   :  { %2865 = vmatprep.subr.bf16.mxu1 %v3149_v6 }
0x1716   :  { %v1714_v26 = vpop.xlane.xlu1 %1713 }
0x1717   :  { %v1715_v52 = vrot.slane %v1714_v26, 4 }
0x1719   :  { %v1716_v54 = vadd.f32 %v1715_v52, %v1714_v26 }
0x171a   :  { %v1736_v58 = vpop.xlane.xlu1 %1735 }
0x171b   :  { %v1717_v55 = vrot.slane %v1716_v54, 2  ;;  %v1737_v5 = vrot.slane %v1736_v58, 4 }
0x171d   :  { %v1718_v42 = vadd.f32 %v1717_v55, %v1716_v54  ;;  %v1738_v7 = vadd.f32 %v1737_v5, %v1736_v58 }
0x171f   :  { %v1719_v56 = vrot.slane %v1718_v42, 1  ;;  %v1739_v8 = vrot.slane %v1738_v7, 2 }
0x1721   :  { %v1720_v41 = vadd.f32 %v1719_v56, %v1718_v42  ;;  %v1740_v9 = vadd.f32 %v1739_v8, %v1738_v7 }
0x1723   :  { %2988 = vpush %v1720_v41  ;;  %v1741_v10 = vrot.slane %v1740_v9, 1 }
0x1725   :  { %v1742_v20 = vadd.f32 %v1741_v10, %v1740_v9 }
0x1754   :  { %s2989_s24 = spop %2988 }
0x1755   :  { %s1724_s25 = smul.f32 0.0625, %s2989_s24  ;;  %s3168_s24 = smov 48  }
0x1757   :  { %s1725_s0 = sadd.f32 1e-05, %s1724_s25  ;;  %s3169_s25 = smov 16  }
0x1759   :  { %v1726_v53 = vstv %s1725_s0 }
0x175a   :  { %3107 = vrsqrt.f32 %v1726_v53 }
0x1767   :  { %v3108_v0 = vpop.eup %3107 }
0x1768   :  { %2990 = vpush %v3108_v0 }
0x1769   :  { %2992 = vpush %v1742_v20 }
0x176e   :  { %v3704_v11 = vpop.f32.mrf.mxu1 }
0x1770   :  { %v2839_v12 = vpop.f32.mrf.mxu1 }
0x1772   :  { %v1904_v15 = vpop.f32.mrf.mxu1 }
0x1774   :  { %v2840_v16 = vpop.f32.mrf.mxu1 }
0x1799   :  { %s3706_s26 = spop %2990 }
0x179a   :  { %s2993_s27 = spop %2992  ;;  %v1729_v49 = vstv %s3706_s26 }
0x179b   :  { %s1746_s28 = smul.f32 0.0625, %s2993_s27  ;;  %v1730_v35 = vmul.f32 %v1729_v49, %v3691_v46  ;;  %v1816_v46 = vpop.xlane.xlu0 %1815 }
0x179c   :  { %v1817_v53 = vrot.slane %v1816_v46, 4 }
0x179d   :  { %v1747_v17 = vstv %s1746_s28 }
0x179e   :  { %v1748_v22 = vsub.f32 %v3679_v48, %v1747_v17  ;;  %v1818_v8 = vadd.f32 %v1817_v53, %v1816_v46 }
0x17a0   :  { %v1749_v28 = vmul.f32 %v1748_v22, %v1748_v22  ;;  %v1819_v10 = vrot.slane %v1818_v8, 2 }
0x17a2   :  { %v1751_v14 = vrot.slane %v1749_v28, 2  ;;  %v1820_v0 = vadd.f32 %v1819_v10, %v1818_v8 }
0x17a4   :  { %v1753_v30 = vsel %vm355_vm3, %v1751_v14, 0.0  ;;  %v1821_v20 = vrot.slane %v1820_v0, 1 }
0x17a5   :  { %1754 = vadd.xlane.f32.xlu1 %v1753_v30 }
0x17a6   :  { %v1822_v15 = vadd.f32 %v1821_v20, %v1820_v0 }
0x17a9   :  { %1775 = vadd.xlane.f32.xlu1 %v1774_v34 }
0x182e   :  { %v1755_v57 = vpop.xlane.xlu1 %1754 }
0x182f   :  { %v1756_v3 = vrot.slane %v1755_v57, 4 }
0x1831   :  { %v1757_v60 = vadd.f32 %v1756_v3, %v1755_v57  ;;  %v1907_v57 = vmul.f32 8.0, %v3704_v11 }
0x1832   :  { %v1776_v27 = vpop.xlane.xlu1 %1775 }
0x1833   :  { %v1758_v61 = vrot.slane %v1757_v60, 2  ;;  %v1777_v40 = vrot.slane %v1776_v27, 4 }
0x1835   :  { %v1759_v62 = vadd.f32 %v1758_v61, %v1757_v60  ;;  %v1778_v59 = vadd.f32 %v1777_v40, %v1776_v27 }
0x1837   :  { %v1760_v39 = vrot.slane %v1759_v62, 1  ;;  %v1779_v23 = vrot.slane %v1778_v59, 2 }
0x1839   :  { %v1761_v32 = vadd.f32 %v1760_v39, %v1759_v62  ;;  %v1780_v45 = vadd.f32 %v1779_v23, %v1778_v59 }
0x183b   :  { %2994 = vpush %v1761_v32  ;;  %v1781_v47 = vrot.slane %v1780_v45, 1 }
0x183d   :  { %v1782_v37 = vadd.f32 %v1781_v47, %v1780_v45 }
0x186c   :  { %s2995_s5 = spop %2994 }
0x186d   :  { %s1765_s29 = smul.f32 0.0625, %s2995_s5 }
0x186f   :  { %s1766_s30 = sadd.f32 1e-05, %s1765_s29 }
0x1871   :  { %v1767_v33 = vstv %s1766_s30 }
0x1872   :  { %3109 = vrsqrt.f32 %v1767_v33 }
0x187f   :  { %v3110_v43 = vpop.eup %3109 }
0x1880   :  { %2996 = vpush %v3110_v43 }
0x1881   :  { %2998 = vpush %v1782_v37 }
0x18b1   :  { %s2997_s7 = spop %2996 }
0x18b2   :  { %v1770_v51 = vstv %s2997_s7  ;;  %s2999_s9 = spop %2998 }
0x18b3   :  { %v1771_v13 = vmul.f32 %v1770_v51, %v1748_v22  ;;  %s1786_s10 = smul.f32 0.0625, %s2999_s9 }
0x18b5   :  { %v1852_v1 = vsel %vm512_vm4, %v1730_v35, %v1771_v13  ;;  %v1787_v36 = vstv %s1786_s10  ;;  %v3148_v35 = vld [vmem:[%s3827_s6] sm:$0xff]   ;;  %s3167_s6 = smov 32  }
0x18b6   :  { %v1788_v44 = vsub.f32 %v3679_v48, %v1787_v36 }
0x18b8   :  { %v1789_v26 = vmul.f32 %v1788_v44, %v1788_v44 }
0x18ba   :  { %v1791_v52 = vrot.slane %v1789_v26, 4 }
0x18bc   :  { %v1793_v54 = vsel %vm355_vm3, %v1791_v52, 0.0 }
0x18bd   :  { %1794 = vadd.xlane.f32.xlu1 %v1793_v54 }
0x1946   :  { %v1795_v55 = vpop.xlane.xlu1 %1794 }
0x1947   :  { %v1796_v42 = vrot.slane %v1795_v55, 4 }
0x1949   :  { %v1797_v56 = vadd.f32 %v1796_v42, %v1795_v55 }
0x194b   :  { %v1798_v41 = vrot.slane %v1797_v56, 2 }
0x194d   :  { %v1799_v58 = vadd.f32 %v1798_v41, %v1797_v56 }
0x194f   :  { %v1800_v5 = vrot.slane %v1799_v58, 1 }
0x1951   :  { %v1801_v7 = vadd.f32 %v1800_v5, %v1799_v58 }
0x1953   :  { %3000 = vpush %v1801_v7 }
0x1984   :  { %s3001_s4 = spop %3000 }
0x1985   :  { %s1805_s11 = smul.f32 0.0625, %s3001_s4 }
0x1987   :  { %s1806_s1 = sadd.f32 1e-05, %s1805_s11 }
0x1989   :  { %v1807_v9 = vstv %s1806_s1 }
0x198a   :  { %3111 = vrsqrt.f32 %v1807_v9 }
0x1997   :  { %v3112_v12 = vpop.eup %3111 }
0x1998   :  { %3002 = vpush %v3112_v12 }
0x1999   :  { %3004 = vpush %v1822_v15 }
0x19c9   :  { %s3003_s2 = spop %3002 }
0x19ca   :  { %v1810_v16 = vstv %s3003_s2  ;;  %s3005_s12 = spop %3004 }
0x19cb   :  { %v1811_v17 = vmul.f32 %v1810_v16, %v1788_v44  ;;  %s1826_s16 = smul.f32 0.0625, %s3005_s12 }
0x19cd   :  { %v1853_v22 = vsel %vm514_vm5, %v1852_v1, %v1811_v17  ;;  %v1827_v28 = vstv %s1826_s16 }
0x19ce   :  { %v1828_v14 = vsub.f32 %v3679_v48, %v1827_v28 }
0x19d0   :  { %v1829_v30 = vmul.f32 %v1828_v14, %v1828_v14 }
0x19d2   :  { %v1831_v31 = vrot.slane %v1829_v30, 6 }
0x19d4   :  { %v1833_v34 = vsel %vm355_vm3, %v1831_v31, 0.0 }
0x19d5   :  { %1834 = vadd.xlane.f32.xlu1 %v1833_v34 }
0x19e6   :  { %1954 = vrot.lane.b32.xlu1 %v1907_v57, %s3165_s20 }
0x1a5e   :  { %v1835_v3 = vpop.xlane.xlu1 %1834 }
0x1a5f   :  { %v1836_v60 = vrot.slane %v1835_v3, 4 }
0x1a61   :  { %v1837_v61 = vadd.f32 %v1836_v60, %v1835_v3 }
0x1a62   :  { %v1955_v44 = vpop.permute.xlu1 %1954 }
0x1a63   :  { %v1838_v62 = vrot.slane %v1837_v61, 2  ;;  %v1957_v26 = vmul.f32 %v1955_v44, %v3336_v19 }
0x1a65   :  { %v1839_v39 = vadd.f32 %v1838_v62, %v1837_v61 }
0x1a67   :  { %v1840_v32 = vrot.slane %v1839_v39, 1 }
0x1a69   :  { %v1841_v27 = vadd.f32 %v1840_v32, %v1839_v39 }
0x1a6b   :  { %3006 = vpush %v1841_v27 }
0x1a9c   :  { %s3007_s17 = spop %3006 }
0x1a9d   :  { %s1845_s18 = smul.f32 0.0625, %s3007_s17 }
0x1a9f   :  { %s1846_s19 = sadd.f32 1e-05, %s1845_s18 }
0x1aa1   :  { %v1847_v48 = vstv %s1846_s19 }
0x1aa2   :  { %3113 = vrsqrt.f32 %v1847_v48 }
0x1aaf   :  { %v3114_v40 = vpop.eup %3113 }
0x1ab0   :  { %3008 = vpush %v3114_v40 }
0x1ae1   :  { %s3009_s21 = spop %3008 }
0x1ae2   :  { %v1850_v59 = vstv %s3009_s21 }
0x1ae3   :  { %v1851_v11 = vmul.f32 %v1850_v59, %v1828_v14 }
0x1ae5   :  { %v1854_v33 = vsel %vm516_vm6, %v1853_v22, %v1851_v11 }
0x1ae6   :  { %v1855_v23 = vmul.f32 %v1854_v33, %v3460_v38 }
0x1ae8   :  { %v1856_v45 = vadd.f32 %v1855_v23, %v3465_v29 }
0x1aea   :  { %v2559_v47 = vmul.f32 -1.442695, %v1856_v45 }
0x1aec   :  { %3115 = vpow2.f32 %v2559_v47 }
0x1af9   :  { %v3116_v43 = vpop.eup %3115 }
0x1afa   :  { %v1860_v37 = vadd.f32 1.0, %v3116_v43 }
0x1afc   :  { %3117 = vrcp.f32 %v1860_v37 }
0x1b09   :  { %v3118_v49 = vpop.eup %3117 }
0x1b0a   :  { %v1908_v51 = vpack.c.bf16 %v3118_v49, %v3118_v49 }
0x1b0c   :  { %2850 = vmatmul.mubr.msk.bf16.vlgmr.msra.gmra.mxu0 %vm711_vm7, %v1908_v51 }
0x1b0d   :  { %2860 = vmatpush3.bf16.msra.mxu0 %v3148_v35  ;;  %2861 = vmatprep.mubr.msk.bf16.mxu0 %vm3150_vm1, %v3149_v6 }
0x1b0e   :  { %2871 = vmatprep.subr.bf16.mxu0 %v3149_v6 }
0x1bcc   :  { %v1946_v38 = vpop.f32.mrf.mxu0 }
0x1bcd   :  { %v1952_v29 = vmul.f32 8.0, %v1946_v38 }
0x1bce   :  { %v2851_v13 = vpop.f32.mrf.mxu0 }
0x1bcf   :  { %1959 = vrot.lane.b32.xlu1 %v1952_v29, %s3165_s20 }
0x1bd0   :  { %v1949_v1 = vpop.f32.mrf.mxu0 }
0x1bd2   :  { %v2852_v36 = vpop.f32.mrf.mxu0 }
0x1c41   :  { %v1960_v52 = vpop.permute.xlu1 %1959 }
0x1c42   :  { %v3734_v54 = vmul.f32 %v1960_v52, %v1957_v26 }
0x1c44   :  { %v1963_v55 = vpack.c.bf16 %v3734_v54, %v3734_v54 }
0x1c46   :  { %2055 = vrot.lane.b32.xlu0 %v1963_v55, %s3167_s6  ;;  %1965 = vrot.lane.b32.xlu1 %v1963_v55, %s3165_s20 }
0x1c4a   :  { %2010 = vrot.lane.b32.xlu1 %v1963_v55, %s3168_s24 }
0x1c4e   :  { %2100 = vrot.lane.b32.xlu1 %v1963_v55, %s3169_s25 }
0x1cb8   :  { %v1966_v42 = vpop.permute.xlu1 %1965  ;;  %v2056_v56 = vpop.permute.xlu0 %2055 }
0x1cb9   :  { %2856 = vmatmul.mubr.msk.bf16.vlgmr.msra.gmra.mxu1 %vm834_vm8, %v1966_v42 }
0x1cba   :  { %2866 = vmatpush3.bf16.msra.mxu1 %v3148_v35  ;;  %2867 = vmatprep.mubr.msk.bf16.mxu1 %vm3150_vm1, %v3149_v6 }
0x1cbb   :  { %2877 = vmatprep.subr.bf16.mxu1 %v3149_v6 }
0x1cbc   :  { %v2011_v19 = vpop.permute.xlu1 %2010 }
0x1cbd   :  { %2862 = vmatmul.mubr.msk.bf16.vlgmr.msra.gmra.mxu0 %vm834_vm8, %v2011_v19 }
0x1cbe   :  { %2872 = vmatpush3.bf16.msra.mxu0 %v3148_v35  ;;  %2873 = vmatprep.mubr.msk.bf16.mxu0 %vm3150_vm1, %v3149_v6 }
0x1cbf   :  { %2883 = vmatprep.subr.bf16.mxu0 %v3149_v6 }
0x1cc0   :  { %v2101_v41 = vpop.permute.xlu1 %2100 }
0x1cc1   :  { %2868 = vmatmul.mubr.msk.bf16.vlgmr.msra.gmra.mxu1 %vm834_vm8, %v2056_v56 }
0x1cc2   :  { %2879 = vmatprep.mubr.msk.bf16.mxu1 %vm3150_vm1, %v3149_v6 }
0x1cc5   :  { %2874 = vmatmul.mubr.msk.bf16.vlgmr.msra.gmra.mxu0 %vm834_vm8, %v2101_v41 }
0x1cc6   :  { %2885 = vmatprep.mubr.msk.bf16.mxu0 %vm3150_vm1, %v3149_v6 }
0x1d79   :  { %v2004_v58 = vpop.f32.mrf.mxu1 }
0x1d7b   :  { %v2857_v5 = vpop.f32.mrf.mxu1 }
0x1d7d   :  { %v2007_v7 = vpop.f32.mrf.mxu1  ;;  %v2049_v46 = vpop.f32.mrf.mxu0 }
0x1d7e   :  { %2146 = vrot.lane.b32.xlu1 %v2049_v46, %s3158_s13 }
0x1d7f   :  { %v2858_v53 = vpop.f32.mrf.mxu1  ;;  %v2863_v8 = vpop.f32.mrf.mxu0 }
0x1d81   :  { %v2052_v9 = vpop.f32.mrf.mxu0  ;;  %v2094_v10 = vpop.f32.mrf.mxu1 }
0x1d82   :  { %2150 = vrot.lane.b32.xlu1 %v2094_v10, %s3159_s14 }
0x1d83   :  { %v2864_v0 = vpop.f32.mrf.mxu0  ;;  %v2869_v20 = vpop.f32.mrf.mxu1 }
0x1d85   :  { %v2097_v12 = vpop.f32.mrf.mxu1  ;;  %v2139_v15 = vpop.f32.mrf.mxu0 }
0x1d86   :  { %2154 = vrot.lane.b32.xlu1 %v2139_v15, %s3160_s15 }
0x1d87   :  { %v2870_v16 = vpop.f32.mrf.mxu1  ;;  %v2875_v17 = vpop.f32.mrf.mxu0 }
0x1d89   :  { %v2142_v22 = vpop.f32.mrf.mxu0 }
0x1d8b   :  { %v2876_v28 = vpop.f32.mrf.mxu0 }
0x1df0   :  { %v2147_v14 = vpop.permute.xlu1 %2146 }
0x1df1   :  { %v2157_v31 = vsel %vm1026_vm9, %v2004_v58, %v2147_v14 }
0x1df4   :  { %v2151_v30 = vpop.permute.xlu1 %2150 }
0x1df5   :  { %v2158_v34 = vsel %vm711_vm7, %v2157_v31, %v2151_v30 }
0x1df8   :  { %v2155_v57 = vpop.permute.xlu1 %2154 }
0x1df9   :  { %v2159_v3 = vsel %vm1029_vm10, %v2158_v34, %v2155_v57  ;;  %v1317_v34 = vsel %vm1200_vm12, %v3655_v24, 0.0 }
0x1dfa   :  { %v2160_v60 = vsel %vm834_vm8, %v2159_v3, 0.0 }
0x1dfb   :  { %2161 = vadd.xlane.f32.xlu1 %v2160_v60 }
0x1e84   :  { %v2162_v61 = vpop.xlane.xlu1 %2161 }
0x1e85   :  { %v2163_v62 = vrot.slane %v2162_v61, 4 }
0x1e87   :  { %v2164_v39 = vadd.f32 %v2163_v62, %v2162_v61 }
0x1e89   :  { %v2165_v32 = vrot.slane %v2164_v39, 2 }
0x1e8b   :  { %v2166_v27 = vadd.f32 %v2165_v32, %v2164_v39 }
0x1e8d   :  { %v2167_v48 = vrot.slane %v2166_v27, 1 }
0x1e8f   :  { %v2168_v40 = vadd.f32 %v2167_v48, %v2166_v27 }
0x1e91   :  { %3010 = vpush %v2168_v40 }
0x1ec2   :  { %s3011_s13 = spop %3010 }
0x1ec3   :  { %s2172_s14 = smul.f32 0.0078125, %s3011_s13 }
0x1ec5   :  { %v2173_v59 = vstv %s2172_s14 }
0x1ec6   :  { %v2174_v11 = vsub.f32 %v2159_v3, %v2173_v59  ;;  %v1201_v3 = vsel %vm1200_vm12, %v3653_v18, 0.0 }
0x1ec8   :  { %v2175_v33 = vmul.f32 %v2174_v11, %v2174_v11 }
0x1eca   :  { %v2176_v23 = vsel %vm834_vm8, %v2175_v33, 0.0 }
0x1ecb   :  { %2177 = vadd.xlane.f32.xlu0 %v2176_v23 }
0x1f54   :  { %v2178_v45 = vpop.xlane.xlu0 %2177 }
0x1f55   :  { %v2179_v47 = vrot.slane %v2178_v45, 4 }
0x1f57   :  { %v2180_v43 = vadd.f32 %v2179_v47, %v2178_v45 }
0x1f59   :  { %v2181_v37 = vrot.slane %v2180_v43, 2 }
0x1f5b   :  { %v2182_v49 = vadd.f32 %v2181_v37, %v2180_v43 }
0x1f5d   :  { %v2183_v51 = vrot.slane %v2182_v49, 1 }
0x1f5f   :  { %v2184_v35 = vadd.f32 %v2183_v51, %v2182_v49 }
0x1f61   :  { %3012 = vpush %v2184_v35 }
0x1f92   :  { %s3013_s15 = spop %3012 }
0x1f93   :  { %s2188_s20 = smul.f32 0.0078125, %s3013_s15 }
0x1f95   :  { %s2189_s0 = sadd.f32 1e-05, %s2188_s20 }
0x1f97   :  { %v2190_v38 = vstv %s2189_s0 }
0x1f98   :  { %3119 = vrsqrt.f32 %v2190_v38 }
0x1fa5   :  { %v3120_v29 = vpop.eup %3119 }
0x1fa6   :  { %3014 = vpush %v3120_v29 }
0x1fd7   :  { %s3015_s26 = spop %3014 }
0x1fd8   :  { %v2193_v13 = vstv %s3015_s26 }
0x1fd9   :  { %v2194_v1 = vmul.f32 %v2193_v13, %v2174_v11 }
0x1fdb   :  { %v2195_v36 = vmul.f32 %v2194_v1, %v3525_v21 }
0x1fdd   :  { %v2196_v44 = vadd.f32 %v2195_v36, %v3523_v50 }
0x1fdf   :  { %v2198_v26 = vmul.f32 %v2196_v44, %v3528_v25  ;;  %v2199_v52 = vmul.f32 %v2196_v44, %v3622_v2  ;;  %v2197_v41 = vmul.f32 %v2196_v44, %v3535_v4 }
0x1fe1   :  { %v2201_v55 = vpack.c.bf16 %v2198_v26, %v2198_v26  ;;  %v3765_v42 = vpack.c.bf16 %v2199_v52, %v2199_v52  ;;  %v2200_v21 = vpack.c.bf16 %v2197_v41, %v2197_v41 }
0x1fe3   :  { %v2207_v19 = vsel %vm834_vm8, %v2201_v55, 0  ;;  %v2266_v56 = vsel %vm512_vm4, %v3765_v42, 0  ;;  %v2315_v50 = vrot.slane %v2201_v55, 2  ;;  %v2313_v2 = vrot.slane %v2200_v21, 2 }
0x1fe4   :  { %2878 = vmatpush3.bf16.xpose.msra.mxu1 %v2207_v19  ;;  %2884 = vmatpush3.bf16.msra.mxu0 %v2266_v56  ;;  %v2376_v18 = vrot.slane %v3765_v42, 2 }
0x1fe5   :  { %2889 = vmatprep.subr.bf16.mxu1 %v3149_v6  ;;  %2895 = vmatprep.subr.bf16.mxu0 %v3149_v6  ;;  %v2320_v25 = vsel %vm834_vm8, %v2315_v50, 0 }
0x1fe6   :  { %v2381_v45 = vsel %vm512_vm4, %v2376_v18, 0 }
0x1feb   :  { %2880 = vmatmul.mubr.msk.bf16.vlgmr.msra.gmra.mxu1 %vm834_vm8, %v2200_v21 }
0x1fec   :  { %2890 = vmatpush3.bf16.xpose.msra.mxu1 %v2320_v25  ;;  %2891 = vmatprep.mubr.msk.bf16.mxu1 %vm3150_vm1, %v3149_v6 }
0x1ff3   :  { %2892 = vmatmul.mubr.msk.bf16.vlgmr.msra.gmra.mxu1 %vm834_vm8, %v2313_v2 }
0x20ab   :  { %v2243_v58 = vpop.f32.mrf.mxu1 }
0x20ac   :  { %v2249_v5 = vmul.f32 0.5, %v2243_v58 }
0x20ad   :  { %v2881_v4 = vpop.f32.mrf.mxu1 }
0x20ae   :  { %v2250_v7 = vsel %vm1141_vm11, %v2249_v5, -inf  ;;  %v3059_v4 = vld [vmem:[%s3828_s3] sm:$0xff]  }
0x20af   :  { %2251 = vmax.xlane.f32.xlu0 %v2250_v7  ;;  %v2246_v46 = vpop.f32.mrf.mxu1  ;;  %2903 = vmatprep.mubr.msk.bf16.mxu1 %vm711_vm7, %v3059_v4 }
0x20b1   :  { %v2882_v53 = vpop.f32.mrf.mxu1 }
0x20b3   :  { %v2356_v8 = vpop.f32.mrf.mxu1 }
0x20b4   :  { %v2362_v9 = vmul.f32 0.5, %v2356_v8 }
0x20b5   :  { %v2893_v10 = vpop.f32.mrf.mxu1 }
0x20b6   :  { %v2363_v0 = vsel %vm1141_vm11, %v2362_v9, -inf }
0x20b7   :  { %2364 = vmax.xlane.f32.xlu1 %v2363_v0  ;;  %v2359_v20 = vpop.f32.mrf.mxu1 }
0x20b8   :  { %v3060_v20 = vld [vmem:[%s3828_s3 + $0x8] sm:$0xff]  }
0x20b9   :  { %v2894_v12 = vpop.f32.mrf.mxu1 }
0x2138   :  { %v2252_v15 = vpop.xlane.xlu0 %2251 }
0x2139   :  { %v2253_v16 = vsub.f32 %v2249_v5, %v2252_v15 }
0x213b   :  { %v2254_v17 = vmul.f32 1.442695, %v2253_v16 }
0x213d   :  { %3121 = vpow2.f32 %v2254_v17 }
0x2140   :  { %v2365_v22 = vpop.xlane.xlu1 %2364 }
0x2141   :  { %v2366_v28 = vsub.f32 %v2362_v9, %v2365_v22 }
0x2143   :  { %v2367_v14 = vmul.f32 1.442695, %v2366_v28 }
0x2145   :  { %3123 = vpow2.f32 %v2367_v14 }
0x214a   :  { %v3122_v30 = vpop.eup %3121 }
0x214b   :  { %v2256_v31 = vsel %vm1141_vm11, %v3122_v30, 0.0 }
0x214c   :  { %2257 = vadd.xlane.f32.xlu0 %v2256_v31 }
0x2150   :  { %1318 = vadd.xlane.f32.xlu0 %v1317_v34 }
0x2152   :  { %v3124_v57 = vpop.eup %3123 }
0x2153   :  { %v2369_v60 = vsel %vm1141_vm11, %v3124_v57, 0.0 }
0x2154   :  { %1202 = vadd.xlane.f32.xlu0 %v1201_v3  ;;  %2370 = vadd.xlane.f32.xlu1 %v2369_v60 }
0x21d5   :  { %v2258_v61 = vpop.xlane.xlu0 %2257 }
0x21d6   :  { %3125 = vrcp.f32 %v2258_v61 }
0x21d9   :  { %v1319_v62 = vpop.xlane.xlu0 %1318 }
0x21da   :  { %v1320_v39 = vmul.f32 0.0625, %v1319_v62 }
0x21dc   :  { %v1322_v48 = vrot.slane %v1320_v39, 4 }
0x21dd   :  { %v1203_v32 = vpop.xlane.xlu0 %1202  ;;  %v2371_v27 = vpop.xlane.xlu1 %2370 }
0x21de   :  { %v1205_v40 = vmul.f32 0.0625, %v1203_v32  ;;  %3127 = vrcp.f32 %v2371_v27 }
0x21e0   :  { %v1324_v24 = vsel %vm514_vm5, %v1205_v40, %v1322_v48 }
0x21e1   :  { %v2551_v59 = vmul.f32 -1.442695, %v1324_v24 }
0x21e3   :  { %v3126_v11 = vpop.eup %3125  ;;  %3129 = vpow2.f32 %v2551_v59 }
0x21e4   :  { %v2260_v33 = vmul.f32 %v3126_v11, %v3122_v30 }
0x21e6   :  { %v2261_v23 = vpack.c.bf16 %v2260_v33, %v2260_v33 }
0x21e8   :  { %2886 = vmatmul.mubr.msk.bf16.vlgmr.msra.gmra.mxu0 %vm1026_vm9, %v2261_v23 }
0x21e9   :  { %2896 = vmatpush3.bf16.msra.mxu0 %v2381_v45  ;;  %2897 = vmatprep.mubr.msk.bf16.mxu0 %vm3150_vm1, %v3149_v6 }
0x21eb   :  { %v3128_v47 = vpop.eup %3127 }
0x21ec   :  { %v2373_v43 = vmul.f32 %v3128_v47, %v3124_v57 }
0x21ee   :  { %v2374_v37 = vpack.c.bf16 %v2373_v43, %v2373_v43 }
0x21f0   :  { %v3130_v49 = vpop.eup %3129  ;;  %2898 = vmatmul.mubr.msk.bf16.vlgmr.msra.gmra.mxu0 %vm1026_vm9, %v2374_v37 }
0x21f1   :  { %v1328_v51 = vadd.f32 1.0, %v3130_v49 }
0x21f3   :  { %3131 = vrcp.f32 %v1328_v51 }
0x2200   :  { %v3132_v35 = vpop.eup %3131 }
0x2201   :  { %1333 = vperm.xlu0 %3046, %v3132_v35  }
0x227c   :  { %v1334_v7 = vpop.permute.xlu0 %1333 }
0x227d   :  { %v1336_v53 = vmul.f32 %v1334_v7, %v3482_v63 }
0x22a8   :  { %v2302_v38 = vpop.f32.mrf.mxu0 }
0x22a9   :  { %v2308_v52 = vsel %vm1200_vm12, %v2302_v38, 0.0 }
0x22aa   :  { %v2887_v29 = vpop.f32.mrf.mxu0 }
0x22ac   :  { %v2305_v13 = vpop.f32.mrf.mxu0 }
0x22ae   :  { %v2888_v1 = vpop.f32.mrf.mxu0 }
0x22b0   :  { %v2417_v36 = vpop.f32.mrf.mxu0 }
0x22b1   :  { %v2423_v44 = vsel %vm1200_vm12, %v2417_v36, 0.0 }
0x22b2   :  { %2424 = vadd.xlane.f32.xlu1 %v2423_v44  ;;  %v2899_v26 = vpop.f32.mrf.mxu0 }
0x22b4   :  { %v2420_v6 = vpop.f32.mrf.mxu0 }
0x22b6   :  { %2309 = vadd.xlane.f32.xlu1 %v2308_v52  ;;  %v2900_v55 = vpop.f32.mrf.mxu0 }
0x233b   :  { %v2425_v42 = vpop.xlane.xlu1 %2424 }
0x233c   :  { %v2426_v19 = vmul.f32 0.0625, %v2425_v42 }
0x233e   :  { %v2428_v41 = vrot.slane %v2426_v19, 4 }
0x233f   :  { %v2310_v56 = vpop.xlane.xlu1 %2309 }
0x2340   :  { %v2311_v50 = vmul.f32 0.0625, %v2310_v56 }
0x2342   :  { %v2430_v21 = vsel %vm514_vm5, %v2311_v50, %v2428_v41 }
0x2343   :  { %v2570_v25 = vmul.f32 -1.442695, %v2430_v21 }
0x2345   :  { %3133 = vpow2.f32 %v2570_v25 }
0x2352   :  { %v3134_v2 = vpop.eup %3133 }
0x2353   :  { %v2434_v58 = vadd.f32 1.0, %v3134_v2 }
0x2355   :  { %3135 = vrcp.f32 %v2434_v58 }
0x2362   :  { %v3136_v5 = vpop.eup %3135 }
0x2363   :  { %2439 = vperm.xlu1 %3047, %v3136_v5  }
0x23de   :  { %v2440_v46 = vpop.permute.xlu1 %2439 }
0x23df   :  { %v2442_v8 = vmul.f32 %v2440_v46, %v3734_v54 }
0x23e1   :  { %v2443_v9 = vsel %vm139_vm0, %v1336_v53, %v2442_v8 }
0x23e2   :  { %v2444_v10 = vpack.c.bf16 %v2443_v9, %v2443_v9 }
0x23e4   :  { %2907 = vmatprep.subr.msk.bf16.mxu1 %vm514_vm5, %v2444_v10  ;;  %v2462_v0 = vsel %vm514_vm5, %v2444_v10, 0 }
0x23e5   :  { %2902 = vmatpush3.bf16.msra.mxu1 %v2462_v0 }
0x23e8   :  { %2904 = vmatmul.mubr.msk.bf16.vlgmr.msra.gmra.mxu1 %vm711_vm7, %v3060_v20 }
0x24a8   :  { %v2905_v12 = vpop.f32.mrf.mxu1 }
0x24a9   :  { %2515 = vst [vmem:[%s3829_s8 + $0x10] sm:$0xff] %v2905_v12 }
0x24aa   :  { %v2498_v63 = vpop.f32.mrf.mxu1 }
0x24ab   :  { %2513 = vst [vmem:[%s3829_s8] sm:$0xff] %v2498_v63 }
0x24ac   :  { %v2906_v54 = vpop.f32.mrf.mxu1 }
0x24ad   :  { %2516 = vst [vmem:[%s3829_s8 + $0x18] sm:$0xff] %v2906_v54 }
0x24ae   :  { %v2501_v15 = vpop.f32.mrf.mxu1 }
0x24af   :  { %2514 = vst [vmem:[%s3829_s8 + $0x8] sm:$0xff] %v2501_v15 }

</bundles_post_ra>
